<compile_context>
chip_gen: v7x
topology: tpu7x:2x2x1
jax: 0.10.0
libtpu: 0.0.40
codegen_flags: <defaults>
</compile_context>

<pallas_src>
import jax
import jax.numpy as jnp
from jax.experimental import pallas as pl
from jax.experimental.pallas import tpu as pltpu


# ----------------------------------------------------------------------------
# Bias / affine slab layout (all offsets are multiples of 128 lanes)
# ----------------------------------------------------------------------------
_B1, _B2 = (0, 512), (512, 768)
_BM1, _BM2, _BM3, _BM4 = (768, 896), (896, 1024), (1024, 1152), (1152, 1280)
_BF1, _BF2, _BC = (1280, 1536), (1536, 1792), (1792, 1920)
_GAMMA, _BETA = (1920, 2432), (2432, 2944)
_BIAS_LEN = 2944


# ----------------------------------------------------------------------------
# Fused kernel: meta MLP + fc1/GroupNorm/ReLU/fc2 + fusion net + classifier
# ----------------------------------------------------------------------------
def _ol3i_head_kernel(img_ref, meta_ref, w1_ref, g_ref, w2_ref,
                      mslab_ref, fslab_ref, bias_ref, out_ref):
    f32, bf16 = jnp.float32, jnp.bfloat16

    def bias(rng):
        return bias_ref[:, rng[0]:rng[1]]

    # ----- metadata MLP first (deep dependent chain on tiny shapes; lets the
    #       scheduler hide it under the large image-branch matmuls) -----------
    m = meta_ref[...]                                                     # [B,128] bf16
    m = jnp.maximum(jnp.dot(m, mslab_ref[0:128, :],
                            preferred_element_type=f32) + bias(_BM1), 0.0)
    m = jnp.maximum(jnp.dot(m.astype(bf16), mslab_ref[128:256, :],
                            preferred_element_type=f32) + bias(_BM2), 0.0)
    m = jnp.maximum(jnp.dot(m.astype(bf16), mslab_ref[256:384, :],
                            preferred_element_type=f32) + bias(_BM3), 0.0)
    meta_e = jnp.dot(m.astype(bf16), mslab_ref[384:512, :],
                     preferred_element_type=f32) + bias(_BM4)             # [B,128]

    # ----- image branch: fc1 (768 -> 512) ------------------------------------
    x = img_ref[...]                                                      # [B,768] bf16
    if x.dtype != bf16:
        x = x.astype(bf16)
    h = jnp.dot(x, w1_ref[...], preferred_element_type=f32) + bias(_B1)   # [B,512] f32

    # ----- GroupNorm(32, 512), eps=1e-5 --------------------------------------
    # G is a bf16 [512,512] block-diagonal averaging matrix (1/16 within each
    # group, exact in bf16).  Centered two-pass variance: var = mean((h-mu)^2),
    # a sum of non-negatives with f32 accumulation, so var >= 0 (no NaN risk).
    mean = jnp.dot(h.astype(bf16), g_ref[...], preferred_element_type=f32)  # [B,512]
    d = h - mean
    var = jnp.dot((d * d).astype(bf16), g_ref[...], preferred_element_type=f32)
    var = jnp.maximum(var, 0.0)
    h = d * jax.lax.rsqrt(var + 1e-5)
    h = h * bias(_GAMMA) + bias(_BETA)

    # ----- ReLU + fc2 (512 -> 256) -------------------------------------------
    h = jnp.maximum(h, 0.0)
    img_e = jnp.dot(h.astype(bf16), w2_ref[...],
                    preferred_element_type=f32) + bias(_B2)               # [B,256]

    # ----- fusion net on concat([img_e, meta_e]): 384 -> 256 -> 256 ----------
    # concat expressed as a split matmul: cat(a,b) @ W == a @ W[:256] + b @ W[256:]
    f = (jnp.dot(img_e.astype(bf16), fslab_ref[0:256, :], preferred_element_type=f32)
         + jnp.dot(meta_e.astype(bf16), fslab_ref[256:384, :], preferred_element_type=f32)
         + bias(_BF1))
    f = jnp.maximum(f, 0.0)
    f = jnp.maximum(jnp.dot(f.astype(bf16), fslab_ref[384:640, :],
                            preferred_element_type=f32) + bias(_BF2), 0.0)

    # ----- classifier (256 -> num_labels), zero-padded to 128 lanes ----------
    out_ref[...] = jnp.dot(f.astype(bf16), mslab_ref[512:768, :],
                           preferred_element_type=f32) + bias(_BC)


# ----------------------------------------------------------------------------
# Wrapper: batch tiling + pallas_call (no batch padding; ragged last tile)
# ----------------------------------------------------------------------------
def _round_up(x, m):
    return (x + m - 1) // m * m


def ol3i_forward(img_feat, meta, kp, num_labels, *, tile_b=1024):
    """img_feat: [B, 768] swin embedding (ideally bf16); meta: [B, metadata_length]."""
    assert num_labels <= 128
    B = img_feat.shape[0]
    ml = meta.shape[1]
    assert img_feat.shape == (B, 768)
    assert meta.shape[0] == B and ml <= 128

    bf16 = jnp.bfloat16
    if img_feat.dtype != bf16:
        # Prefer producing the swin embedding in bf16 upstream; cast here otherwise.
        img_feat = img_feat.astype(bf16)
    # Single fused cast+lane-pad pass over the tiny metadata (bf16 stream).
    if ml < 128 or meta.dtype != bf16:
        meta_p = jnp.pad(meta.astype(bf16), ((0, 0), (0, 128 - ml)))
    else:
        meta_p = meta

    # Batch tile: multiple of 16 (bf16 sublane packing), capped at ~ceil(B/2)
    # so the grid has >= 2 steps when B allows it (keeps both v7x TCs busy).
    tb = min(tile_b, _round_up(pl.cdiv(B, 2), 16))
    tb = max(16, _round_up(tb, 16))
    grid = (pl.cdiv(B, tb),)

    in_specs = [
        pl.BlockSpec((tb, 768), lambda i: (i, 0)),          # img tile (streamed, bf16)
        pl.BlockSpec((tb, 128), lambda i: (i, 0)),          # meta tile (streamed, bf16)
        pl.BlockSpec((768, 512), lambda i: (0, 0)),         # w1                (resident)
        pl.BlockSpec((512, 512), lambda i: (0, 0)),         # GroupNorm averaging matrix
        pl.BlockSpec((512, 256), lambda i: (0, 0)),         # w2
        pl.BlockSpec((768, 128), lambda i: (0, 0)),         # meta-MLP + classifier slab
        pl.BlockSpec((640, 256), lambda i: (0, 0)),         # fusion slab
        pl.BlockSpec((1, _BIAS_LEN), lambda i: (0, 0)),     # biases + GN affine slab
    ]
    out_specs = pl.BlockSpec((tb, 128), lambda i: (i, 0))

    out = pl.pallas_call(
        _ol3i_head_kernel,
        out_shape=jax.ShapeDtypeStruct((B, 128), jnp.float32),
        grid=grid,
        in_specs=in_specs,
        out_specs=out_specs,
        compiler_params=pltpu.CompilerParams(
            dimension_semantics=("parallel",),
            vmem_limit_bytes=48 * 1024 * 1024),
    )(img_feat, meta_p, kp["w1"], kp["G"], kp["w2"],
      kp["mslab"], kp["fslab"], kp["bias"])

    return out[:, :num_labels]


# ----------------------------------------------------------------------------
# Parameter construction (f32 masters, shapes from the module's __init__)
# ----------------------------------------------------------------------------
def make_params(key, num_labels=2, metadata_length=4):
    def lin(k, din, dout, scale=0.05):
        kw, kb = jax.random.split(k)
        return (scale * jax.random.normal(kw, (din, dout), jnp.float32),
                scale * jax.random.normal(kb, (1, dout), jnp.float32))

    keys = jax.random.split(key, 11)
    p = {}
    p["w1"], p["b1"] = lin(keys[0], 768, 512)                 # fc1
    p["gamma"] = 1.0 + 0.1 * jax.random.normal(keys[9], (1, 512), jnp.float32)
    p["beta"] = 0.1 * jax.random.normal(keys[10], (1, 512), jnp.float32)
    p["w2"], p["b2"] = lin(keys[1], 512, 256)                 # fc2
    p["wm1"], p["bm1"] = lin(keys[2], metadata_length, 64)    # meta_net
    p["wm2"], p["bm2"] = lin(keys[3], 64, 64)
    p["wm3"], p["bm3"] = lin(keys[4], 64, 128)
    p["wm4"], p["bm4"] = lin(keys[5], 128, 128)
    p["wf1"], p["bf1"] = lin(keys[6], 384, 256)               # fusion_net
    p["wf2"], p["bf2"] = lin(keys[7], 256, 256)
    p["wc"], p["bc"] = lin(keys[8], 256, num_labels)          # classifier
    return p


def pack_params(p):
    """Pack f32 master params into the (mostly bf16) kernel operand set."""
    bf16, f32 = jnp.bfloat16, jnp.float32

    def pad2(a, r, c):
        return jnp.pad(a, ((0, r - a.shape[0]), (0, c - a.shape[1])))

    def padrow(b, n):
        b = b.reshape(1, -1)
        return jnp.pad(b, ((0, 0), (0, n - b.shape[1])))

    kp = {}
    kp["w1"] = p["w1"].astype(bf16)                                      # [768,512]
    kp["w2"] = p["w2"].astype(bf16)                                      # [512,256]

    # Block-diagonal group-averaging matrix: 32 groups x 16 channels, value 1/16
    # (exact in bf16).
    ch = jnp.arange(512)
    kp["G"] = (((ch[:, None] // 16) == (ch[None, :] // 16)).astype(f32) / 16.0
               ).astype(bf16)                                            # [512,512]

    # meta-MLP weights (4 x 128-row blocks) + classifier (256 rows), 128 lanes.
    kp["mslab"] = jnp.concatenate(
        [pad2(p["wm1"], 128, 128), pad2(p["wm2"], 128, 128),
         pad2(p["wm3"], 128, 128), pad2(p["wm4"], 128, 128),
         pad2(p["wc"], 256, 128)],
        axis=0).astype(bf16)                                             # [768,128]

    # fusion-net weights (wf1 rows 0:256 = img_e part, 256:384 = meta_e part).
    kp["fslab"] = jnp.concatenate([p["wf1"], p["wf2"]],
                                  axis=0).astype(bf16)                   # [640,256]

    kp["bias"] = jnp.concatenate(
        [padrow(p["b1"], 512), padrow(p["b2"], 256),
         padrow(p["bm1"], 128), padrow(p["bm2"], 128),
         padrow(p["bm3"], 128), padrow(p["bm4"], 128),
         padrow(p["bf1"], 256), padrow(p["bf2"], 256), padrow(p["bc"], 128),
         padrow(p["gamma"], 512), padrow(p["beta"], 512)],
        axis=1).astype(f32)                                              # [1,2944]
    assert kp["bias"].shape == (1, _BIAS_LEN)
    return kp


# ----------------------------------------------------------------------------
# Pure-JAX reference (bf16 weights like the kernel; exact f32 GroupNorm)
# ----------------------------------------------------------------------------
def reference_forward(img_feat, meta, p):
    f32, bf16 = jnp.float32, jnp.bfloat16

    def lin(x, w, b):
        return jnp.dot(x.astype(bf16), w.astype(bf16),
                       preferred_element_type=f32) + b

    h = lin(img_feat, p["w1"], p["b1"])
    B = h.shape[0]
    hg = h.reshape(B, 32, 16)
    mu = hg.mean(-1, keepdims=True)
    var = hg.var(-1, keepdims=True)
    h = ((hg - mu) * jax.lax.rsqrt(var + 1e-5)).reshape(B, 512)
    h = h * p["gamma"] + p["beta"]
    h = jnp.maximum(h, 0.0)
    img_e = lin(h, p["w2"], p["b2"])

    m = jnp.maximum(lin(meta, p["wm1"], p["bm1"]), 0.0)
    m = jnp.maximum(lin(m, p["wm2"], p["bm2"]), 0.0)
    m = jnp.maximum(lin(m, p["wm3"], p["bm3"]), 0.0)
    meta_e = lin(m, p["wm4"], p["bm4"])

    fused = jnp.concatenate([img_e, meta_e], axis=1)
    f = jnp.maximum(lin(fused, p["wf1"], p["bf1"]), 0.0)
    f = jnp.maximum(lin(f, p["wf2"], p["bf2"]), 0.0)
    return lin(f, p["wc"], p["bc"])


if __name__ == "__main__":
    key = jax.random.PRNGKey(0)
    k_param, k_img, k_meta, k2_param, k2_img, k2_meta = jax.random.split(key, 6)

    # ---- test 1: tiny batch (single ragged grid step) ------------------------
    batch, metadata_length, num_labels = 2, 4, 2
    params = make_params(k_param, num_labels=num_labels,
                         metadata_length=metadata_length)
    kparams = pack_params(params)

    # Swin-S embedding stand-in (see TODO(synk) above), consumed in bf16.
    img_feat = jax.random.normal(k_img, (batch, 768), jnp.float32).astype(jnp.bfloat16)
    meta = jax.random.normal(k_meta, (batch, metadata_length), jnp.float32)

    logits = jax.block_until_ready(ol3i_forward(img_feat, meta, kparams, num_labels))
    ref = reference_forward(img_feat, meta, params)
    assert logits.shape == (batch, num_labels)
    assert jnp.allclose(logits, ref, atol=1e-2, rtol=1e-2), (logits, ref)

    # ---- test 2: multi-step grid with a ragged (partial) last batch tile -----
    batch2, ml2, nl2 = 300, 7, 5
    params2 = make_params(k2_param, num_labels=nl2, metadata_length=ml2)
    kparams2 = pack_params(params2)
    img2 = jax.random.normal(k2_img, (batch2, 768), jnp.float32).astype(jnp.bfloat16)
    meta2 = jax.random.normal(k2_meta, (batch2, ml2), jnp.float32)

    logits2 = jax.block_until_ready(
        ol3i_forward(img2, meta2, kparams2, nl2, tile_b=128))
    ref2 = reference_forward(img2, meta2, params2)
    assert logits2.shape == (batch2, nl2)
    assert jnp.allclose(logits2, ref2, atol=1e-2, rtol=1e-2), (logits2, ref2)

    print("KERNEL_OK")
</pallas_src>

<mosaic_0001>
module attributes {stable_mosaic.version = 11 : i64} {
  func.func @_ol3i_head_kernel(%arg0: i32, %arg1: memref<16x768xbf16, #tpu.memory_space<vmem>>, %arg2: memref<16x128xbf16, #tpu.memory_space<vmem>>, %arg3: memref<768x512xbf16, #tpu.memory_space<vmem>>, %arg4: memref<512x512xbf16, #tpu.memory_space<vmem>>, %arg5: memref<512x256xbf16, #tpu.memory_space<vmem>>, %arg6: memref<768x128xbf16, #tpu.memory_space<vmem>>, %arg7: memref<640x256xbf16, #tpu.memory_space<vmem>>, %arg8: memref<1x2944xf32, #tpu.memory_space<vmem>>, %arg9: memref<16x128xf32, #tpu.memory_space<vmem>>) attributes {dimension_semantics = [#tpu.dimension_semantics<parallel>], iteration_bounds = array<i64: 1>, scalar_prefetch = 0 : i64, scratch_operands = 0 : i64, tpu.core_type = #tpu.core_type<tc>, window_params = [{transform_indices = @transform_0, window_bounds = array<i64: 16, 768>}, {transform_indices = @transform_1, window_bounds = array<i64: 16, 128>}, {pipeline_mode = #tpu.pipeline_mode<synchronous>, transform_indices = @transform_2, window_bounds = array<i64: 768, 512>}, {pipeline_mode = #tpu.pipeline_mode<synchronous>, transform_indices = @transform_3, window_bounds = array<i64: 512, 512>}, {pipeline_mode = #tpu.pipeline_mode<synchronous>, transform_indices = @transform_4, window_bounds = array<i64: 512, 256>}, {pipeline_mode = #tpu.pipeline_mode<synchronous>, transform_indices = @transform_5, window_bounds = array<i64: 768, 128>}, {pipeline_mode = #tpu.pipeline_mode<synchronous>, transform_indices = @transform_6, window_bounds = array<i64: 640, 256>}, {pipeline_mode = #tpu.pipeline_mode<synchronous>, transform_indices = @transform_7, window_bounds = array<i64: 1, 2944>}, {transform_indices = @transform_8, window_bounds = array<i64: 16, 128>}]} {
    %c0 = arith.constant 0 : index
    %c0_0 = arith.constant 0 : index
    %0 = vector.load %arg2[%c0, %c0_0] : memref<16x128xbf16, #tpu.memory_space<vmem>>, vector<16x128xbf16>
    %c0_1 = arith.constant 0 : index
    %c0_2 = arith.constant 0 : index
    %1 = vector.load %arg6[%c0_1, %c0_2] : memref<768x128xbf16, #tpu.memory_space<vmem>>, vector<128x128xbf16>
    %cst = arith.constant dense<0.000000e+00> : vector<16x128xf32>
    %2 = tpu.matmul %0, %1, %cst {dimension_numbers = #tpu.dot_dimension_numbers<[1], [0], [0], [1], [0, 0, 1, 1], [], []>} : vector<16x128xbf16>, vector<128x128xbf16>, vector<16x128xf32> -> vector<16x128xf32>
    %c0_3 = arith.constant 0 : index
    %c768 = arith.constant 768 : index
    %3 = vector.load %arg8[%c0_3, %c768] : memref<1x2944xf32, #tpu.memory_space<vmem>>, vector<1x128xf32>
    %4 = vector.broadcast %3 : vector<1x128xf32> to vector<16x128xf32>
    %5 = arith.addf %2, %4 : vector<16x128xf32>
    %cst_4 = arith.constant 0.000000e+00 : f32
    %6 = vector.broadcast %cst_4 : f32 to vector<16x128xf32>
    %7 = arith.maximumf %5, %6 : vector<16x128xf32>
    %8 = arith.truncf %7 : vector<16x128xf32> to vector<16x128xbf16>
    %c128 = arith.constant 128 : index
    %c0_5 = arith.constant 0 : index
    %9 = vector.load %arg6[%c128, %c0_5] : memref<768x128xbf16, #tpu.memory_space<vmem>>, vector<128x128xbf16>
    %cst_6 = arith.constant dense<0.000000e+00> : vector<16x128xf32>
    %10 = tpu.matmul %8, %9, %cst_6 {dimension_numbers = #tpu.dot_dimension_numbers<[1], [0], [0], [1], [0, 0, 1, 1], [], []>} : vector<16x128xbf16>, vector<128x128xbf16>, vector<16x128xf32> -> vector<16x128xf32>
    %c0_7 = arith.constant 0 : index
    %c896 = arith.constant 896 : index
    %11 = vector.load %arg8[%c0_7, %c896] : memref<1x2944xf32, #tpu.memory_space<vmem>>, vector<1x128xf32>
    %12 = vector.broadcast %11 : vector<1x128xf32> to vector<16x128xf32>
    %13 = arith.addf %10, %12 : vector<16x128xf32>
    %cst_8 = arith.constant 0.000000e+00 : f32
    %14 = vector.broadcast %cst_8 : f32 to vector<16x128xf32>
    %15 = arith.maximumf %13, %14 : vector<16x128xf32>
    %16 = arith.truncf %15 : vector<16x128xf32> to vector<16x128xbf16>
    %c256 = arith.constant 256 : index
    %c0_9 = arith.constant 0 : index
    %17 = vector.load %arg6[%c256, %c0_9] : memref<768x128xbf16, #tpu.memory_space<vmem>>, vector<128x128xbf16>
    %cst_10 = arith.constant dense<0.000000e+00> : vector<16x128xf32>
    %18 = tpu.matmul %16, %17, %cst_10 {dimension_numbers = #tpu.dot_dimension_numbers<[1], [0], [0], [1], [0, 0, 1, 1], [], []>} : vector<16x128xbf16>, vector<128x128xbf16>, vector<16x128xf32> -> vector<16x128xf32>
    %c0_11 = arith.constant 0 : index
    %c1024 = arith.constant 1024 : index
    %19 = vector.load %arg8[%c0_11, %c1024] : memref<1x2944xf32, #tpu.memory_space<vmem>>, vector<1x128xf32>
    %20 = vector.broadcast %19 : vector<1x128xf32> to vector<16x128xf32>
    %21 = arith.addf %18, %20 : vector<16x128xf32>
    %cst_12 = arith.constant 0.000000e+00 : f32
    %22 = vector.broadcast %cst_12 : f32 to vector<16x128xf32>
    %23 = arith.maximumf %21, %22 : vector<16x128xf32>
    %24 = arith.truncf %23 : vector<16x128xf32> to vector<16x128xbf16>
    %c384 = arith.constant 384 : index
    %c0_13 = arith.constant 0 : index
    %25 = vector.load %arg6[%c384, %c0_13] : memref<768x128xbf16, #tpu.memory_space<vmem>>, vector<128x128xbf16>
    %cst_14 = arith.constant dense<0.000000e+00> : vector<16x128xf32>
    %26 = tpu.matmul %24, %25, %cst_14 {dimension_numbers = #tpu.dot_dimension_numbers<[1], [0], [0], [1], [0, 0, 1, 1], [], []>} : vector<16x128xbf16>, vector<128x128xbf16>, vector<16x128xf32> -> vector<16x128xf32>
    %c0_15 = arith.constant 0 : index
    %c1152 = arith.constant 1152 : index
    %27 = vector.load %arg8[%c0_15, %c1152] : memref<1x2944xf32, #tpu.memory_space<vmem>>, vector<1x128xf32>
    %28 = vector.broadcast %27 : vector<1x128xf32> to vector<16x128xf32>
    %29 = arith.addf %26, %28 : vector<16x128xf32>
    %c0_16 = arith.constant 0 : index
    %c0_17 = arith.constant 0 : index
    %30 = vector.load %arg1[%c0_16, %c0_17] : memref<16x768xbf16, #tpu.memory_space<vmem>>, vector<16x768xbf16>
    %c0_18 = arith.constant 0 : index
    %c0_19 = arith.constant 0 : index
    %31 = vector.load %arg3[%c0_18, %c0_19] : memref<768x512xbf16, #tpu.memory_space<vmem>>, vector<768x512xbf16>
    %cst_20 = arith.constant dense<0.000000e+00> : vector<16x512xf32>
    %32 = tpu.matmul %30, %31, %cst_20 {dimension_numbers = #tpu.dot_dimension_numbers<[1], [0], [0], [1], [0, 0, 1, 1], [], []>} : vector<16x768xbf16>, vector<768x512xbf16>, vector<16x512xf32> -> vector<16x512xf32>
    %c0_21 = arith.constant 0 : index
    %c0_22 = arith.constant 0 : index
    %33 = vector.load %arg8[%c0_21, %c0_22] : memref<1x2944xf32, #tpu.memory_space<vmem>>, vector<1x512xf32>
    %34 = vector.broadcast %33 : vector<1x512xf32> to vector<16x512xf32>
    %35 = arith.addf %32, %34 : vector<16x512xf32>
    %36 = arith.truncf %35 : vector<16x512xf32> to vector<16x512xbf16>
    %c0_23 = arith.constant 0 : index
    %c0_24 = arith.constant 0 : index
    %37 = vector.load %arg4[%c0_23, %c0_24] : memref<512x512xbf16, #tpu.memory_space<vmem>>, vector<512x512xbf16>
    %cst_25 = arith.constant dense<0.000000e+00> : vector<16x512xf32>
    %38 = tpu.matmul %36, %37, %cst_25 {dimension_numbers = #tpu.dot_dimension_numbers<[1], [0], [0], [1], [0, 0, 1, 1], [], []>} : vector<16x512xbf16>, vector<512x512xbf16>, vector<16x512xf32> -> vector<16x512xf32>
    %39 = arith.subf %35, %38 : vector<16x512xf32>
    %40 = arith.mulf %39, %39 : vector<16x512xf32>
    %41 = arith.truncf %40 : vector<16x512xf32> to vector<16x512xbf16>
    %c0_26 = arith.constant 0 : index
    %c0_27 = arith.constant 0 : index
    %42 = vector.load %arg4[%c0_26, %c0_27] : memref<512x512xbf16, #tpu.memory_space<vmem>>, vector<512x512xbf16>
    %cst_28 = arith.constant dense<0.000000e+00> : vector<16x512xf32>
    %43 = tpu.matmul %41, %42, %cst_28 {dimension_numbers = #tpu.dot_dimension_numbers<[1], [0], [0], [1], [0, 0, 1, 1], [], []>} : vector<16x512xbf16>, vector<512x512xbf16>, vector<16x512xf32> -> vector<16x512xf32>
    %cst_29 = arith.constant 0.000000e+00 : f32
    %44 = vector.broadcast %cst_29 : f32 to vector<16x512xf32>
    %45 = arith.maximumf %43, %44 : vector<16x512xf32>
    %cst_30 = arith.constant 9.99999974E-6 : f32
    %46 = vector.broadcast %cst_30 : f32 to vector<16x512xf32>
    %47 = arith.addf %45, %46 : vector<16x512xf32>
    %48 = math.rsqrt %47 : vector<16x512xf32>
    %49 = arith.mulf %39, %48 : vector<16x512xf32>
    %c0_31 = arith.constant 0 : index
    %c1920 = arith.constant 1920 : index
    %50 = vector.load %arg8[%c0_31, %c1920] : memref<1x2944xf32, #tpu.memory_space<vmem>>, vector<1x512xf32>
    %51 = vector.broadcast %50 : vector<1x512xf32> to vector<16x512xf32>
    %52 = arith.mulf %49, %51 : vector<16x512xf32>
    %c0_32 = arith.constant 0 : index
    %c2432 = arith.constant 2432 : index
    %53 = vector.load %arg8[%c0_32, %c2432] : memref<1x2944xf32, #tpu.memory_space<vmem>>, vector<1x512xf32>
    %54 = vector.broadcast %53 : vector<1x512xf32> to vector<16x512xf32>
    %55 = arith.addf %52, %54 : vector<16x512xf32>
    %cst_33 = arith.constant 0.000000e+00 : f32
    %56 = vector.broadcast %cst_33 : f32 to vector<16x512xf32>
    %57 = arith.maximumf %55, %56 : vector<16x512xf32>
    %58 = arith.truncf %57 : vector<16x512xf32> to vector<16x512xbf16>
    %c0_34 = arith.constant 0 : index
    %c0_35 = arith.constant 0 : index
    %59 = vector.load %arg5[%c0_34, %c0_35] : memref<512x256xbf16, #tpu.memory_space<vmem>>, vector<512x256xbf16>
    %cst_36 = arith.constant dense<0.000000e+00> : vector<16x256xf32>
    %60 = tpu.matmul %58, %59, %cst_36 {dimension_numbers = #tpu.dot_dimension_numbers<[1], [0], [0], [1], [0, 0, 1, 1], [], []>} : vector<16x512xbf16>, vector<512x256xbf16>, vector<16x256xf32> -> vector<16x256xf32>
    %c0_37 = arith.constant 0 : index
    %c512 = arith.constant 512 : index
    %61 = vector.load %arg8[%c0_37, %c512] : memref<1x2944xf32, #tpu.memory_space<vmem>>, vector<1x256xf32>
    %62 = vector.broadcast %61 : vector<1x256xf32> to vector<16x256xf32>
    %63 = arith.addf %60, %62 : vector<16x256xf32>
    %64 = arith.truncf %63 : vector<16x256xf32> to vector<16x256xbf16>
    %c0_38 = arith.constant 0 : index
    %c0_39 = arith.constant 0 : index
    %65 = vector.load %arg7[%c0_38, %c0_39] : memref<640x256xbf16, #tpu.memory_space<vmem>>, vector<256x256xbf16>
    %cst_40 = arith.constant dense<0.000000e+00> : vector<16x256xf32>
    %66 = tpu.matmul %64, %65, %cst_40 {dimension_numbers = #tpu.dot_dimension_numbers<[1], [0], [0], [1], [0, 0, 1, 1], [], []>} : vector<16x256xbf16>, vector<256x256xbf16>, vector<16x256xf32> -> vector<16x256xf32>
    %67 = arith.truncf %29 : vector<16x128xf32> to vector<16x128xbf16>
    %c256_41 = arith.constant 256 : index
    %c0_42 = arith.constant 0 : index
    %68 = vector.load %arg7[%c256_41, %c0_42] : memref<640x256xbf16, #tpu.memory_space<vmem>>, vector<128x256xbf16>
    %cst_43 = arith.constant dense<0.000000e+00> : vector<16x256xf32>
    %69 = tpu.matmul %67, %68, %cst_43 {dimension_numbers = #tpu.dot_dimension_numbers<[1], [0], [0], [1], [0, 0, 1, 1], [], []>} : vector<16x128xbf16>, vector<128x256xbf16>, vector<16x256xf32> -> vector<16x256xf32>
    %70 = arith.addf %66, %69 : vector<16x256xf32>
    %c0_44 = arith.constant 0 : index
    %c1280 = arith.constant 1280 : index
    %71 = vector.load %arg8[%c0_44, %c1280] : memref<1x2944xf32, #tpu.memory_space<vmem>>, vector<1x256xf32>
    %72 = vector.broadcast %71 : vector<1x256xf32> to vector<16x256xf32>
    %73 = arith.addf %70, %72 : vector<16x256xf32>
    %cst_45 = arith.constant 0.000000e+00 : f32
    %74 = vector.broadcast %cst_45 : f32 to vector<16x256xf32>
    %75 = arith.maximumf %73, %74 : vector<16x256xf32>
    %76 = arith.truncf %75 : vector<16x256xf32> to vector<16x256xbf16>
    %c384_46 = arith.constant 384 : index
    %c0_47 = arith.constant 0 : index
    %77 = vector.load %arg7[%c384_46, %c0_47] : memref<640x256xbf16, #tpu.memory_space<vmem>>, vector<256x256xbf16>
    %cst_48 = arith.constant dense<0.000000e+00> : vector<16x256xf32>
    %78 = tpu.matmul %76, %77, %cst_48 {dimension_numbers = #tpu.dot_dimension_numbers<[1], [0], [0], [1], [0, 0, 1, 1], [], []>} : vector<16x256xbf16>, vector<256x256xbf16>, vector<16x256xf32> -> vector<16x256xf32>
    %c0_49 = arith.constant 0 : index
    %c1536 = arith.constant 1536 : index
    %79 = vector.load %arg8[%c0_49, %c1536] : memref<1x2944xf32, #tpu.memory_space<vmem>>, vector<1x256xf32>
    %80 = vector.broadcast %79 : vector<1x256xf32> to vector<16x256xf32>
    %81 = arith.addf %78, %80 : vector<16x256xf32>
    %cst_50 = arith.constant 0.000000e+00 : f32
    %82 = vector.broadcast %cst_50 : f32 to vector<16x256xf32>
    %83 = arith.maximumf %81, %82 : vector<16x256xf32>
    %84 = arith.truncf %83 : vector<16x256xf32> to vector<16x256xbf16>
    %c512_51 = arith.constant 512 : index
    %c0_52 = arith.constant 0 : index
    %85 = vector.load %arg6[%c512_51, %c0_52] : memref<768x128xbf16, #tpu.memory_space<vmem>>, vector<256x128xbf16>
    %cst_53 = arith.constant dense<0.000000e+00> : vector<16x128xf32>
    %86 = tpu.matmul %84, %85, %cst_53 {dimension_numbers = #tpu.dot_dimension_numbers<[1], [0], [0], [1], [0, 0, 1, 1], [], []>} : vector<16x256xbf16>, vector<256x128xbf16>, vector<16x128xf32> -> vector<16x128xf32>
    %c0_54 = arith.constant 0 : index
    %c1792 = arith.constant 1792 : index
    %87 = vector.load %arg8[%c0_54, %c1792] : memref<1x2944xf32, #tpu.memory_space<vmem>>, vector<1x128xf32>
    %88 = vector.broadcast %87 : vector<1x128xf32> to vector<16x128xf32>
    %89 = arith.addf %86, %88 : vector<16x128xf32>
    %c0_55 = arith.constant 0 : index
    %c0_56 = arith.constant 0 : index
    %90 = vector.load %arg9[%c0_55, %c0_56] : memref<16x128xf32, #tpu.memory_space<vmem>>, vector<16x128xf32>
    tpu.vector_store %arg9[%c0_55, %c0_56], %89 {strides = array<i32>} : memref<16x128xf32, #tpu.memory_space<vmem>>, vector<16x128xf32>,
    return
  }
  func.func @transform_0(%arg0: i32) -> (i32, i32) {
    %c0_i32 = arith.constant 0 : i32
    %c0_i32_0 = arith.constant 0 : i32
    return %arg0, %c0_i32 : i32, i32
  }
  func.func @transform_1(%arg0: i32) -> (i32, i32) {
    %c0_i32 = arith.constant 0 : i32
    %c0_i32_0 = arith.constant 0 : i32
    return %arg0, %c0_i32 : i32, i32
  }
  func.func @transform_2(%arg0: i32) -> (i32, i32) {
    %c0_i32 = arith.constant 0 : i32
    %c0_i32_0 = arith.constant 0 : i32
    %c0_i32_1 = arith.constant 0 : i32
    return %c0_i32, %c0_i32_0 : i32, i32
  }
  func.func @transform_3(%arg0: i32) -> (i32, i32) {
    %c0_i32 = arith.constant 0 : i32
    %c0_i32_0 = arith.constant 0 : i32
    %c0_i32_1 = arith.constant 0 : i32
    return %c0_i32, %c0_i32_0 : i32, i32
  }
  func.func @transform_4(%arg0: i32) -> (i32, i32) {
    %c0_i32 = arith.constant 0 : i32
    %c0_i32_0 = arith.constant 0 : i32
    %c0_i32_1 = arith.constant 0 : i32
    return %c0_i32, %c0_i32_0 : i32, i32
  }
  func.func @transform_5(%arg0: i32) -> (i32, i32) {
    %c0_i32 = arith.constant 0 : i32
    %c0_i32_0 = arith.constant 0 : i32
    %c0_i32_1 = arith.constant 0 : i32
    return %c0_i32, %c0_i32_0 : i32, i32
  }
  func.func @transform_6(%arg0: i32) -> (i32, i32) {
    %c0_i32 = arith.constant 0 : i32
    %c0_i32_0 = arith.constant 0 : i32
    %c0_i32_1 = arith.constant 0 : i32
    return %c0_i32, %c0_i32_0 : i32, i32
  }
  func.func @transform_7(%arg0: i32) -> (i32, i32) {
    %c0_i32 = arith.constant 0 : i32
    %c0_i32_0 = arith.constant 0 : i32
    %c0_i32_1 = arith.constant 0 : i32
    return %c0_i32, %c0_i32_0 : i32, i32
  }
  func.func @transform_8(%arg0: i32) -> (i32, i32) {
    %c0_i32 = arith.constant 0 : i32
    %c0_i32_0 = arith.constant 0 : i32
    return %arg0, %c0_i32 : i32, i32
  }
}

</mosaic_0001>

<bundles_post_ra>
// kernel: tpu_custom_call.1
= control target key start
LH: loop header
LB: loop body
LE: loop exit
PB: predicated region body
PF: predicated region fallthrough
CT: control target
= control target key end

     0   :  { %13 = vsyncpa [#allocation3], 0  ;;  %s7412_s0 = inlined_call_operand.hbm [shape: bf16[2,768], index: 0, kind: input, shape index: {}]   ;;  %s7413_s1 = inlined_call_operand.vmem [shape: bf16[2,128], index: 1, kind: input, shape index: {}]   ;;  %s7414_s2 = inlined_call_operand.hbm [shape: bf16[768,512], index: 2, kind: input, shape index: {}]   ;;  %s7415_s3 = inlined_call_operand.hbm [shape: bf16[512,512], index: 3, kind: input, shape index: {}]   ;;  %s7416_s4 = inlined_call_operand.hbm [shape: bf16[512,256], index: 4, kind: input, shape index: {}]   ;;  %s7417_s5 = inlined_call_operand.hbm [shape: bf16[768,128], index: 5, kind: input, shape index: {}]   ;;  %s7418_s6 = inlined_call_operand.hbm [shape: bf16[640,256], index: 6, kind: input, shape index: {}]   ;;  %s7419_s7 = inlined_call_operand.vmem [shape: f32[1,2944], index: 7, kind: input, shape index: {}]   ;;  %s7420_s8 = inlined_call_operand.hbm [shape: f32[2,128], index: 8, kind: output, shape index: {}]  }
   0x1   :  { %14 = vsyncpa [#allocation6], 0 }
   0x2   :  { %15 = vsyncpa [#allocation9], 0 }
   0x3   :  { %16 = vsyncpa [#allocation12], 0 }
   0x4   :  { %17 = vsyncpa [#allocation4], 0 }
   0x5   :  { %22 = vsyncadd [#allocation3], 672  ;;  %s6460_s27 = smov [#allocation5]   ;;  %s6296_s9 = scalar_lea.hbm %s7414_s2, 24576 }
   0x6   :  { %s37_s28 = sshll.u32 %s6460_s27, 4  ;;  %p6297_p0 = scmp.ne.s32.totalorder %s7414_s2, %s6296_s9  ;;  %s38_s28 = int_to_ptr.vmem [resolvable:$true] %s37_s28 }
   0x7   :  { %p6300_p1 = scmp.lt.u32.totalorder %s6296_s9, %s7414_s2 }
   0x9   :  { %p6302_p2 = pnand %p6300_p1, %p6297_p0 }
   0xb   :  { %6305 = shalt.err (!%p6302_p2)
}
   0xc   :  { %s6306_s14 = scalar_lea.vmem %s38_s28, 24576  ;;  %p6311_p4 = scmp.lt.s32.totalorder %s38_s28, %s38_s28 }
   0xd   :  { %p6307_p3 = scmp.ne.s32.totalorder %s38_s28, %s6306_s14  ;;  %p6312_p5 = scmp.lt.s32.totalorder %s6306_s14, %s6306_s14 }
   0xf   :  { %p6313_p6 = por %p6312_p5, %p6311_p4 }
  0x11   :  { %p6314_p7 = pnand %p6313_p6, %p6307_p3 }
  0x13   :  { %6317 = shalt.err (!%p6314_p7)
}
  0x14   :  { %s6461_s15 = smov 256   ;;  %s6462_s16 = smov 16  }
  0x15   :  { %43 = dma.hbm_to_vmem [thread:$0]  %s7414_s2, 24576, %s38_s28, [#allocation6], %s6461_s15, %s6461_s15, %s6462_s16  }
  0x16   :  { %s6463_s19 = smov [#allocation8]   ;;  %s6318_s23 = scalar_lea.hbm %s7416_s4, 8192 }
  0x17   :  { %s61_s20 = sshll.u32 %s6463_s19, 4  ;;  %p6319_p8 = scmp.ne.s32.totalorder %s7416_s4, %s6318_s23  ;;  %s62_s20 = int_to_ptr.vmem [resolvable:$true] %s61_s20 }
  0x18   :  { %p6322_p9 = scmp.lt.u32.totalorder %s6318_s23, %s7416_s4 }
  0x1a   :  { %p6324_p10 = pnand %p6322_p9, %p6319_p8 }
  0x1c   :  { %6327 = shalt.err (!%p6324_p10)
}
  0x1d   :  { %s6328_s29 = scalar_lea.vmem %s62_s20, 8192  ;;  %p6333_p12 = scmp.lt.s32.totalorder %s62_s20, %s62_s20 }
  0x1e   :  { %p6329_p11 = scmp.ne.s32.totalorder %s62_s20, %s6328_s29  ;;  %p6334_p13 = scmp.lt.s32.totalorder %s6328_s29, %s6328_s29 }
  0x20   :  { %p6335_p0 = por %p6334_p13, %p6333_p12 }
  0x22   :  { %p6336_p1 = pnand %p6335_p0, %p6329_p11 }
  0x24   :  { %6339 = shalt.err (!%p6336_p1)
}
  0x25   :  { %s6464_s2 = smov 128   ;;  %s6465_s28 = smov 8  }
  0x26   :  { %67 = dma.hbm_to_vmem [thread:$0]  %s7416_s4, 8192, %s62_s20, [#allocation9], %s6464_s2, %s6464_s2, %s6465_s28  }
  0x27   :  { %s6466_s10 = smov [#allocation2]   ;;  %s6340_s14 = scalar_lea.hbm %s7412_s0, 96 }
  0x28   :  { %s23_s11 = sshll.u32 %s6466_s10, 4  ;;  %p6341_p2 = scmp.ne.s32.totalorder %s7412_s0, %s6340_s14  ;;  %s24_s11 = int_to_ptr.vmem [resolvable:$true] %s23_s11 }
  0x29   :  { %p6344_p3 = scmp.lt.u32.totalorder %s6340_s14, %s7412_s0 }
  0x2b   :  { %p6346_p4 = pnand %p6344_p3, %p6341_p2 }
  0x2d   :  { %6349 = shalt.err (!%p6346_p4)
}
  0x2e   :  { %s6350_s22 = scalar_lea.vmem %s24_s11, 96  ;;  %s6354_s4 = scalar_lea.vmem %s24_s11, 768 }
  0x2f   :  { %p6351_p5 = scmp.ne.s32.totalorder %s24_s11, %s6350_s22  ;;  %p6355_p6 = scmp.lt.s32.totalorder %s24_s11, %s24_s11 }
  0x30   :  { %p6356_p7 = scmp.lt.s32.totalorder %s6354_s4, %s6350_s22 }
  0x32   :  { %p6357_p8 = por %p6356_p7, %p6355_p6 }
  0x34   :  { %p6358_p9 = pnand %p6357_p8, %p6351_p5 }
  0x36   :  { %6361 = shalt.err (!%p6358_p9)
}
  0x37   :  { %s6467_s20 = smov 96   ;;  %s6468_s23 = smov 6  }
  0x38   :  { %29 = dma.hbm_to_vmem [thread:$0]  %s7412_s0, 96, %s24_s11, [#allocation3], %s6467_s20, %s6467_s20, %s6468_s23  }
  0x39   :  { %s6469_s26 = smov [#allocation7]   ;;  %s6470_s29 = smov [#allocation10]  }
  0x3a   :  { %s49_s27 = sshll.u32 %s6469_s26, 4  ;;  %s73_s30 = sshll.u32 %s6470_s29, 4  ;;  %s50_s27 = int_to_ptr.vmem [resolvable:$true] %s49_s27  ;;  %s74_s30 = int_to_ptr.vmem [resolvable:$true] %s73_s30 }
  0x3b   :  { %s6362_s12 = scalar_lea.hbm %s7415_s3, 16384 }
  0x3c   :  { %p6363_p10 = scmp.ne.s32.totalorder %s7415_s3, %s6362_s12  ;;  %p6366_p11 = scmp.lt.u32.totalorder %s6362_s12, %s7415_s3 }
  0x3e   :  { %p6368_p12 = pnand %p6366_p11, %p6363_p10 }
  0x40   :  { %6371 = shalt.err (!%p6368_p12)
}
  0x41   :  { %s6372_s0 = scalar_lea.vmem %s50_s27, 16384  ;;  %p6377_p0 = scmp.lt.s32.totalorder %s50_s27, %s50_s27 }
  0x42   :  { %p6373_p13 = scmp.ne.s32.totalorder %s50_s27, %s6372_s0  ;;  %p6378_p1 = scmp.lt.s32.totalorder %s6372_s0, %s6372_s0 }
  0x44   :  { %p6379_p2 = por %p6378_p1, %p6377_p0 }
  0x46   :  { %p6380_p3 = pnand %p6379_p2, %p6373_p13 }
  0x48   :  { %6383 = shalt.err (!%p6380_p3)
}
  0x49   :  { %55 = dma.hbm_to_vmem [thread:$0]  %s7415_s3, 16384, %s50_s27, [#allocation6], %s6461_s15, %s6461_s15, %s6462_s16  }
  0x4a   :  { %s6384_s4 = scalar_lea.hbm %s7417_s5, 6144 }
  0x4b   :  { %p6385_p4 = scmp.ne.s32.totalorder %s7417_s5, %s6384_s4  ;;  %p6388_p5 = scmp.lt.u32.totalorder %s6384_s4, %s7417_s5 }
  0x4d   :  { %p6390_p6 = pnand %p6388_p5, %p6385_p4 }
  0x4f   :  { %6393 = shalt.err (!%p6390_p6)
}
  0x50   :  { %s6394_s26 = scalar_lea.vmem %s74_s30, 6144  ;;  %p6399_p8 = scmp.lt.s32.totalorder %s74_s30, %s74_s30 }
  0x51   :  { %p6395_p7 = scmp.ne.s32.totalorder %s74_s30, %s6394_s26  ;;  %p6400_p9 = scmp.lt.s32.totalorder %s6394_s26, %s6394_s26 }
  0x53   :  { %p6401_p10 = por %p6400_p9, %p6399_p8 }
  0x55   :  { %p6402_p11 = pnand %p6401_p10, %p6395_p7 }
  0x57   :  { %6405 = shalt.err (!%p6402_p11)
}
  0x58   :  { %s6471_s3 = smov 64   ;;  %s6472_s15 = smov 4  }
  0x59   :  { %79 = dma.hbm_to_vmem [thread:$0]  %s7417_s5, 6144, %s74_s30, [#allocation9], %s6471_s3, %s6471_s3, %s6472_s15  }
  0x5a   :  { %s6473_s29 = smov [#allocation11]   ;;  %s6406_s13 = scalar_lea.hbm %s7418_s6, 10240 }
  0x5b   :  { %s85_s9 = sshll.u32 %s6473_s29, 4  ;;  %p6407_p12 = scmp.ne.s32.totalorder %s7418_s6, %s6406_s13  ;;  %s86_s9 = int_to_ptr.vmem [resolvable:$true] %s85_s9 }
  0x5c   :  { %p6410_p13 = scmp.lt.u32.totalorder %s6406_s13, %s7418_s6 }
  0x5e   :  { %p6412_p0 = pnand %p6410_p13, %p6407_p12 }
  0x60   :  { %6415 = shalt.err (!%p6412_p0)
}
  0x61   :  { %s6416_s11 = scalar_lea.vmem %s86_s9, 10240  ;;  %p6421_p2 = scmp.lt.s32.totalorder %s86_s9, %s86_s9 }
  0x62   :  { %p6417_p1 = scmp.ne.s32.totalorder %s86_s9, %s6416_s11  ;;  %p6422_p3 = scmp.lt.s32.totalorder %s6416_s11, %s6416_s11 }
  0x64   :  { %p6423_p4 = por %p6422_p3, %p6421_p2 }
  0x66   :  { %p6424_p5 = pnand %p6423_p4, %p6417_p1 }
  0x68   :  { %6427 = shalt.err (!%p6424_p5)
}
  0x69   :  { %91 = dma.hbm_to_vmem [thread:$0]  %s7418_s6, 10240, %s86_s9, [#allocation12], %s6464_s2, %s6464_s2, %s6465_s28  }
  0x6a   :  { %6450 = dma.done.wait [#allocation3], 768  }
  0x6b   :  { %6451 = vsyncadd [#allocation3], 4294966528 }
  0x6c   :  { %6452 = dma.done.wait [#allocation6], 40960  }
  0x6d   :  { %6453 = vsyncadd [#allocation6], 4294926336 }
  0x6e   :  { %6454 = dma.done.wait [#allocation9], 14336  }
  0x6f   :  { %6455 = vsyncadd [#allocation9], 4294952960 }
  0x70   :  { %6456 = dma.done.wait [#allocation12], 10240  }
  0x71   :  { %6457 = vsyncadd [#allocation12], 4294957056  ;;  %v6474_v0 = vmov 0.0   ;;  %vm6475_vm0 = vmmov 0   ;;  %v5524_v1 = vld [vmem:[#allocation10] sm:$0xff]   ;;  %v5525_v2 = vld [vmem:[#allocation10 + $0x8] sm:$0xff]   ;;  %v159_v3 = vlaneseq }
  0x72   :  { %5371 = vmatprep.subr.bf16.mxu0 %v6474_v0  ;;  %5387 = vmatprep.mubr.msk.bf16.mxu0 %vm6475_vm0, %v6474_v0  ;;  %v6476_v4 = vmov 1966171168   ;;  %v5526_v6 = vld [vmem:[#allocation10 + $0x10] sm:$0xff]   ;;  %v5527_v8 = vld [vmem:[#allocation10 + $0x18] sm:$0xff]   ;;  %v5532_v18 = vld [vmem:[#allocation10 + $0x40] sm:$0xff]  }
  0x73   :  { %5391 = vmatprep.subr.bf16.mxu1 %v6474_v0  ;;  %5407 = vmatprep.mubr.msk.bf16.mxu1 %vm6475_vm0, %v6474_v0  ;;  %v157_v5 = vunpack.c.l.s4 %v6476_v4  ;;  %v6618_v7 = vshrl.u32 %v159_v3, 7  ;;  %v113_v9 = vld [vmem:[%s7413_s1] sm:$0x1]  ;;  %v114_v10 = vld [vmem:[%s7413_s1 + $0x1] sm:$0x1]  ;;  %v5533_v24 = vld [vmem:[#allocation10 + $0x48] sm:$0xff]  }
  0x74   :  { %5372 = vmatpush3.bf16.msra.mxu0 %v5524_v1  ;;  %v115_v11 = vld [vmem:[%s7413_s1 + $0x2] sm:$0x1]  ;;  %v116_v13 = vld [vmem:[%s7413_s1 + $0x3] sm:$0x1]  ;;  %v117_v14 = vld [vmem:[%s7413_s1 + $0x4] sm:$0x1]  ;;  %v152_v20 = vcombine.low %v113_v9, %v114_v10  ;;  %5392 = vmatpush3.bf16.msra.mxu1 %v5532_v18 }
  0x75   :  { %5373 = vmatprep.subr.bf16.mxu0 %v6474_v0  ;;  %v158_v12 = vunpack.c.0.s8 %v157_v5  ;;  %v118_v15 = vld [vmem:[%s7413_s1 + $0x5] sm:$0x1]  ;;  %v119_v16 = vld [vmem:[%s7413_s1 + $0x6] sm:$0x1]  ;;  %v120_v17 = vld [vmem:[%s7413_s1 + $0x7] sm:$0x1]  ;;  %v153_v21 = vcombine.low %v115_v11, %v116_v13  ;;  %5393 = vmatprep.subr.bf16.mxu1 %v6474_v0 }
  0x76   :  { %v154_v22 = vcombine.low %v117_v14, %v118_v15  ;;  %v155_v23 = vcombine.low %v119_v16, %v120_v17  ;;  %v5528_v25 = vld [vmem:[#allocation10 + $0x20] sm:$0xff]   ;;  %v5529_v26 = vld [vmem:[#allocation10 + $0x28] sm:$0xff]   ;;  %v5534_v27 = vld [vmem:[#allocation10 + $0x50] sm:$0xff]  }
  0x77   :  { %v6646_v19 = vsub.s32 %v158_v12, %v6618_v7  ;;  %v5535_v32 = vld [vmem:[#allocation10 + $0x58] sm:$0xff]   ;;  %v5530_v33 = vld [vmem:[#allocation10 + $0x30] sm:$0xff]   ;;  %v5536_v36 = vld [vmem:[#allocation10 + $0x60] sm:$0xff]  }
  0x78   :  { %5374 = vmatpush3.bf16.msra.mxu0 %v5525_v2  ;;  %5394 = vmatpush3.bf16.msra.mxu1 %v5533_v24  ;;  %v5531_v37 = vld [vmem:[#allocation10 + $0x38] sm:$0xff]   ;;  %v5537_v40 = vld [vmem:[#allocation10 + $0x68] sm:$0xff]   ;;  %v5538_v42 = vld [vmem:[#allocation10 + $0x70] sm:$0xff]  }
  0x79   :  { %5375 = vmatprep.subr.bf16.mxu0 %v6474_v0  ;;  %v162_v28 = vrot.slane %v152_v20, %v6646_v19  ;;  %v169_v29 = vrot.slane %v153_v21, %v6646_v19  ;;  %v176_v30 = vrot.slane %v154_v22, %v6646_v19  ;;  %v183_v31 = vrot.slane %v155_v23, %v6646_v19  ;;  %v5539_v43 = vld [vmem:[#allocation10 + $0x78] sm:$0xff]   ;;  %v5540_v44 = vld [vmem:[#allocation10 + $0x80] sm:$0xff]   ;;  %v5541_v45 = vld [vmem:[#allocation10 + $0x88] sm:$0xff]  }
  0x7a   :  { %5395 = vmatprep.subr.bf16.mxu1 %v6474_v0  ;;  %v5542_v46 = vld [vmem:[#allocation10 + $0x90] sm:$0xff]   ;;  %v5543_v47 = vld [vmem:[#allocation10 + $0x98] sm:$0xff]   ;;  %v5544_v48 = vld [vmem:[#allocation10 + $0xa0] sm:$0xff]  }
  0x7b   :  { %v184_v34 = vcombine.low %v162_v28, %v169_v29  ;;  %v185_v35 = vcombine.low %v176_v30, %v183_v31  ;;  %v5545_v49 = vld [vmem:[#allocation10 + $0xa8] sm:$0xff]   ;;  %v4796_v50 = vld [vmem:[%s7419_s7 + $0x6] ss:$0 sm:$0xff]  ;;  %v5546_v60 = vld [vmem:[#allocation10 + $0xb0] sm:$0xff]  }
  0x7c   :  { %5376 = vmatpush3.bf16.msra.mxu0 %v5526_v6  ;;  %5396 = vmatpush3.bf16.msra.mxu1 %v5534_v27  ;;  %v5547_v61 = vld [vmem:[#allocation10 + $0xb8] sm:$0xff]   ;;  %v5550_v62 = vld [vmem:[#allocation5 + $0x4] ss:$16 sps:$4 sm:$0xff]   ;;  %v5600_v2 = vld [vmem:[#allocation2 + $0x18] ss:$6 sps:$4 sm:$0xff]  }
  0x7d   :  { %5377 = vmatprep.subr.bf16.mxu0 %v6474_v0  ;;  %5397 = vmatprep.subr.bf16.mxu1 %v6474_v0  ;;  %v192_v38 = vrot.slane %v184_v34, %v6646_v19  ;;  %v199_v39 = vrot.slane %v185_v35, %v6646_v19  ;;  %v5596_v63 = vld [vmem:[#allocation2] ss:$6 sps:$4 sm:$0xff]   ;;  %v5598_v1 = vld [vmem:[#allocation2 + $0xc] ss:$6 sps:$4 sm:$0xff]   ;;  %v908_v6 = vrot.slane %v5600_v2, %v6646_v19 }
  0x7e   :  { %v5602_v3 = vld [vmem:[#allocation2 + $0x24] ss:$6 sps:$4 sm:$0xff]   ;;  %v880_v4 = vrot.slane %v5596_v63, %v6646_v19  ;;  %v894_v5 = vrot.slane %v5598_v1, %v6646_v19  ;;  %v4805_v14 = vld [vmem:[%s7419_s7 + $0x7] ss:$0 sm:$0xff]  ;;  %v5548_v28 = vld [vmem:[#allocation5] ss:$16 sps:$4 sm:$0xff]  }
  0x7f   :  { %v200_v41 = vcombine.low %v192_v38, %v199_v39  ;;  %v5551_v34 = vld [vmem:[#allocation5 + $0x20] ss:$16 sps:$4 sm:$0xff]   ;;  %v5556_v35 = vld [vmem:[#allocation5 + $0x44] ss:$16 sps:$4 sm:$0xff]  }
  0x80   :  { %5378 = vmatpush3.bf16.msra.mxu0 %v5527_v8  ;;  %5398 = vmatpush3.bf16.msra.mxu1 %v5535_v32  ;;  %v922_v8 = vrot.slane %v5602_v3, %v6646_v19  ;;  %v930_v9 = vcombine.low %v880_v4, %v894_v5  ;;  %v931_v15 = vcombine.high %v880_v4, %v894_v5  ;;  %v5553_v32 = vld [vmem:[#allocation5 + $0x24] ss:$16 sps:$4 sm:$0xff]   ;;  %v5557_v38 = vld [vmem:[#allocation5 + $0x60] ss:$16 sps:$4 sm:$0xff]   ;;  %v5699_v3 = vld [vmem:[#allocation10 + $0xe8] sm:$0xff]  }
  0x81   :  { %5379 = vmatprep.subr.bf16.mxu0 %v6474_v0  ;;  %5399 = vmatprep.subr.bf16.mxu1 %v6474_v0  ;;  %v5562_v39 = vld [vmem:[#allocation5 + $0x84] ss:$16 sps:$4 sm:$0xff]   ;;  %v5590_v2 = vld [vmem:[#allocation5 + $0x1c0] ss:$16 sps:$4 sm:$0xff]  }
  0x82   :  { %v934_v10 = vcombine.low %v908_v6, %v922_v8  ;;  %v944_v11 = vrot.slane %v930_v9, %v6646_v19  ;;  %v935_v16 = vcombine.high %v908_v6, %v922_v8  ;;  %v958_v22 = vrot.slane %v931_v15, %v6646_v19  ;;  %v5695_v63 = vld [vmem:[#allocation10 + $0xe0] sm:$0xff]  }
  0x83   :  { %v5592_v1 = vld [vmem:[#allocation5 + $0x1c4] ss:$16 sps:$4 sm:$0xff]   ;;  %v5593_v5 = vld [vmem:[#allocation5 + $0x1e0] ss:$16 sps:$4 sm:$0xff]  }
  0x84   :  { %5380 = vmatpush3.bf16.msra.mxu0 %v5528_v25  ;;  %5400 = vmatpush3.bf16.msra.mxu1 %v5536_v36  ;;  %v972_v12 = vrot.slane %v934_v10, %v6646_v19  ;;  %v986_v23 = vrot.slane %v935_v16, %v6646_v19  ;;  %v5554_v36 = vld [vmem:[#allocation5 + $0x40] ss:$16 sps:$4 sm:$0xff]   ;;  %v5595_v4 = vld [vmem:[#allocation5 + $0x1e4] ss:$16 sps:$4 sm:$0xff]  }
  0x85   :  { %5381 = vmatprep.subr.bf16.mxu0 %v6474_v0  ;;  %5401 = vmatprep.subr.bf16.mxu1 %v6474_v0  ;;  %v5606_v6 = vld [vmem:[#allocation5 + $0x204] ss:$16 sps:$4 sm:$0xff]   ;;  %v5604_v8 = vld [vmem:[#allocation5 + $0x200] ss:$16 sps:$4 sm:$0xff]  }
  0x86   :  { %v6687_v13 = vcombine.low %v944_v11, %v972_v12  ;;  %v6694_v29 = vcombine.low %v958_v22, %v986_v23  ;;  %v6696_v30 = vcombine.high %v958_v22, %v986_v23  ;;  %v5609_v9 = vld [vmem:[#allocation5 + $0x224] ss:$16 sps:$4 sm:$0xff]   ;;  %v5607_v10 = vld [vmem:[#allocation5 + $0x220] ss:$16 sps:$4 sm:$0xff]  }
  0x87   :  { %v5613_v15 = vld [vmem:[#allocation5 + $0x260] ss:$16 sps:$4 sm:$0xff]   ;;  %v5618_v16 = vld [vmem:[#allocation5 + $0x284] ss:$16 sps:$4 sm:$0xff]  }
  0x88   :  { %5382 = vmatpush3.bf16.msra.mxu0 %v5529_v26  ;;  %5402 = vmatpush3.bf16.msra.mxu1 %v5537_v40  ;;  %v5560_v40 = vld [vmem:[#allocation5 + $0x80] ss:$16 sps:$4 sm:$0xff]   ;;  %v5711_v23 = vld [vmem:[#allocation2 + $0x28] ss:$6 sps:$4 sm:$0x33]  }
  0x89   :  { %5383 = vmatprep.subr.bf16.mxu0 %v6474_v0  ;;  %5403 = vmatprep.subr.bf16.mxu1 %v6474_v0  ;;  %v5710_v22 = vld [vmem:[#allocation2 + $0x1c] ss:$6 sps:$4 sm:$0x33]  }
  0x8c   :  { %5384 = vmatpush3.bf16.msra.mxu0 %v5530_v33  ;;  %5404 = vmatpush3.bf16.msra.mxu1 %v5538_v42  ;;  %v6698_v33 = vcombine.high %v944_v11, %v972_v12  ;;  %v5563_v42 = vld [vmem:[#allocation5 + $0xa0] ss:$16 sps:$4 sm:$0xff]   ;;  %v5612_v11 = vld [vmem:[#allocation5 + $0x244] ss:$16 sps:$4 sm:$0xff]  }
  0x8d   :  { %5385 = vmatprep.subr.bf16.mxu0 %v6474_v0  ;;  %5405 = vmatprep.subr.bf16.mxu1 %v6474_v0  ;;  %v5610_v12 = vld [vmem:[#allocation5 + $0x240] ss:$16 sps:$4 sm:$0xff]  }
  0x90   :  { %5386 = vmatpush3.bf16.msra.mxu0 %v5531_v37  ;;  %5406 = vmatpush3.bf16.msra.mxu1 %v5539_v43  ;;  %v5559_v37 = vld [vmem:[#allocation5 + $0x64] ss:$16 sps:$4 sm:$0xff]  }
  0x91   :  { %5411 = vmatprep.subr.bf16.mxu0 %v6474_v0  ;;  %5431 = vmatprep.subr.bf16.mxu1 %v6474_v0  ;;  %v5568_v43 = vld [vmem:[#allocation5 + $0xc4] ss:$16 sps:$4 sm:$0xff]  }
  0x93   :  { %5388 = vmatmul.mubr.bf16.vlgmr.msra.gmra.mrb[0].mxu0 %v200_v41  ;;  %v5565_v41 = vld [vmem:[#allocation5 + $0xa4] ss:$16 sps:$4 sm:$0xff]  }
  0x94   :  { %5427 = vmatprep.mubr.msk.bf16.mxu0 %vm6475_vm0, %v6474_v0  ;;  %5412 = vmatpush3.bf16.msra.mxu0 %v5540_v44  ;;  %v5566_v44 = vld [vmem:[#allocation5 + $0xc0] ss:$16 sps:$4 sm:$0xff]  }
  0x95   :  { %5413 = vmatprep.subr.bf16.mxu0 %v6474_v0 }
  0x98   :  { %5414 = vmatpush3.bf16.msra.mxu0 %v5541_v45  ;;  %v5571_v45 = vld [vmem:[#allocation5 + $0xe4] ss:$16 sps:$4 sm:$0xff]  }
  0x99   :  { %5415 = vmatprep.subr.bf16.mxu0 %v6474_v0 }
  0x9c   :  { %5416 = vmatpush3.bf16.msra.mxu0 %v5542_v46  ;;  %v5569_v46 = vld [vmem:[#allocation5 + $0xe0] ss:$16 sps:$4 sm:$0xff]  }
  0x9d   :  { %5417 = vmatprep.subr.bf16.mxu0 %v6474_v0 }
  0xa0   :  { %5418 = vmatpush3.bf16.msra.mxu0 %v5543_v47  ;;  %v5574_v47 = vld [vmem:[#allocation5 + $0x104] ss:$16 sps:$4 sm:$0xff]  }
  0xa1   :  { %5419 = vmatprep.subr.bf16.mxu0 %v6474_v0 }
  0xa4   :  { %5420 = vmatpush3.bf16.msra.mxu0 %v5544_v48  ;;  %v5572_v48 = vld [vmem:[#allocation5 + $0x100] ss:$16 sps:$4 sm:$0xff]  }
  0xa5   :  { %5421 = vmatprep.subr.bf16.mxu0 %v6474_v0 }
  0xa8   :  { %5422 = vmatpush3.bf16.msra.mxu0 %v5545_v49  ;;  %v5577_v49 = vld [vmem:[#allocation5 + $0x124] ss:$16 sps:$4 sm:$0xff]  }
  0xa9   :  { %5423 = vmatprep.subr.bf16.mxu0 %v6474_v0 }
  0xac   :  { %5424 = vmatpush3.bf16.msra.mxu0 %v5546_v60  ;;  %v5691_v60 = vld [vmem:[#allocation10 + $0xd8] sm:$0xff]  }
  0xad   :  { %5425 = vmatprep.subr.bf16.mxu0 %v6474_v0 }
  0xb0   :  { %5426 = vmatpush3.bf16.msra.mxu0 %v5547_v61  ;;  %v5589_v61 = vld [vmem:[#allocation5 + $0x1a4] ss:$16 sps:$4 sm:$0xff]  }
  0xb1   :  { %1966 = vmatprep.subr.bf16.mxu0 %v5550_v62  ;;  %v5587_v62 = vld [vmem:[#allocation5 + $0x1a0] ss:$16 sps:$4 sm:$0xff]  }
 0x166   :  { %v284_v51 = vpop.f32.mrb[0].mxu0 }
 0x167   :  { %v285_v52 = vadd.f32 %v4796_v50, %v284_v51  ;;  %v5389_v53 = vpop.f32.mrb[1].mxu0  ;;  %v5679_v51 = vld [vmem:[#allocation10 + $0xc0] sm:$0xff]  }
 0x168   :  { %v287_v54 = vpop.f32.mrb[2].mxu0  ;;  %v5578_v53 = vld [vmem:[#allocation5 + $0x140] ss:$16 sps:$4 sm:$0xff]  }
 0x169   :  { %v288_v55 = vadd.f32 %v4796_v50, %v287_v54  ;;  %v5390_v56 = vpop.f32.mrb[3].mxu0  ;;  %v291_v57 = vmax.f32 %v285_v52, 0.0  ;;  %v5575_v50 = vld [vmem:[#allocation5 + $0x120] ss:$16 sps:$4 sm:$0xff]   ;;  %v5580_v52 = vld [vmem:[#allocation5 + $0x144] ss:$16 sps:$4 sm:$0xff]  }
 0x16a   :  { %v5683_v54 = vld [vmem:[#allocation10 + $0xc8] sm:$0xff]   ;;  %v5581_v56 = vld [vmem:[#allocation5 + $0x160] ss:$16 sps:$4 sm:$0xff]  }
 0x16b   :  { %v292_v58 = vmax.f32 %v288_v55, 0.0  ;;  %v5583_v55 = vld [vmem:[#allocation5 + $0x164] ss:$16 sps:$4 sm:$0xff]  }
 0x16d   :  { %v293_v59 = vpack.c.bf16 %v292_v58, %v291_v57  ;;  %v5687_v57 = vld [vmem:[#allocation10 + $0xd0] sm:$0xff]  }
 0x16e   :  { %v5586_v58 = vld [vmem:[#allocation5 + $0x184] ss:$16 sps:$4 sm:$0xff]  }
 0x16f   :  { %5408 = vmatmul.mubr.bf16.vlgmr.msra.gmra.mrb[0].mxu1 %v293_v59  ;;  %v5584_v59 = vld [vmem:[#allocation5 + $0x180] ss:$16 sps:$4 sm:$0xff]  }
 0x170   :  { %5447 = vmatprep.mubr.msk.bf16.mxu1 %vm6475_vm0, %v6474_v0  ;;  %5432 = vmatpush3.bf16.msra.mxu1 %v5679_v51  ;;  %v5642_v51 = vld [vmem:[#allocation5 + $0x384] ss:$16 sps:$4 sm:$0xff]  }
 0x171   :  { %5433 = vmatprep.subr.bf16.mxu1 %v6474_v0 }
 0x174   :  { %5434 = vmatpush3.bf16.msra.mxu1 %v5683_v54  ;;  %v5643_v54 = vld [vmem:[#allocation5 + $0x3a0] ss:$16 sps:$4 sm:$0xff]  }
 0x175   :  { %5435 = vmatprep.subr.bf16.mxu1 %v6474_v0 }
 0x178   :  { %5436 = vmatpush3.bf16.msra.mxu1 %v5687_v57 }
 0x179   :  { %5437 = vmatprep.subr.bf16.mxu1 %v6474_v0 }
 0x17c   :  { %5438 = vmatpush3.bf16.msra.mxu1 %v5691_v60  ;;  %v5649_v60 = vld [vmem:[#allocation5 + $0x3e0] ss:$16 sps:$4 sm:$0xff]  }
 0x17d   :  { %5439 = vmatprep.subr.bf16.mxu1 %v6474_v0 }
 0x180   :  { %5440 = vmatpush3.bf16.msra.mxu1 %v5695_v63  ;;  %v5654_v63 = vld [vmem:[#allocation5 + $0x404] ss:$16 sps:$4 sm:$0xff]  }
 0x181   :  { %5441 = vmatprep.subr.bf16.mxu1 %v6474_v0 }
 0x184   :  { %5442 = vmatpush3.bf16.msra.mxu1 %v5699_v3  ;;  %v5657_v3 = vld [vmem:[#allocation5 + $0x424] ss:$16 sps:$4 sm:$0xff]  }
 0x185   :  { %5443 = vmatprep.subr.bf16.mxu1 %v6474_v0 }
 0x242   :  { %v399_v17 = vpop.f32.mrb[0].mxu1 }
 0x243   :  { %v400_v18 = vadd.f32 %v4805_v14, %v399_v17  ;;  %v5409_v20 = vpop.f32.mrb[1].mxu1  ;;  %v5616_v17 = vld [vmem:[#allocation5 + $0x280] ss:$16 sps:$4 sm:$0xff]  }
 0x244   :  { %v402_v21 = vpop.f32.mrb[2].mxu1  ;;  %v5708_v20 = vld [vmem:[#allocation2 + $0x4] ss:$6 sps:$4 sm:$0x33]  }
 0x245   :  { %v403_v24 = vadd.f32 %v4805_v14, %v402_v21  ;;  %v5410_v25 = vpop.f32.mrb[3].mxu1  ;;  %v406_v26 = vmax.f32 %v400_v18, 0.0  ;;  %v5615_v14 = vld [vmem:[#allocation5 + $0x264] ss:$16 sps:$4 sm:$0xff]  }
 0x246   :  { %v5621_v18 = vld [vmem:[#allocation5 + $0x2a4] ss:$16 sps:$4 sm:$0xff]  }
 0x247   :  { %v407_v27 = vmax.f32 %v403_v24, 0.0  ;;  %v5709_v21 = vld [vmem:[#allocation2 + $0x10] ss:$6 sps:$4 sm:$0x33]   ;;  %v887_v24 = vrot.slane %v5708_v20, %v6646_v19 }
 0x248   :  { %v901_v25 = vrot.slane %v5709_v21, %v6646_v19  ;;  %v5676_v20 = vld [vmem:[#allocation5 + $0x500] ss:$16 sps:$4 sm:$0xff]   ;;  %v5682_v21 = vld [vmem:[#allocation5 + $0x524] ss:$16 sps:$4 sm:$0xff]  }
 0x249   :  { %v408_v31 = vpack.c.bf16 %v407_v27, %v406_v26  ;;  %v5619_v26 = vld [vmem:[#allocation5 + $0x2a0] ss:$16 sps:$4 sm:$0xff]   ;;  %v915_v27 = vrot.slane %v5710_v22, %v6646_v19 }
 0x24a   :  { %v933_v57 = vcombine.high %v887_v24, %v901_v25  ;;  %v5680_v22 = vld [vmem:[#allocation5 + $0x520] ss:$16 sps:$4 sm:$0xff]  }
 0x24b   :  { %5428 = vmatmul.mubr.bf16.vlgmr.msra.gmra.mrb[4].mxu0 %v408_v31  ;;  %v5624_v31 = vld [vmem:[#allocation5 + $0x2c4] ss:$16 sps:$4 sm:$0xff]  }
 0x24c   :  { %1967 = vmatpush1.bf16.msra.mxu0 %v5548_v28  ;;  %1998 = vmatprep.mubr.bf16.mxu0 %v6694_v29  ;;  %v929_v28 = vrot.slane %v5711_v23, %v6646_v19  ;;  %v5686_v23 = vld [vmem:[#allocation5 + $0x544] ss:$16 sps:$4 sm:$0xff]  }
 0x24d   :  { %1968 = vmatprep.subr.bf16.mxu0 %v5553_v32  ;;  %v5703_v32 = vld [vmem:[#allocation10 + $0xf0] sm:$0xff]  }
 0x24e   :  { %5444 = vmatpush3.bf16.msra.mxu1 %v5703_v32  ;;  %v5696_v32 = vld [vmem:[#allocation5 + $0x5a0] ss:$16 sps:$4 sm:$0xff]  }
 0x24f   :  { %5445 = vmatprep.subr.bf16.mxu1 %v6474_v0  ;;  %v5633_v0 = vld [vmem:[#allocation5 + $0x324] ss:$16 sps:$4 sm:$0xff]  }
 0x250   :  { %1969 = vmatpush1.bf16.msra.mxu0 %v5551_v34  ;;  %v932_v34 = vcombine.low %v887_v24, %v901_v25  ;;  %v5684_v24 = vld [vmem:[#allocation5 + $0x540] ss:$16 sps:$4 sm:$0xff]   ;;  %v5690_v25 = vld [vmem:[#allocation5 + $0x564] ss:$16 sps:$4 sm:$0xff]  }
 0x251   :  { %1970 = vmatprep.subr.bf16.mxu0 %v5556_v35  ;;  %v936_v35 = vcombine.low %v915_v27, %v929_v28 }
 0x254   :  { %1971 = vmatpush1.bf16.msra.mxu0 %v5554_v36  ;;  %v5622_v36 = vld [vmem:[#allocation5 + $0x2c0] ss:$16 sps:$4 sm:$0xff]  }
 0x255   :  { %1972 = vmatprep.subr.bf16.mxu0 %v5559_v37  ;;  %v951_v37 = vrot.slane %v932_v34, %v6646_v19  ;;  %v5702_v34 = vld [vmem:[#allocation5 + $0x5c4] ss:$16 sps:$4 sm:$0xff]  }
 0x258   :  { %1973 = vmatpush1.bf16.msra.mxu0 %v5557_v38  ;;  %v979_v38 = vrot.slane %v936_v35, %v6646_v19  ;;  %v5700_v35 = vld [vmem:[#allocation5 + $0x5c0] ss:$16 sps:$4 sm:$0xff]  }
 0x259   :  { %1974 = vmatprep.subr.bf16.mxu0 %v5562_v39  ;;  %v5627_v39 = vld [vmem:[#allocation5 + $0x2e4] ss:$16 sps:$4 sm:$0xff]  }
 0x25c   :  { %1975 = vmatpush1.bf16.msra.mxu0 %v5560_v40  ;;  %v5707_v40 = vld [vmem:[#allocation10 + $0xf8] sm:$0xff]  }
 0x25d   :  { %1976 = vmatprep.subr.bf16.mxu0 %v5565_v41  ;;  %v6716_v41 = vcombine.low %v951_v37, %v979_v38  ;;  %5446 = vmatpush3.bf16.msra.mxu1 %v5707_v40  ;;  %v5704_v37 = vld [vmem:[#allocation5 + $0x5e0] ss:$16 sps:$4 sm:$0xff]  }
 0x25e   :  { %v4814_v38 = vld [vmem:[%s7419_s7 + $0x8] ss:$0 sm:$0xff] }
 0x260   :  { %1977 = vmatpush1.bf16.msra.mxu0 %v5563_v42  ;;  %v5625_v42 = vld [vmem:[#allocation5 + $0x2e0] ss:$16 sps:$4 sm:$0xff]  }
 0x261   :  { %1978 = vmatprep.subr.bf16.mxu0 %v5568_v43  ;;  %v5714_v43 = vld [vmem:[#allocation5 + $0xc] ss:$16 sps:$4 sm:$0xff]  }
 0x262   :  { %2095 = vmatprep.subr.bf16.mxu1 %v5714_v43 }
 0x264   :  { %1979 = vmatpush1.bf16.msra.mxu0 %v5566_v44  ;;  %v5630_v44 = vld [vmem:[#allocation5 + $0x304] ss:$16 sps:$4 sm:$0xff]  }
 0x265   :  { %1980 = vmatprep.subr.bf16.mxu0 %v5571_v45  ;;  %v5628_v45 = vld [vmem:[#allocation5 + $0x300] ss:$16 sps:$4 sm:$0xff]  }
 0x268   :  { %1981 = vmatpush1.bf16.msra.mxu0 %v5569_v46  ;;  %v5631_v46 = vld [vmem:[#allocation5 + $0x320] ss:$16 sps:$4 sm:$0xff]  }
 0x269   :  { %1982 = vmatprep.subr.bf16.mxu0 %v5574_v47  ;;  %v5636_v47 = vld [vmem:[#allocation5 + $0x344] ss:$16 sps:$4 sm:$0xff]  }
 0x26c   :  { %1983 = vmatpush1.bf16.msra.mxu0 %v5572_v48  ;;  %v5634_v48 = vld [vmem:[#allocation5 + $0x340] ss:$16 sps:$4 sm:$0xff]  }
 0x26d   :  { %1984 = vmatprep.subr.bf16.mxu0 %v5577_v49  ;;  %v5639_v49 = vld [vmem:[#allocation5 + $0x364] ss:$16 sps:$4 sm:$0xff]  }
 0x270   :  { %1985 = vmatpush1.bf16.msra.mxu0 %v5575_v50  ;;  %v5637_v50 = vld [vmem:[#allocation5 + $0x360] ss:$16 sps:$4 sm:$0xff]  }
 0x271   :  { %1986 = vmatprep.subr.bf16.mxu0 %v5580_v52  ;;  %v5640_v52 = vld [vmem:[#allocation5 + $0x380] ss:$16 sps:$4 sm:$0xff]  }
 0x274   :  { %1987 = vmatpush1.bf16.msra.mxu0 %v5578_v53  ;;  %v5645_v53 = vld [vmem:[#allocation5 + $0x3a4] ss:$16 sps:$4 sm:$0xff]  }
 0x275   :  { %1988 = vmatprep.subr.bf16.mxu0 %v5583_v55  ;;  %v5648_v55 = vld [vmem:[#allocation5 + $0x3c4] ss:$16 sps:$4 sm:$0xff]  }
 0x278   :  { %1989 = vmatpush1.bf16.msra.mxu0 %v5581_v56  ;;  %v5646_v56 = vld [vmem:[#allocation5 + $0x3c0] ss:$16 sps:$4 sm:$0xff]  }
 0x279   :  { %1990 = vmatprep.subr.bf16.mxu0 %v5586_v58  ;;  %v937_v58 = vcombine.high %v915_v27, %v929_v28  ;;  %v5694_v27 = vld [vmem:[#allocation5 + $0x584] ss:$16 sps:$4 sm:$0xff]   ;;  %v5692_v28 = vld [vmem:[#allocation5 + $0x580] ss:$16 sps:$4 sm:$0xff]  }
 0x27c   :  { %1991 = vmatpush1.bf16.msra.mxu0 %v5584_v59  ;;  %v5651_v59 = vld [vmem:[#allocation5 + $0x3e4] ss:$16 sps:$4 sm:$0xff]  }
 0x27d   :  { %1992 = vmatprep.subr.bf16.mxu0 %v5589_v61  ;;  %v965_v61 = vrot.slane %v933_v57, %v6646_v19  ;;  %v5729_v57 = vld [vmem:[#allocation5 + $0xac] ss:$16 sps:$4 sm:$0xff]  }
 0x280   :  { %1993 = vmatpush1.bf16.msra.mxu0 %v5587_v62  ;;  %v993_v62 = vrot.slane %v937_v58, %v6646_v19  ;;  %v5663_v19 = vld [vmem:[#allocation5 + $0x464] ss:$16 sps:$4 sm:$0xff]   ;;  %v5727_v58 = vld [vmem:[#allocation5 + $0xa8] ss:$16 sps:$4 sm:$0xff]  }
 0x281   :  { %1994 = vmatprep.subr.bf16.mxu0 %v5592_v1  ;;  %v5652_v1 = vld [vmem:[#allocation5 + $0x400] ss:$16 sps:$4 sm:$0xff]  }
 0x284   :  { %1995 = vmatpush1.bf16.msra.mxu0 %v5590_v2  ;;  %v6720_v2 = vcombine.low %v965_v61, %v993_v62  ;;  %v6729_v61 = vld [vmem:[#allocation7 + $0x4] ss:$16 sps:$4 sm:$0xff]   ;;  %v5733_v62 = vld [vmem:[#allocation5 + $0xe8] ss:$16 sps:$4 sm:$0xff]  }
 0x285   :  { %1996 = vmatprep.subr.bf16.mxu0 %v5595_v4  ;;  %v5655_v4 = vld [vmem:[#allocation5 + $0x420] ss:$16 sps:$4 sm:$0xff]  }
 0x288   :  { %1997 = vmatpush1.bf16.msra.mxu0 %v5593_v5  ;;  %v5660_v5 = vld [vmem:[#allocation5 + $0x444] ss:$16 sps:$4 sm:$0xff]  }
 0x289   :  { %2009 = vmatprep.subr.bf16.mxu0 %v5606_v6  ;;  %v5658_v6 = vld [vmem:[#allocation5 + $0x440] ss:$16 sps:$4 sm:$0xff]  }
 0x28b   :  { %1999 = vmatmul.mubr.bf16.vlgmr.msra.gmra.mrb[8].mxu0 %v6687_v13 }
 0x28c   :  { %2010 = vmatpush1.bf16.msra.mxu0 %v5604_v8  ;;  %2041 = vmatprep.mubr.bf16.mxu0 %v6696_v30  ;;  %v5661_v8 = vld [vmem:[#allocation5 + $0x460] ss:$16 sps:$4 sm:$0xff]  }
 0x28d   :  { %2011 = vmatprep.subr.bf16.mxu0 %v5609_v9  ;;  %v5666_v9 = vld [vmem:[#allocation5 + $0x484] ss:$16 sps:$4 sm:$0xff]  }
 0x290   :  { %2012 = vmatpush1.bf16.msra.mxu0 %v5607_v10  ;;  %v5664_v10 = vld [vmem:[#allocation5 + $0x480] ss:$16 sps:$4 sm:$0xff]  }
 0x291   :  { %2013 = vmatprep.subr.bf16.mxu0 %v5612_v11  ;;  %v5669_v11 = vld [vmem:[#allocation5 + $0x4a4] ss:$16 sps:$4 sm:$0xff]  }
 0x294   :  { %2014 = vmatpush1.bf16.msra.mxu0 %v5610_v12  ;;  %v5667_v12 = vld [vmem:[#allocation5 + $0x4a0] ss:$16 sps:$4 sm:$0xff]  }
 0x295   :  { %2015 = vmatprep.subr.bf16.mxu0 %v5615_v14  ;;  %v5672_v14 = vld [vmem:[#allocation5 + $0x4c4] ss:$16 sps:$4 sm:$0xff]  }
 0x298   :  { %2016 = vmatpush1.bf16.msra.mxu0 %v5613_v15  ;;  %v5670_v15 = vld [vmem:[#allocation5 + $0x4c0] ss:$16 sps:$4 sm:$0xff]  }
 0x299   :  { %2017 = vmatprep.subr.bf16.mxu0 %v5618_v16  ;;  %v5675_v16 = vld [vmem:[#allocation5 + $0x4e4] ss:$16 sps:$4 sm:$0xff]  }
 0x29c   :  { %2018 = vmatpush1.bf16.msra.mxu0 %v5616_v17  ;;  %v5673_v17 = vld [vmem:[#allocation5 + $0x4e0] ss:$16 sps:$4 sm:$0xff]  }
 0x29d   :  { %2019 = vmatprep.subr.bf16.mxu0 %v5621_v18  ;;  %v5678_v18 = vld [vmem:[#allocation5 + $0x504] ss:$16 sps:$4 sm:$0xff]  }
 0x2a0   :  { %2020 = vmatpush1.bf16.msra.mxu0 %v5619_v26  ;;  %v5688_v26 = vld [vmem:[#allocation5 + $0x560] ss:$16 sps:$4 sm:$0xff]  }
 0x2a1   :  { %2021 = vmatprep.subr.bf16.mxu0 %v5624_v31  ;;  %v5698_v31 = vld [vmem:[#allocation5 + $0x5a4] ss:$16 sps:$4 sm:$0xff]  }
 0x2a4   :  { %2022 = vmatpush1.bf16.msra.mxu0 %v5622_v36  ;;  %v5706_v36 = vld [vmem:[#allocation5 + $0x5e4] ss:$16 sps:$4 sm:$0xff]  }
 0x2a5   :  { %2023 = vmatprep.subr.bf16.mxu0 %v5627_v39 }
 0x2a8   :  { %2024 = vmatpush1.bf16.msra.mxu0 %v5625_v42 }
 0x2a9   :  { %2025 = vmatprep.subr.bf16.mxu0 %v5630_v44 }
 0x2ac   :  { %2026 = vmatpush1.bf16.msra.mxu0 %v5628_v45 }
 0x2ad   :  { %2027 = vmatprep.subr.bf16.mxu0 %v5633_v0 }
 0x2b0   :  { %2028 = vmatpush1.bf16.msra.mxu0 %v5631_v46 }
 0x2b1   :  { %2029 = vmatprep.subr.bf16.mxu0 %v5636_v47  ;;  %v5712_v47 = vld [vmem:[#allocation5 + $0x8] ss:$16 sps:$4 sm:$0xff]  }
 0x2b4   :  { %2030 = vmatpush1.bf16.msra.mxu0 %v5634_v48 }
 0x2b5   :  { %2031 = vmatprep.subr.bf16.mxu0 %v5639_v49  ;;  %v5717_v49 = vld [vmem:[#allocation5 + $0x2c] ss:$16 sps:$4 sm:$0xff]  }
 0x2b8   :  { %2032 = vmatpush1.bf16.msra.mxu0 %v5637_v50  ;;  %v5715_v50 = vld [vmem:[#allocation5 + $0x28] ss:$16 sps:$4 sm:$0xff]  }
 0x2b9   :  { %2033 = vmatprep.subr.bf16.mxu0 %v5642_v51  ;;  %v5720_v51 = vld [vmem:[#allocation5 + $0x4c] ss:$16 sps:$4 sm:$0xff]  }
 0x2bc   :  { %2034 = vmatpush1.bf16.msra.mxu0 %v5640_v52  ;;  %v5718_v52 = vld [vmem:[#allocation5 + $0x48] ss:$16 sps:$4 sm:$0xff]  }
 0x2bd   :  { %2035 = vmatprep.subr.bf16.mxu0 %v5645_v53  ;;  %v5723_v53 = vld [vmem:[#allocation5 + $0x6c] ss:$16 sps:$4 sm:$0xff]  }
 0x2c0   :  { %2036 = vmatpush1.bf16.msra.mxu0 %v5643_v54  ;;  %v5721_v54 = vld [vmem:[#allocation5 + $0x68] ss:$16 sps:$4 sm:$0xff]  }
 0x2c1   :  { %2037 = vmatprep.subr.bf16.mxu0 %v5648_v55  ;;  %v5726_v55 = vld [vmem:[#allocation5 + $0x8c] ss:$16 sps:$4 sm:$0xff]  }
 0x2c4   :  { %2038 = vmatpush1.bf16.msra.mxu0 %v5646_v56  ;;  %v5724_v56 = vld [vmem:[#allocation5 + $0x88] ss:$16 sps:$4 sm:$0xff]  }
 0x2c5   :  { %2039 = vmatprep.subr.bf16.mxu0 %v5651_v59  ;;  %v5732_v59 = vld [vmem:[#allocation5 + $0xcc] ss:$16 sps:$4 sm:$0xff]  }
 0x2c8   :  { %2040 = vmatpush1.bf16.msra.mxu0 %v5649_v60  ;;  %v5735_v60 = vld [vmem:[#allocation5 + $0xec] ss:$16 sps:$4 sm:$0xff]  }
 0x2c9   :  { %2052 = vmatprep.subr.bf16.mxu0 %v5654_v63  ;;  %v6731_v63 = vld [vmem:[#allocation7] ss:$16 sps:$4 sm:$0xff]  }
 0x2cb   :  { %2042 = vmatmul.mubr.bf16.vlgmr.msra.gmra.mrb[8].mxu0 %v6698_v33 }
 0x2cc   :  { %2053 = vmatpush1.bf16.msra.mxu0 %v5652_v1  ;;  %2084 = vmatprep.mubr.bf16.mxu0 %v6720_v2  ;;  %v5738_v1 = vld [vmem:[#allocation5 + $0x10c] ss:$16 sps:$4 sm:$0xff]  }
 0x2cd   :  { %2054 = vmatprep.subr.bf16.mxu0 %v5657_v3  ;;  %v6735_v3 = vld [vmem:[#allocation7 + $0x24] ss:$16 sps:$4 sm:$0xff]  }
 0x2d0   :  { %2055 = vmatpush1.bf16.msra.mxu0 %v5655_v4  ;;  %v5736_v4 = vld [vmem:[#allocation5 + $0x108] ss:$16 sps:$4 sm:$0xff]  }
 0x2d1   :  { %2056 = vmatprep.subr.bf16.mxu0 %v5660_v5  ;;  %v6737_v5 = vld [vmem:[#allocation7 + $0x20] ss:$16 sps:$4 sm:$0xff]  }
 0x2d4   :  { %2057 = vmatpush1.bf16.msra.mxu0 %v5658_v6  ;;  %v5741_v6 = vld [vmem:[#allocation5 + $0x12c] ss:$16 sps:$4 sm:$0xff]  }
 0x2d5   :  { %2058 = vmatprep.subr.bf16.mxu0 %v5663_v19  ;;  %v6741_v19 = vld [vmem:[#allocation7 + $0x44] ss:$16 sps:$4 sm:$0xff]  }
 0x2d8   :  { %2059 = vmatpush1.bf16.msra.mxu0 %v5661_v8  ;;  %v5739_v8 = vld [vmem:[#allocation5 + $0x128] ss:$16 sps:$4 sm:$0xff]  }
 0x2d9   :  { %2060 = vmatprep.subr.bf16.mxu0 %v5666_v9  ;;  %v6743_v9 = vld [vmem:[#allocation7 + $0x40] ss:$16 sps:$4 sm:$0xff]  }
 0x2dc   :  { %2061 = vmatpush1.bf16.msra.mxu0 %v5664_v10  ;;  %v5744_v10 = vld [vmem:[#allocation5 + $0x14c] ss:$16 sps:$4 sm:$0xff]  }
 0x2dd   :  { %2062 = vmatprep.subr.bf16.mxu0 %v5669_v11  ;;  %v6747_v11 = vld [vmem:[#allocation7 + $0x64] ss:$16 sps:$4 sm:$0xff]  }
 0x2e0   :  { %2063 = vmatpush1.bf16.msra.mxu0 %v5667_v12  ;;  %v5742_v12 = vld [vmem:[#allocation5 + $0x148] ss:$16 sps:$4 sm:$0xff]  }
 0x2e1   :  { %2064 = vmatprep.subr.bf16.mxu0 %v5672_v14  ;;  %v6749_v14 = vld [vmem:[#allocation7 + $0x60] ss:$16 sps:$4 sm:$0xff]  }
 0x2e4   :  { %2065 = vmatpush1.bf16.msra.mxu0 %v5670_v15  ;;  %v5747_v15 = vld [vmem:[#allocation5 + $0x16c] ss:$16 sps:$4 sm:$0xff]  }
 0x2e5   :  { %2066 = vmatprep.subr.bf16.mxu0 %v5675_v16  ;;  %v6753_v16 = vld [vmem:[#allocation7 + $0x84] ss:$16 sps:$4 sm:$0xff]  }
 0x2e8   :  { %2067 = vmatpush1.bf16.msra.mxu0 %v5673_v17  ;;  %v5745_v17 = vld [vmem:[#allocation5 + $0x168] ss:$16 sps:$4 sm:$0xff]  }
 0x2e9   :  { %2068 = vmatprep.subr.bf16.mxu0 %v5678_v18  ;;  %v6755_v18 = vld [vmem:[#allocation7 + $0x80] ss:$16 sps:$4 sm:$0xff]  }
 0x2ec   :  { %2069 = vmatpush1.bf16.msra.mxu0 %v5676_v20  ;;  %v5750_v20 = vld [vmem:[#allocation5 + $0x18c] ss:$16 sps:$4 sm:$0xff]  }
 0x2ed   :  { %2070 = vmatprep.subr.bf16.mxu0 %v5682_v21  ;;  %v6759_v21 = vld [vmem:[#allocation7 + $0xa4] ss:$16 sps:$4 sm:$0xff]  }
 0x2f0   :  { %2071 = vmatpush1.bf16.msra.mxu0 %v5680_v22  ;;  %v5748_v22 = vld [vmem:[#allocation5 + $0x188] ss:$16 sps:$4 sm:$0xff]  }
 0x2f1   :  { %2072 = vmatprep.subr.bf16.mxu0 %v5686_v23  ;;  %v6761_v23 = vld [vmem:[#allocation7 + $0xa0] ss:$16 sps:$4 sm:$0xff]  }
 0x2f4   :  { %2073 = vmatpush1.bf16.msra.mxu0 %v5684_v24  ;;  %v5753_v24 = vld [vmem:[#allocation5 + $0x1ac] ss:$16 sps:$4 sm:$0xff]  }
 0x2f5   :  { %2074 = vmatprep.subr.bf16.mxu0 %v5690_v25  ;;  %v6765_v25 = vld [vmem:[#allocation7 + $0xc4] ss:$16 sps:$4 sm:$0xff]  }
 0x2f8   :  { %2075 = vmatpush1.bf16.msra.mxu0 %v5688_v26  ;;  %v5751_v26 = vld [vmem:[#allocation5 + $0x1a8] ss:$16 sps:$4 sm:$0xff]  }
 0x2f9   :  { %2076 = vmatprep.subr.bf16.mxu0 %v5694_v27  ;;  %v6767_v27 = vld [vmem:[#allocation7 + $0xc0] ss:$16 sps:$4 sm:$0xff]  }
 0x2fc   :  { %2077 = vmatpush1.bf16.msra.mxu0 %v5692_v28  ;;  %v5756_v28 = vld [vmem:[#allocation5 + $0x1cc] ss:$16 sps:$4 sm:$0xff]  }
 0x2fd   :  { %2078 = vmatprep.subr.bf16.mxu0 %v5698_v31  ;;  %v6771_v31 = vld [vmem:[#allocation7 + $0xe4] ss:$16 sps:$4 sm:$0xff]  }
 0x300   :  { %2079 = vmatpush1.bf16.msra.mxu0 %v5696_v32  ;;  %v5754_v32 = vld [vmem:[#allocation5 + $0x1c8] ss:$16 sps:$4 sm:$0xff]  }
 0x301   :  { %2080 = vmatprep.subr.bf16.mxu0 %v5702_v34  ;;  %v6773_v34 = vld [vmem:[#allocation7 + $0xe0] ss:$16 sps:$4 sm:$0xff]  }
 0x304   :  { %2081 = vmatpush1.bf16.msra.mxu0 %v5700_v35  ;;  %v5759_v35 = vld [vmem:[#allocation5 + $0x1ec] ss:$16 sps:$4 sm:$0xff]  }
 0x305   :  { %2082 = vmatprep.subr.bf16.mxu0 %v5706_v36  ;;  %v6777_v36 = vld [vmem:[#allocation7 + $0x104] ss:$16 sps:$4 sm:$0xff]  }
 0x308   :  { %2083 = vmatpush1.bf16.msra.mxu0 %v5704_v37  ;;  %v5757_v37 = vld [vmem:[#allocation5 + $0x1e8] ss:$16 sps:$4 sm:$0xff]  }
 0x309   :  { %2996 = vmatprep.subr.bf16.mxu0 %v6729_v61 }
 0x30b   :  { %2085 = vmatmul.mubr.bf16.vlgmr.msra.gmra.mrb[8].mxu0 %v6716_v41 }
 0x30c   :  { %2997 = vmatpush1.bf16.msra.mxu0 %v6731_v63 }
 0x30d   :  { %2998 = vmatprep.subr.bf16.mxu0 %v6735_v3 }
 0x310   :  { %2999 = vmatpush1.bf16.msra.mxu0 %v6737_v5 }
 0x311   :  { %3000 = vmatprep.subr.bf16.mxu0 %v6741_v19 }
 0x314   :  { %3001 = vmatpush1.bf16.msra.mxu0 %v6743_v9 }
 0x315   :  { %3002 = vmatprep.subr.bf16.mxu0 %v6747_v11 }
 0x318   :  { %3003 = vmatpush1.bf16.msra.mxu0 %v6749_v14 }
 0x319   :  { %3004 = vmatprep.subr.bf16.mxu0 %v6753_v16 }
 0x31c   :  { %3005 = vmatpush1.bf16.msra.mxu0 %v6755_v18 }
 0x31d   :  { %3006 = vmatprep.subr.bf16.mxu0 %v6759_v21 }
 0x31e   :  { %v514_v39 = vpop.f32.mrb[4].mxu0 }
 0x31f   :  { %v515_v40 = vadd.f32 %v4814_v38, %v514_v39  ;;  %v5429_v42 = vpop.f32.mrb[5].mxu0  ;;  %v5762_v39 = vld [vmem:[#allocation5 + $0x20c] ss:$16 sps:$4 sm:$0xff]  }
 0x320   :  { %v517_v43 = vpop.f32.mrb[6].mxu0  ;;  %3007 = vmatpush1.bf16.msra.mxu0 %v6761_v23  ;;  %v5760_v42 = vld [vmem:[#allocation5 + $0x208] ss:$16 sps:$4 sm:$0xff]  }
 0x321   :  { %v518_v44 = vadd.f32 %v4814_v38, %v517_v43  ;;  %v5430_v45 = vpop.f32.mrb[7].mxu0  ;;  %v521_v0 = vmax.f32 %v515_v40, 0.0  ;;  %3008 = vmatprep.subr.bf16.mxu0 %v6765_v25  ;;  %v6779_v38 = vld [vmem:[#allocation7 + $0x100] ss:$16 sps:$4 sm:$0xff]   ;;  %v6783_v40 = vld [vmem:[#allocation7 + $0x124] ss:$16 sps:$4 sm:$0xff]  }
 0x322   :  { %v6785_v43 = vld [vmem:[#allocation7 + $0x120] ss:$16 sps:$4 sm:$0xff]   ;;  %v6790_v45 = vld [vmem:[#allocation7 + $0x144] ss:$16 sps:$4 sm:$0xff]  }
 0x323   :  { %v522_v46 = vmax.f32 %v518_v44, 0.0  ;;  %v5765_v44 = vld [vmem:[#allocation5 + $0x22c] ss:$16 sps:$4 sm:$0xff]  }
 0x324   :  { %3009 = vmatpush1.bf16.msra.mxu0 %v6767_v27 }
 0x325   :  { %v523_v48 = vpack.c.bf16 %v522_v46, %v521_v0  ;;  %3010 = vmatprep.subr.bf16.mxu0 %v6771_v31  ;;  %v5763_v0 = vld [vmem:[#allocation5 + $0x228] ss:$16 sps:$4 sm:$0xff]   ;;  %v6793_v46 = vld [vmem:[#allocation7 + $0x140] ss:$16 sps:$4 sm:$0xff]  }
 0x327   :  { %5448 = vmatmul.mubr.bf16.vlgmr.msra.gmra.mrb[4].mxu1 %v523_v48  ;;  %v6797_v48 = vld [vmem:[#allocation7 + $0x164] ss:$16 sps:$4 sm:$0xff]  }
 0x328   :  { %2096 = vmatpush1.bf16.msra.mxu1 %v5712_v47  ;;  %2127 = vmatprep.mubr.bf16.mxu1 %v6694_v29  ;;  %v5730_v29 = vld [vmem:[#allocation5 + $0xc8] ss:$16 sps:$4 sm:$0xff]   ;;  %v5768_v47 = vld [vmem:[#allocation5 + $0x24c] ss:$16 sps:$4 sm:$0xff]  }
 0x329   :  { %2097 = vmatprep.subr.bf16.mxu1 %v5717_v49  ;;  %3011 = vmatpush1.bf16.msra.mxu0 %v6773_v34  ;;  %v5766_v49 = vld [vmem:[#allocation5 + $0x248] ss:$16 sps:$4 sm:$0xff]  }
 0x32a   :  { %3012 = vmatprep.subr.bf16.mxu0 %v6777_v36 }
 0x32c   :  { %2098 = vmatpush1.bf16.msra.mxu1 %v5715_v50  ;;  %v6799_v50 = vld [vmem:[#allocation7 + $0x160] ss:$16 sps:$4 sm:$0xff]  }
 0x32d   :  { %2099 = vmatprep.subr.bf16.mxu1 %v5720_v51  ;;  %3013 = vmatpush1.bf16.msra.mxu0 %v6779_v38  ;;  %v5769_v51 = vld [vmem:[#allocation5 + $0x268] ss:$16 sps:$4 sm:$0xff]  }
 0x32e   :  { %3014 = vmatprep.subr.bf16.mxu0 %v6783_v40 }
 0x330   :  { %2100 = vmatpush1.bf16.msra.mxu1 %v5718_v52  ;;  %v6805_v52 = vld [vmem:[#allocation7 + $0x180] ss:$16 sps:$4 sm:$0xff]  }
 0x331   :  { %2101 = vmatprep.subr.bf16.mxu1 %v5723_v53  ;;  %3015 = vmatpush1.bf16.msra.mxu0 %v6785_v43  ;;  %v5774_v53 = vld [vmem:[#allocation5 + $0x28c] ss:$16 sps:$4 sm:$0xff]  }
 0x332   :  { %3016 = vmatprep.subr.bf16.mxu0 %v6790_v45 }
 0x334   :  { %2102 = vmatpush1.bf16.msra.mxu1 %v5721_v54  ;;  %v6809_v54 = vld [vmem:[#allocation7 + $0x1a4] ss:$16 sps:$4 sm:$0xff]  }
 0x335   :  { %2103 = vmatprep.subr.bf16.mxu1 %v5726_v55  ;;  %3017 = vmatpush1.bf16.msra.mxu0 %v6793_v46  ;;  %7509 = vst [vmem:[#allocation19_spill] sm:$0xff] %v6809_v54  ;;  %v5772_v55 = vld [vmem:[#allocation5 + $0x288] ss:$16 sps:$4 sm:$0xff]  }
 0x336   :  { %3018 = vmatprep.subr.bf16.mxu0 %v6797_v48 }
 0x338   :  { %2104 = vmatpush1.bf16.msra.mxu1 %v5724_v56  ;;  %v6811_v56 = vld [vmem:[#allocation7 + $0x1a0] ss:$16 sps:$4 sm:$0xff]  }
 0x339   :  { %2105 = vmatprep.subr.bf16.mxu1 %v5729_v57  ;;  %3019 = vmatpush1.bf16.msra.mxu0 %v6799_v50  ;;  %7510 = vst [vmem:[#allocation20_spill] sm:$0xff] %v6811_v56  ;;  %v5777_v57 = vld [vmem:[#allocation5 + $0x2ac] ss:$16 sps:$4 sm:$0xff]  }
 0x33c   :  { %2106 = vmatpush1.bf16.msra.mxu1 %v5727_v58  ;;  %v6815_v58 = vld [vmem:[#allocation7 + $0x1c4] ss:$16 sps:$4 sm:$0xff]  }
 0x33d   :  { %2107 = vmatprep.subr.bf16.mxu1 %v5732_v59  ;;  %7511 = vst [vmem:[#allocation21_spill] sm:$0xff] %v6815_v58  ;;  %v5775_v59 = vld [vmem:[#allocation5 + $0x2a8] ss:$16 sps:$4 sm:$0xff]  }
 0x340   :  { %2108 = vmatpush1.bf16.msra.mxu1 %v5730_v29  ;;  %v6817_v29 = vld [vmem:[#allocation7 + $0x1c0] ss:$16 sps:$4 sm:$0xff]  }
 0x341   :  { %2109 = vmatprep.subr.bf16.mxu1 %v5735_v60  ;;  %7512 = vst [vmem:[#allocation22_spill] sm:$0xff] %v6817_v29  ;;  %v5780_v60 = vld [vmem:[#allocation5 + $0x2cc] ss:$16 sps:$4 sm:$0xff]  }
 0x344   :  { %2110 = vmatpush1.bf16.msra.mxu1 %v5733_v62  ;;  %v6821_v62 = vld [vmem:[#allocation7 + $0x1e4] ss:$16 sps:$4 sm:$0xff]  }
 0x345   :  { %2111 = vmatprep.subr.bf16.mxu1 %v5738_v1  ;;  %7513 = vst [vmem:[#allocation23_spill] sm:$0xff] %v6821_v62  ;;  %v5778_v1 = vld [vmem:[#allocation5 + $0x2c8] ss:$16 sps:$4 sm:$0xff]  }
 0x348   :  { %2112 = vmatpush1.bf16.msra.mxu1 %v5736_v4  ;;  %v6823_v4 = vld [vmem:[#allocation7 + $0x1e0] ss:$16 sps:$4 sm:$0xff]  }
 0x349   :  { %2113 = vmatprep.subr.bf16.mxu1 %v5741_v6  ;;  %7514 = vst [vmem:[#allocation24_spill] sm:$0xff] %v6823_v4  ;;  %v5783_v6 = vld [vmem:[#allocation5 + $0x2ec] ss:$16 sps:$4 sm:$0xff]  }
 0x34c   :  { %2114 = vmatpush1.bf16.msra.mxu1 %v5739_v8  ;;  %v5781_v8 = vld [vmem:[#allocation5 + $0x2e8] ss:$16 sps:$4 sm:$0xff]  }
 0x34d   :  { %2115 = vmatprep.subr.bf16.mxu1 %v5744_v10  ;;  %v5786_v10 = vld [vmem:[#allocation5 + $0x30c] ss:$16 sps:$4 sm:$0xff]  }
 0x350   :  { %2116 = vmatpush1.bf16.msra.mxu1 %v5742_v12  ;;  %v5784_v12 = vld [vmem:[#allocation5 + $0x308] ss:$16 sps:$4 sm:$0xff]  }
 0x351   :  { %2117 = vmatprep.subr.bf16.mxu1 %v5747_v15  ;;  %v5789_v15 = vld [vmem:[#allocation5 + $0x32c] ss:$16 sps:$4 sm:$0xff]  }
 0x354   :  { %2118 = vmatpush1.bf16.msra.mxu1 %v5745_v17  ;;  %v5787_v17 = vld [vmem:[#allocation5 + $0x328] ss:$16 sps:$4 sm:$0xff]  }
 0x355   :  { %2119 = vmatprep.subr.bf16.mxu1 %v5750_v20  ;;  %v5792_v20 = vld [vmem:[#allocation5 + $0x34c] ss:$16 sps:$4 sm:$0xff]  }
 0x358   :  { %2120 = vmatpush1.bf16.msra.mxu1 %v5748_v22  ;;  %v5790_v22 = vld [vmem:[#allocation5 + $0x348] ss:$16 sps:$4 sm:$0xff]  }
 0x359   :  { %2121 = vmatprep.subr.bf16.mxu1 %v5753_v24  ;;  %v5795_v24 = vld [vmem:[#allocation5 + $0x36c] ss:$16 sps:$4 sm:$0xff]  }
 0x35c   :  { %2122 = vmatpush1.bf16.msra.mxu1 %v5751_v26  ;;  %v5793_v26 = vld [vmem:[#allocation5 + $0x368] ss:$16 sps:$4 sm:$0xff]  }
 0x35d   :  { %2123 = vmatprep.subr.bf16.mxu1 %v5756_v28  ;;  %v5798_v28 = vld [vmem:[#allocation5 + $0x38c] ss:$16 sps:$4 sm:$0xff]  }
 0x360   :  { %2124 = vmatpush1.bf16.msra.mxu1 %v5754_v32  ;;  %v5796_v32 = vld [vmem:[#allocation5 + $0x388] ss:$16 sps:$4 sm:$0xff]  }
 0x361   :  { %2125 = vmatprep.subr.bf16.mxu1 %v5759_v35  ;;  %v5801_v35 = vld [vmem:[#allocation5 + $0x3ac] ss:$16 sps:$4 sm:$0xff]  }
 0x364   :  { %2126 = vmatpush1.bf16.msra.mxu1 %v5757_v37  ;;  %v5799_v37 = vld [vmem:[#allocation5 + $0x3a8] ss:$16 sps:$4 sm:$0xff]  }
 0x365   :  { %2138 = vmatprep.subr.bf16.mxu1 %v5762_v39  ;;  %v5804_v39 = vld [vmem:[#allocation5 + $0x3cc] ss:$16 sps:$4 sm:$0xff]  }
 0x367   :  { %2128 = vmatmul.mubr.bf16.vlgmr.msra.gmra.mrb[8].mxu1 %v6687_v13  ;;  %v5771_v13 = vld [vmem:[#allocation5 + $0x26c] ss:$16 sps:$4 sm:$0xff]  }
 0x368   :  { %2139 = vmatpush1.bf16.msra.mxu1 %v5760_v42  ;;  %2170 = vmatprep.mubr.bf16.mxu1 %v6696_v30  ;;  %v6803_v30 = vld [vmem:[#allocation7 + $0x184] ss:$16 sps:$4 sm:$0xff]   ;;  %v5802_v42 = vld [vmem:[#allocation5 + $0x3c8] ss:$16 sps:$4 sm:$0xff]  }
 0x369   :  { %2140 = vmatprep.subr.bf16.mxu1 %v5765_v44  ;;  %3020 = vmatprep.subr.bf16.mxu0 %v6803_v30  ;;  %v5807_v44 = vld [vmem:[#allocation5 + $0x3ec] ss:$16 sps:$4 sm:$0xff]  }
 0x36a   :  { %3021 = vmatpush1.bf16.msra.mxu0 %v6805_v52 }
 0x36b   :  { %3022 = vmatprep.subr.bf16.mxu0 %v6809_v54 }
 0x36c   :  { %2141 = vmatpush1.bf16.msra.mxu1 %v5763_v0  ;;  %v5805_v0 = vld [vmem:[#allocation5 + $0x3e8] ss:$16 sps:$4 sm:$0xff]  }
 0x36d   :  { %2142 = vmatprep.subr.bf16.mxu1 %v5768_v47  ;;  %v5810_v47 = vld [vmem:[#allocation5 + $0x40c] ss:$16 sps:$4 sm:$0xff]  }
 0x36e   :  { %3023 = vmatpush1.bf16.msra.mxu0 %v6811_v56  ;;  %v7034_v56 = vld [vmem:[#allocation7 + $0x3a0] ss:$16 sps:$4 sm:$0xff]  }
 0x36f   :  { %3024 = vmatprep.subr.bf16.mxu0 %v6815_v58  ;;  %v7031_v58 = vld [vmem:[#allocation7 + $0x1cc] ss:$16 sps:$4 sm:$0xff]   ;;  %7553 = vst [vmem:[#allocation63_spill] sm:$0xff] %v7034_v56 }
 0x370   :  { %2143 = vmatpush1.bf16.msra.mxu1 %v5766_v49  ;;  %v5808_v49 = vld [vmem:[#allocation5 + $0x408] ss:$16 sps:$4 sm:$0xff]   ;;  %7552 = vst [vmem:[#allocation62_spill] sm:$0xff] %v7031_v58 }
 0x371   :  { %2144 = vmatprep.subr.bf16.mxu1 %v5771_v13  ;;  %v5813_v13 = vld [vmem:[#allocation5 + $0x42c] ss:$16 sps:$4 sm:$0xff]  }
 0x372   :  { %3025 = vmatpush1.bf16.msra.mxu0 %v6817_v29  ;;  %v7022_v29 = vld [vmem:[#allocation7 + $0x380] ss:$16 sps:$4 sm:$0xff]  }
 0x373   :  { %3026 = vmatprep.subr.bf16.mxu0 %v6821_v62  ;;  %v7019_v62 = vld [vmem:[#allocation7 + $0x1ac] ss:$16 sps:$4 sm:$0xff]   ;;  %7549 = vst [vmem:[#allocation59_spill] sm:$0xff] %v7022_v29 }
 0x374   :  { %2145 = vmatpush1.bf16.msra.mxu1 %v5769_v51  ;;  %v6828_v51 = vld [vmem:[#allocation7 + $0x204] ss:$16 sps:$4 sm:$0xff]   ;;  %7548 = vst [vmem:[#allocation58_spill] sm:$0xff] %v7019_v62 }
 0x375   :  { %2146 = vmatprep.subr.bf16.mxu1 %v5774_v53  ;;  %7515 = vst [vmem:[#allocation25_spill] sm:$0xff] %v6828_v51  ;;  %v5811_v53 = vld [vmem:[#allocation5 + $0x428] ss:$16 sps:$4 sm:$0xff]  }
 0x376   :  { %3027 = vmatpush1.bf16.msra.mxu0 %v6823_v4  ;;  %v7010_v4 = vld [vmem:[#allocation7 + $0x360] ss:$16 sps:$4 sm:$0xff]  }
 0x377   :  { %3039 = vmatprep.subr.bf16.mxu0 %v6828_v51  ;;  %v7007_v51 = vld [vmem:[#allocation7 + $0x18c] ss:$16 sps:$4 sm:$0xff]   ;;  %7546 = vst [vmem:[#allocation56_spill] sm:$0xff] %v7010_v4 }
 0x378   :  { %2147 = vmatpush1.bf16.msra.mxu1 %v5772_v55  ;;  %v5816_v55 = vld [vmem:[#allocation5 + $0x44c] ss:$16 sps:$4 sm:$0xff]  }
 0x379   :  { %2148 = vmatprep.subr.bf16.mxu1 %v5777_v57  ;;  %v5814_v57 = vld [vmem:[#allocation5 + $0x448] ss:$16 sps:$4 sm:$0xff]  }
 0x37c   :  { %2149 = vmatpush1.bf16.msra.mxu1 %v5775_v59  ;;  %v5819_v59 = vld [vmem:[#allocation5 + $0x46c] ss:$16 sps:$4 sm:$0xff]  }
 0x37d   :  { %2150 = vmatprep.subr.bf16.mxu1 %v5780_v60  ;;  %v5817_v60 = vld [vmem:[#allocation5 + $0x468] ss:$16 sps:$4 sm:$0xff]  }
 0x380   :  { %2151 = vmatpush1.bf16.msra.mxu1 %v5778_v1  ;;  %v5822_v1 = vld [vmem:[#allocation5 + $0x48c] ss:$16 sps:$4 sm:$0xff]  }
 0x381   :  { %2152 = vmatprep.subr.bf16.mxu1 %v5783_v6  ;;  %v5825_v6 = vld [vmem:[#allocation5 + $0x4ac] ss:$16 sps:$4 sm:$0xff]  }
 0x384   :  { %2153 = vmatpush1.bf16.msra.mxu1 %v5781_v8  ;;  %v5823_v8 = vld [vmem:[#allocation5 + $0x4a8] ss:$16 sps:$4 sm:$0xff]  }
 0x385   :  { %2154 = vmatprep.subr.bf16.mxu1 %v5786_v10  ;;  %v5826_v10 = vld [vmem:[#allocation5 + $0x4c8] ss:$16 sps:$4 sm:$0xff]  }
 0x388   :  { %2155 = vmatpush1.bf16.msra.mxu1 %v5784_v12  ;;  %v5834_v12 = vld [vmem:[#allocation5 + $0x4ec] ss:$16 sps:$4 sm:$0xff]  }
 0x389   :  { %2156 = vmatprep.subr.bf16.mxu1 %v5789_v15  ;;  %v5832_v15 = vld [vmem:[#allocation5 + $0x4e8] ss:$16 sps:$4 sm:$0xff]  }
 0x38c   :  { %2157 = vmatpush1.bf16.msra.mxu1 %v5787_v17  ;;  %v5840_v17 = vld [vmem:[#allocation5 + $0x50c] ss:$16 sps:$4 sm:$0xff]  }
 0x38d   :  { %2158 = vmatprep.subr.bf16.mxu1 %v5792_v20  ;;  %v5838_v20 = vld [vmem:[#allocation5 + $0x508] ss:$16 sps:$4 sm:$0xff]  }
 0x390   :  { %2159 = vmatpush1.bf16.msra.mxu1 %v5790_v22  ;;  %v5846_v22 = vld [vmem:[#allocation5 + $0x52c] ss:$16 sps:$4 sm:$0xff]  }
 0x391   :  { %2160 = vmatprep.subr.bf16.mxu1 %v5795_v24  ;;  %v5844_v24 = vld [vmem:[#allocation5 + $0x528] ss:$16 sps:$4 sm:$0xff]  }
 0x394   :  { %2161 = vmatpush1.bf16.msra.mxu1 %v5793_v26  ;;  %v5852_v26 = vld [vmem:[#allocation5 + $0x54c] ss:$16 sps:$4 sm:$0xff]  }
 0x395   :  { %2162 = vmatprep.subr.bf16.mxu1 %v5798_v28  ;;  %v5850_v28 = vld [vmem:[#allocation5 + $0x548] ss:$16 sps:$4 sm:$0xff]  }
 0x398   :  { %2163 = vmatpush1.bf16.msra.mxu1 %v5796_v32  ;;  %v5858_v32 = vld [vmem:[#allocation5 + $0x56c] ss:$16 sps:$4 sm:$0xff]  }
 0x399   :  { %2164 = vmatprep.subr.bf16.mxu1 %v5801_v35  ;;  %v5856_v35 = vld [vmem:[#allocation5 + $0x568] ss:$16 sps:$4 sm:$0xff]  }
 0x39c   :  { %2165 = vmatpush1.bf16.msra.mxu1 %v5799_v37  ;;  %v5864_v37 = vld [vmem:[#allocation5 + $0x58c] ss:$16 sps:$4 sm:$0xff]  }
 0x39d   :  { %2166 = vmatprep.subr.bf16.mxu1 %v5804_v39  ;;  %v5862_v39 = vld [vmem:[#allocation5 + $0x588] ss:$16 sps:$4 sm:$0xff]  }
 0x3a0   :  { %2167 = vmatpush1.bf16.msra.mxu1 %v5802_v42  ;;  %v5870_v42 = vld [vmem:[#allocation5 + $0x5ac] ss:$16 sps:$4 sm:$0xff]  }
 0x3a1   :  { %2168 = vmatprep.subr.bf16.mxu1 %v5807_v44  ;;  %v6833_v44 = vsub.s32 0, %v6618_v7 }
 0x3a3   :  { %7516 = vst [vmem:[#allocation26_spill] sm:$0xff] %v6833_v44 }
 0x3a4   :  { %2169 = vmatpush1.bf16.msra.mxu1 %v5805_v0  ;;  %v5868_v0 = vld [vmem:[#allocation5 + $0x5a8] ss:$16 sps:$4 sm:$0xff]  }
 0x3a5   :  { %2181 = vmatprep.subr.bf16.mxu1 %v5810_v47  ;;  %v6838_v47 = vld [vmem:[%s7419_s7] sm:$0xf] }
 0x3a7   :  { %2171 = vmatmul.mubr.bf16.vlgmr.msra.gmra.mrb[8].mxu1 %v6698_v33  ;;  %v5820_v33 = vld [vmem:[#allocation5 + $0x488] ss:$16 sps:$4 sm:$0xff]  }
 0x3a8   :  { %2182 = vmatpush1.bf16.msra.mxu1 %v5808_v49  ;;  %2213 = vmatprep.mubr.bf16.mxu1 %v6720_v2  ;;  %v5828_v2 = vld [vmem:[#allocation5 + $0x4cc] ss:$16 sps:$4 sm:$0xff]   ;;  %v6841_v49 = vsub.s32 1, %v6618_v7 }
 0x3a9   :  { %2183 = vmatprep.subr.bf16.mxu1 %v5813_v13  ;;  %v5876_v13 = vld [vmem:[#allocation5 + $0x5cc] ss:$16 sps:$4 sm:$0xff]  }
 0x3aa   :  { %7517 = vst [vmem:[#allocation27_spill] sm:$0xff] %v6841_v49 }
 0x3ac   :  { %2184 = vmatpush1.bf16.msra.mxu1 %v5811_v53  ;;  %v841_v53 = vrot.slane %v6838_v47, %v6833_v44  ;;  %v6929_v44 = vld [vmem:[#allocation7 + $0x2a0] ss:$16 sps:$4 sm:$0xff]  }
 0x3ad   :  { %2185 = vmatprep.subr.bf16.mxu1 %v5816_v55  ;;  %v5874_v55 = vld [vmem:[#allocation5 + $0x5c8] ss:$16 sps:$4 sm:$0xff]   ;;  %7532 = vst [vmem:[#allocation42_spill] sm:$0xff] %v6929_v44 }
 0x3b0   :  { %2186 = vmatpush1.bf16.msra.mxu1 %v5814_v57  ;;  %v845_v57 = vrot.slane %v6838_v47, %v6841_v49  ;;  %v6926_v49 = vld [vmem:[#allocation7 + $0xcc] ss:$16 sps:$4 sm:$0xff]  }
 0x3b1   :  { %2187 = vmatprep.subr.bf16.mxu1 %v5819_v59  ;;  %v5882_v59 = vld [vmem:[#allocation5 + $0x5ec] ss:$16 sps:$4 sm:$0xff]  }
 0x3b4   :  { %2188 = vmatpush1.bf16.msra.mxu1 %v5817_v60 }
 0x3b5   :  { %2189 = vmatprep.subr.bf16.mxu1 %v5822_v1 }
 0x3b8   :  { %2190 = vmatpush1.bf16.msra.mxu1 %v5820_v33 }
 0x3b9   :  { %2191 = vmatprep.subr.bf16.mxu1 %v5825_v6  ;;  %v5880_v6 = vld [vmem:[#allocation5 + $0x5e8] ss:$16 sps:$4 sm:$0xff]  }
 0x3bc   :  { %2192 = vmatpush1.bf16.msra.mxu1 %v5823_v8 }
 0x3bd   :  { %2193 = vmatprep.subr.bf16.mxu1 %v5828_v2 }
 0x3c0   :  { %2194 = vmatpush1.bf16.msra.mxu1 %v5826_v10  ;;  %v6851_v10 = vld [vmem:[#allocation7 + $0xc] ss:$16 sps:$4 sm:$0xff]  }
 0x3c1   :  { %2195 = vmatprep.subr.bf16.mxu1 %v5834_v12 }
 0x3c4   :  { %2196 = vmatpush1.bf16.msra.mxu1 %v5832_v15 }
 0x3c5   :  { %2197 = vmatprep.subr.bf16.mxu1 %v5840_v17 }
 0x3c8   :  { %2198 = vmatpush1.bf16.msra.mxu1 %v5838_v20 }
 0x3c9   :  { %2199 = vmatprep.subr.bf16.mxu1 %v5846_v22  ;;  %v6861_v22 = vld [vmem:[#allocation7 + $0x8] ss:$16 sps:$4 sm:$0xff]  }
 0x3cc   :  { %2200 = vmatpush1.bf16.msra.mxu1 %v5844_v24 }
 0x3cd   :  { %2201 = vmatprep.subr.bf16.mxu1 %v5852_v26  ;;  %v6866_v26 = vld [vmem:[#allocation7 + $0x2c] ss:$16 sps:$4 sm:$0xff]  }
 0x3d0   :  { %2202 = vmatpush1.bf16.msra.mxu1 %v5850_v28  ;;  %v6868_v28 = vld [vmem:[#allocation7 + $0x200] ss:$16 sps:$4 sm:$0xff]  }
 0x3d1   :  { %2203 = vmatprep.subr.bf16.mxu1 %v5858_v32  ;;  %7522 = vst [vmem:[#allocation32_spill] sm:$0xff] %v6868_v28  ;;  %v6870_v32 = vld [vmem:[#allocation7 + $0x224] ss:$16 sps:$4 sm:$0xff]  }
 0x3d2   :  { %7523 = vst [vmem:[#allocation33_spill] sm:$0xff] %v6870_v32 }
 0x3d4   :  { %2204 = vmatpush1.bf16.msra.mxu1 %v5856_v35  ;;  %v6875_v35 = vld [vmem:[#allocation7 + $0x28] ss:$16 sps:$4 sm:$0xff]  }
 0x3d5   :  { %2205 = vmatprep.subr.bf16.mxu1 %v5864_v37  ;;  %v6878_v37 = vld [vmem:[#allocation7 + $0x4c] ss:$16 sps:$4 sm:$0xff]  }
 0x3d8   :  { %2206 = vmatpush1.bf16.msra.mxu1 %v5862_v39  ;;  %v6881_v39 = vld [vmem:[#allocation7 + $0x220] ss:$16 sps:$4 sm:$0xff]  }
 0x3d9   :  { %2207 = vmatprep.subr.bf16.mxu1 %v5870_v42  ;;  %7524 = vst [vmem:[#allocation34_spill] sm:$0xff] %v6881_v39  ;;  %v6884_v42 = vld [vmem:[#allocation7 + $0x244] ss:$16 sps:$4 sm:$0xff]  }
 0x3da   :  { %7525 = vst [vmem:[#allocation35_spill] sm:$0xff] %v6884_v42 }
 0x3dc   :  { %2208 = vmatpush1.bf16.msra.mxu1 %v5868_v0  ;;  %v6890_v0 = vld [vmem:[#allocation7 + $0x6c] ss:$16 sps:$4 sm:$0xff]  }
 0x3dd   :  { %2209 = vmatprep.subr.bf16.mxu1 %v5876_v13  ;;  %v6893_v13 = vld [vmem:[#allocation7 + $0x240] ss:$16 sps:$4 sm:$0xff]  }
 0x3de   :  { %v2086_v60 = vpop.f32.mrb[8].mxu0  ;;  %7526 = vst [vmem:[#allocation36_spill] sm:$0xff] %v6893_v13 }
 0x3df   :  { %v6847_v1 = vadd.f32 %v2086_v60, %v841_v53  ;;  %v2088_v33 = vpop.f32.mrb[9].mxu0  ;;  %v6908_v60 = vld [vmem:[#allocation7 + $0x284] ss:$16 sps:$4 sm:$0xff]  }
 0x3e0   :  { %2210 = vmatpush1.bf16.msra.mxu1 %v5874_v55  ;;  %v6849_v8 = vadd.f32 %v2088_v33, %v845_v57  ;;  %v2090_v2 = vpop.f32.mrb[10].mxu0  ;;  %v6899_v55 = vld [vmem:[#allocation7 + $0x68] ss:$16 sps:$4 sm:$0xff]   ;;  %7529 = vst [vmem:[#allocation39_spill] sm:$0xff] %v6908_v60 }
 0x3e1   :  { %7518 = vst [vmem:[#allocation28_spill] sm:$0xff] %v6847_v1  ;;  %2211 = vmatprep.subr.bf16.mxu1 %v5882_v59  ;;  %v6853_v12 = vadd.f32 %v2090_v2, %v841_v53  ;;  %v2092_v15 = vpop.f32.mrb[11].mxu0  ;;  %v6896_v53 = vld [vmem:[#allocation7 + $0x264] ss:$16 sps:$4 sm:$0xff]   ;;  %v6905_v59 = vld [vmem:[#allocation7 + $0x260] ss:$16 sps:$4 sm:$0xff]  }
 0x3e2   :  { %7519 = vst [vmem:[#allocation29_spill] sm:$0xff] %v6849_v8  ;;  %v6855_v17 = vadd.f32 %v2092_v15, %v845_v57  ;;  %7527 = vst [vmem:[#allocation37_spill] sm:$0xff] %v6896_v53  ;;  %v6902_v57 = vld [vmem:[#allocation7 + $0x8c] ss:$16 sps:$4 sm:$0xff]   ;;  %v6911_v33 = vld [vmem:[#allocation7 + $0x88] ss:$16 sps:$4 sm:$0xff]  }
 0x3e3   :  { %7520 = vst [vmem:[#allocation30_spill] sm:$0xff] %v6853_v12  ;;  %v6859_v20 = vpack.c.bf16 %v6853_v12, %v6847_v1  ;;  %7528 = vst [vmem:[#allocation38_spill] sm:$0xff] %v6905_v59  ;;  %v6917_v2 = vld [vmem:[#allocation7 + $0x280] ss:$16 sps:$4 sm:$0xff]   ;;  %v6920_v15 = vld [vmem:[#allocation7 + $0x2a4] ss:$16 sps:$4 sm:$0xff]  }
 0x3e4   :  { %7521 = vst [vmem:[#allocation31_spill] sm:$0xff] %v6855_v17  ;;  %2212 = vmatpush1.bf16.msra.mxu1 %v5880_v6  ;;  %v2225_v24 = vpack.c.bf16 %v6855_v17, %v6849_v8  ;;  %v6914_v6 = vld [vmem:[#allocation7 + $0xac] ss:$16 sps:$4 sm:$0xff]   ;;  %7530 = vst [vmem:[#allocation40_spill] sm:$0xff] %v6917_v2  ;;  %v6998_v8 = vld [vmem:[#allocation7 + $0x340] ss:$16 sps:$4 sm:$0xff]  }
 0x3e5   :  { %3082 = vmatprep.subr.bf16.mxu1 %v6851_v10  ;;  %7531 = vst [vmem:[#allocation41_spill] sm:$0xff] %v6920_v15  ;;  %v6945_v17 = vld [vmem:[#allocation7 + $0xec] ss:$16 sps:$4 sm:$0xff]   ;;  %7544 = vst [vmem:[#allocation54_spill] sm:$0xff] %v6998_v8 }
 0x3e6   :  { %3028 = vmatprep.mubr.bf16.mxu0 %v2225_v24  ;;  %v6971_v12 = vld [vmem:[#allocation7 + $0x12c] ss:$16 sps:$4 sm:$0xff]  }
 0x3e7   :  { %2214 = vmatmul.mubr.bf16.vlgmr.msra.gmra.mrb[8].mxu1 %v6716_v41  ;;  %3029 = vmatmul.mubr.bf16.vlgmr.msra.gmra.mrb[12].mxu0 %v6859_v20  ;;  %v6887_v41 = vld [vmem:[#allocation7 + $0x48] ss:$16 sps:$4 sm:$0xff]   ;;  %v6995_v1 = vld [vmem:[#allocation7 + $0x16c] ss:$16 sps:$4 sm:$0xff]  }
 0x3e8   :  { %3083 = vmatpush1.bf16.msra.mxu1 %v6861_v22  ;;  %3114 = vmatprep.mubr.bf16.mxu1 %v2225_v24  ;;  %v6923_v24 = vld [vmem:[#allocation7 + $0xa8] ss:$16 sps:$4 sm:$0xff]  }
 0x3e9   :  { %3084 = vmatprep.subr.bf16.mxu1 %v6866_v26  ;;  %3040 = vmatpush1.bf16.msra.mxu0 %v6868_v28 }
 0x3ea   :  { %3041 = vmatprep.subr.bf16.mxu0 %v6870_v32 }
 0x3ec   :  { %3085 = vmatpush1.bf16.msra.mxu1 %v6875_v35 }
 0x3ed   :  { %3086 = vmatprep.subr.bf16.mxu1 %v6878_v37  ;;  %3042 = vmatpush1.bf16.msra.mxu0 %v6881_v39  ;;  %v6938_v39 = vld [vmem:[#allocation7 + $0xc8] ss:$16 sps:$4 sm:$0xff]  }
 0x3ee   :  { %3043 = vmatprep.subr.bf16.mxu0 %v6884_v42 }
 0x3f0   :  { %3087 = vmatpush1.bf16.msra.mxu1 %v6887_v41 }
 0x3f1   :  { %3088 = vmatprep.subr.bf16.mxu1 %v6890_v0  ;;  %3044 = vmatpush1.bf16.msra.mxu0 %v6893_v13 }
 0x3f2   :  { %3045 = vmatprep.subr.bf16.mxu0 %v6896_v53 }
 0x3f4   :  { %3089 = vmatpush1.bf16.msra.mxu1 %v6899_v55 }
 0x3f5   :  { %3090 = vmatprep.subr.bf16.mxu1 %v6902_v57  ;;  %3046 = vmatpush1.bf16.msra.mxu0 %v6905_v59  ;;  %v4823_v59 = vld [vmem:[%s7419_s7 + $0x9] ss:$0 sm:$0xff] }
 0x3f6   :  { %3047 = vmatprep.subr.bf16.mxu0 %v6908_v60  ;;  %v6935_v60 = vld [vmem:[#allocation7 + $0x2c4] ss:$16 sps:$4 sm:$0xff]  }
 0x3f7   :  { %7533 = vst [vmem:[#allocation43_spill] sm:$0xff] %v6935_v60 }
 0x3f8   :  { %3091 = vmatpush1.bf16.msra.mxu1 %v6911_v33 }
 0x3f9   :  { %3092 = vmatprep.subr.bf16.mxu1 %v6914_v6  ;;  %3048 = vmatpush1.bf16.msra.mxu0 %v6917_v2 }
 0x3fa   :  { %v629_v53 = vpop.f32.mrb[4].mxu1  ;;  %3049 = vmatprep.subr.bf16.mxu0 %v6920_v15  ;;  %v6948_v15 = vld [vmem:[#allocation7 + $0x2c0] ss:$16 sps:$4 sm:$0xff]  }
 0x3fb   :  { %v5449_v13 = vpop.f32.mrb[5].mxu1  ;;  %v6940_v32 = vadd.f32 %v4823_v59, %v629_v53  ;;  %7536 = vst [vmem:[#allocation46_spill] sm:$0xff] %v6948_v15  ;;  %v6962_v53 = vld [vmem:[#allocation7 + $0x2e0] ss:$16 sps:$4 sm:$0xff]  }
 0x3fc   :  { %3093 = vmatpush1.bf16.msra.mxu1 %v6923_v24  ;;  %v632_v42 = vpop.f32.mrb[6].mxu1  ;;  %v6951_v13 = vld [vmem:[#allocation7 + $0x2e4] ss:$16 sps:$4 sm:$0xff]   ;;  %7538 = vst [vmem:[#allocation48_spill] sm:$0xff] %v6962_v53 }
 0x3fd   :  { %7534 = vst [vmem:[#allocation44_spill] sm:$0xff] %v6940_v32  ;;  %v6942_v2 = vadd.f32 %v4823_v59, %v632_v42  ;;  %v5450_v28 = vpop.f32.mrb[7].mxu1  ;;  %3094 = vmatprep.subr.bf16.mxu1 %v6926_v49  ;;  %3050 = vmatpush1.bf16.msra.mxu0 %v6929_v44  ;;  %7537 = vst [vmem:[#allocation47_spill] sm:$0xff] %v6951_v13  ;;  %v6956_v42 = vld [vmem:[#allocation7 + $0xe8] ss:$16 sps:$4 sm:$0xff]  }
 0x3fe   :  { %3051 = vmatprep.subr.bf16.mxu0 %v6935_v60  ;;  %v6959_v28 = vld [vmem:[#allocation7 + $0x10c] ss:$16 sps:$4 sm:$0xff]   ;;  %v6965_v59 = vld [vmem:[#allocation7 + $0x304] ss:$16 sps:$4 sm:$0xff]   ;;  %v6968_v60 = vld [vmem:[#allocation7 + $0x108] ss:$16 sps:$4 sm:$0xff]  }
 0x3ff   :  { %7535 = vst [vmem:[#allocation45_spill] sm:$0xff] %v6942_v2  ;;  %7539 = vst [vmem:[#allocation49_spill] sm:$0xff] %v6965_v59  ;;  %v6974_v32 = vld [vmem:[#allocation7 + $0x300] ss:$16 sps:$4 sm:$0xff]   ;;  %v6977_v2 = vld [vmem:[#allocation7 + $0x324] ss:$16 sps:$4 sm:$0xff]  }
 0x400   :  { %3095 = vmatpush1.bf16.msra.mxu1 %v6938_v39  ;;  %7540 = vst [vmem:[#allocation50_spill] sm:$0xff] %v6974_v32  ;;  %7541 = vst [vmem:[#allocation51_spill] sm:$0xff] %v6977_v2  ;;  %v6986_v44 = vld [vmem:[#allocation7 + $0x320] ss:$16 sps:$4 sm:$0xff]  }
 0x401   :  { %3096 = vmatprep.subr.bf16.mxu1 %v6945_v17  ;;  %3052 = vmatpush1.bf16.msra.mxu0 %v6948_v15  ;;  %v6983_v15 = vld [vmem:[#allocation7 + $0x14c] ss:$16 sps:$4 sm:$0xff]   ;;  %7542 = vst [vmem:[#allocation52_spill] sm:$0xff] %v6986_v44 }
 0x402   :  { %3053 = vmatprep.subr.bf16.mxu0 %v6951_v13  ;;  %v6980_v13 = vld [vmem:[#allocation7 + $0x128] ss:$16 sps:$4 sm:$0xff]  }
 0x404   :  { %3097 = vmatpush1.bf16.msra.mxu1 %v6956_v42 }
 0x405   :  { %3098 = vmatprep.subr.bf16.mxu1 %v6959_v28  ;;  %3054 = vmatpush1.bf16.msra.mxu0 %v6962_v53  ;;  %v6989_v53 = vld [vmem:[#allocation7 + $0x344] ss:$16 sps:$4 sm:$0xff]  }
 0x406   :  { %3055 = vmatprep.subr.bf16.mxu0 %v6965_v59  ;;  %7543 = vst [vmem:[#allocation53_spill] sm:$0xff] %v6989_v53  ;;  %v6992_v59 = vld [vmem:[#allocation7 + $0x148] ss:$16 sps:$4 sm:$0xff]  }
 0x408   :  { %3099 = vmatpush1.bf16.msra.mxu1 %v6968_v60 }
 0x409   :  { %3100 = vmatprep.subr.bf16.mxu1 %v6971_v12  ;;  %3056 = vmatpush1.bf16.msra.mxu0 %v6974_v32  ;;  %v7001_v32 = vld [vmem:[#allocation7 + $0x364] ss:$16 sps:$4 sm:$0xff]  }
 0x40a   :  { %3057 = vmatprep.subr.bf16.mxu0 %v6977_v2  ;;  %7545 = vst [vmem:[#allocation55_spill] sm:$0xff] %v7001_v32  ;;  %v7004_v2 = vld [vmem:[#allocation7 + $0x168] ss:$16 sps:$4 sm:$0xff]  }
 0x40c   :  { %3101 = vmatpush1.bf16.msra.mxu1 %v6980_v13 }
 0x40d   :  { %3102 = vmatprep.subr.bf16.mxu1 %v6983_v15  ;;  %3058 = vmatpush1.bf16.msra.mxu0 %v6986_v44  ;;  %v7013_v44 = vld [vmem:[#allocation7 + $0x384] ss:$16 sps:$4 sm:$0xff]  }
 0x40e   :  { %3059 = vmatprep.subr.bf16.mxu0 %v6989_v53  ;;  %7547 = vst [vmem:[#allocation57_spill] sm:$0xff] %v7013_v44  ;;  %v7016_v53 = vld [vmem:[#allocation7 + $0x188] ss:$16 sps:$4 sm:$0xff]  }
 0x410   :  { %3103 = vmatpush1.bf16.msra.mxu1 %v6992_v59 }
 0x411   :  { %3104 = vmatprep.subr.bf16.mxu1 %v6995_v1  ;;  %3060 = vmatpush1.bf16.msra.mxu0 %v6998_v8  ;;  %v7025_v8 = vld [vmem:[#allocation7 + $0x3a4] ss:$16 sps:$4 sm:$0xff]  }
 0x412   :  { %3061 = vmatprep.subr.bf16.mxu0 %v7001_v32  ;;  %7550 = vst [vmem:[#allocation60_spill] sm:$0xff] %v7025_v8  ;;  %v7028_v32 = vld [vmem:[#allocation7 + $0x1a8] ss:$16 sps:$4 sm:$0xff]  }
 0x413   :  { %7551 = vst [vmem:[#allocation61_spill] sm:$0xff] %v7028_v32 }
 0x414   :  { %3105 = vmatpush1.bf16.msra.mxu1 %v7004_v2 }
 0x415   :  { %3106 = vmatprep.subr.bf16.mxu1 %v7007_v51  ;;  %3062 = vmatpush1.bf16.msra.mxu0 %v7010_v4  ;;  %v7038_v4 = vld [vmem:[#allocation7 + $0x1c8] ss:$16 sps:$4 sm:$0xff]  }
 0x416   :  { %3063 = vmatprep.subr.bf16.mxu0 %v7013_v44  ;;  %7554 = vst [vmem:[#allocation64_spill] sm:$0xff] %v7038_v4  ;;  %v7041_v44 = vld [vmem:[#allocation7 + $0x1ec] ss:$16 sps:$4 sm:$0xff]  }
 0x417   :  { %7555 = vst [vmem:[#allocation65_spill] sm:$0xff] %v7041_v44 }
 0x418   :  { %3107 = vmatpush1.bf16.msra.mxu1 %v7016_v53 }
 0x419   :  { %3108 = vmatprep.subr.bf16.mxu1 %v7019_v62  ;;  %3064 = vmatpush1.bf16.msra.mxu0 %v7022_v29  ;;  %v7045_v62 = vld [vmem:[#allocation7 + $0x1e8] ss:$16 sps:$4 sm:$0xff]   ;;  %v7048_v29 = vld [vmem:[#allocation7 + $0x20c] ss:$16 sps:$4 sm:$0xff]  }
 0x41a   :  { %3065 = vmatprep.subr.bf16.mxu0 %v7025_v8  ;;  %7556 = vst [vmem:[#allocation66_spill] sm:$0xff] %v7045_v62  ;;  %7557 = vst [vmem:[#allocation67_spill] sm:$0xff] %v7048_v29  ;;  %v7051_v8 = vld [vmem:[#allocation7 + $0x208] ss:$16 sps:$4 sm:$0xff]  }
 0x41b   :  { %7558 = vst [vmem:[#allocation68_spill] sm:$0xff] %v7051_v8 }
 0x41c   :  { %3109 = vmatpush1.bf16.msra.mxu1 %v7028_v32  ;;  %v7054_v32 = vld [vmem:[#allocation7 + $0x22c] ss:$16 sps:$4 sm:$0xff]  }
 0x41d   :  { %3110 = vmatprep.subr.bf16.mxu1 %v7031_v58  ;;  %3066 = vmatpush1.bf16.msra.mxu0 %v7034_v56  ;;  %7559 = vst [vmem:[#allocation69_spill] sm:$0xff] %v7054_v32  ;;  %v7058_v56 = vld [vmem:[#allocation7 + $0x228] ss:$16 sps:$4 sm:$0xff]  }
 0x41e   :  { %7560 = vst [vmem:[#allocation70_spill] sm:$0xff] %v7058_v56  ;;  %v7105_v58 = vld [vmem:[#allocation7 + $0x2e8] ss:$16 sps:$4 sm:$0xff]  }
 0x41f   :  { %7576 = vst [vmem:[#allocation86_spill] sm:$0xff] %v7105_v58 }
 0x420   :  { %3111 = vmatpush1.bf16.msra.mxu1 %v7038_v4  ;;  %v7061_v4 = vld [vmem:[#allocation7 + $0x24c] ss:$16 sps:$4 sm:$0xff]  }
 0x421   :  { %3112 = vmatprep.subr.bf16.mxu1 %v7041_v44  ;;  %7561 = vst [vmem:[#allocation71_spill] sm:$0xff] %v7061_v4  ;;  %v7064_v44 = vld [vmem:[#allocation7 + $0x248] ss:$16 sps:$4 sm:$0xff]  }
 0x422   :  { %7562 = vst [vmem:[#allocation72_spill] sm:$0xff] %v7064_v44 }
 0x424   :  { %3113 = vmatpush1.bf16.msra.mxu1 %v7045_v62  ;;  %v7067_v62 = vld [vmem:[#allocation7 + $0x26c] ss:$16 sps:$4 sm:$0xff]  }
 0x425   :  { %3125 = vmatprep.subr.bf16.mxu1 %v7048_v29  ;;  %7563 = vst [vmem:[#allocation73_spill] sm:$0xff] %v7067_v62  ;;  %v7070_v29 = vld [vmem:[#allocation7 + $0x268] ss:$16 sps:$4 sm:$0xff]  }
 0x426   :  { %7564 = vst [vmem:[#allocation74_spill] sm:$0xff] %v7070_v29 }
 0x427   :  { %3115 = vmatmul.mubr.bf16.vlgmr.msra.gmra.mrb[12].mxu1 %v6859_v20  ;;  %v7073_v20 = vld [vmem:[#allocation7 + $0x28c] ss:$16 sps:$4 sm:$0xff]  }
 0x428   :  { %3126 = vmatpush1.bf16.msra.mxu1 %v7051_v8  ;;  %7565 = vst [vmem:[#allocation75_spill] sm:$0xff] %v7073_v20  ;;  %v7087_v8 = vld [vmem:[#allocation7 + $0x3c4] ss:$16 sps:$4 sm:$0xff]  }
 0x429   :  { %3127 = vmatprep.subr.bf16.mxu1 %v7054_v32  ;;  %v7076_v32 = vld [vmem:[#allocation7 + $0x288] ss:$16 sps:$4 sm:$0xff]   ;;  %7570 = vst [vmem:[#allocation80_spill] sm:$0xff] %v7087_v8  ;;  %3067 = vmatprep.subr.bf16.mxu0 %v7087_v8  ;;  %v7109_v8 = vld [vmem:[#allocation7 + $0x30c] ss:$16 sps:$4 sm:$0xff]  }
 0x42a   :  { %7566 = vst [vmem:[#allocation76_spill] sm:$0xff] %v7076_v32  ;;  %7577 = vst [vmem:[#allocation87_spill] sm:$0xff] %v7109_v8 }
 0x42c   :  { %3128 = vmatpush1.bf16.msra.mxu1 %v7058_v56  ;;  %v7079_v56 = vld [vmem:[#allocation7 + $0x2ac] ss:$16 sps:$4 sm:$0xff]  }
 0x42d   :  { %3129 = vmatprep.subr.bf16.mxu1 %v7061_v4  ;;  %7567 = vst [vmem:[#allocation77_spill] sm:$0xff] %v7079_v56  ;;  %v7082_v4 = vld [vmem:[#allocation7 + $0x2a8] ss:$16 sps:$4 sm:$0xff]  }
 0x42e   :  { %7568 = vst [vmem:[#allocation78_spill] sm:$0xff] %v7082_v4 }
 0x430   :  { %3130 = vmatpush1.bf16.msra.mxu1 %v7064_v44  ;;  %v7085_v44 = vld [vmem:[#allocation7 + $0x2cc] ss:$16 sps:$4 sm:$0xff]  }
 0x431   :  { %3131 = vmatprep.subr.bf16.mxu1 %v7067_v62  ;;  %7569 = vst [vmem:[#allocation79_spill] sm:$0xff] %v7085_v44  ;;  %v7089_v62 = vld [vmem:[#allocation7 + $0x3c0] ss:$16 sps:$4 sm:$0xff]  }
 0x432   :  { %7571 = vst [vmem:[#allocation81_spill] sm:$0xff] %v7089_v62  ;;  %3068 = vmatpush1.bf16.msra.mxu0 %v7089_v62  ;;  %v7113_v62 = vld [vmem:[#allocation7 + $0x308] ss:$16 sps:$4 sm:$0xff]  }
 0x433   :  { %7578 = vst [vmem:[#allocation88_spill] sm:$0xff] %v7113_v62 }
 0x434   :  { %3132 = vmatpush1.bf16.msra.mxu1 %v7070_v29  ;;  %v7093_v29 = vld [vmem:[#allocation7 + $0x2c8] ss:$16 sps:$4 sm:$0xff]  }
 0x435   :  { %3133 = vmatprep.subr.bf16.mxu1 %v7073_v20  ;;  %7572 = vst [vmem:[#allocation82_spill] sm:$0xff] %v7093_v29  ;;  %v7099_v20 = vld [vmem:[#allocation7 + $0x3e4] ss:$16 sps:$4 sm:$0xff]  }
 0x436   :  { %7574 = vst [vmem:[#allocation84_spill] sm:$0xff] %v7099_v20  ;;  %3069 = vmatprep.subr.bf16.mxu0 %v7099_v20  ;;  %v7119_v20 = vld [vmem:[#allocation7 + $0x328] ss:$16 sps:$4 sm:$0xff]  }
 0x437   :  { %7580 = vst [vmem:[#allocation90_spill] sm:$0xff] %v7119_v20 }
 0x438   :  { %3134 = vmatpush1.bf16.msra.mxu1 %v7076_v32  ;;  %v7097_v32 = vld [vmem:[#allocation7 + $0x2ec] ss:$16 sps:$4 sm:$0xff]  }
 0x439   :  { %3135 = vmatprep.subr.bf16.mxu1 %v7079_v56  ;;  %7573 = vst [vmem:[#allocation83_spill] sm:$0xff] %v7097_v32  ;;  %v7101_v56 = vld [vmem:[#allocation7 + $0x3e0] ss:$16 sps:$4 sm:$0xff]  }
 0x43a   :  { %7575 = vst [vmem:[#allocation85_spill] sm:$0xff] %v7101_v56  ;;  %3070 = vmatpush1.bf16.msra.mxu0 %v7101_v56  ;;  %v7122_v56 = vld [vmem:[#allocation7 + $0x34c] ss:$16 sps:$4 sm:$0xff]  }
 0x43b   :  { %3188 = vmatprep.subr.bf16.mxu0 %v6729_v61  ;;  %7581 = vst [vmem:[#allocation91_spill] sm:$0xff] %v7122_v56  ;;  %v7128_v61 = vld [vmem:[#allocation7 + $0x36c] ss:$16 sps:$4 sm:$0xff]  }
 0x43c   :  { %3136 = vmatpush1.bf16.msra.mxu1 %v7082_v4  ;;  %7583 = vst [vmem:[#allocation93_spill] sm:$0xff] %v7128_v61 }
 0x43d   :  { %3137 = vmatprep.subr.bf16.mxu1 %v7085_v44  ;;  %v7116_v44 = vld [vmem:[#allocation7 + $0x32c] ss:$16 sps:$4 sm:$0xff]  }
 0x43e   :  { %7579 = vst [vmem:[#allocation89_spill] sm:$0xff] %v7116_v44 }
 0x440   :  { %3138 = vmatpush1.bf16.msra.mxu1 %v7093_v29 }
 0x441   :  { %3139 = vmatprep.subr.bf16.mxu1 %v7097_v32  ;;  %v7125_v32 = vld [vmem:[#allocation7 + $0x348] ss:$16 sps:$4 sm:$0xff]  }
 0x442   :  { %7582 = vst [vmem:[#allocation92_spill] sm:$0xff] %v7125_v32 }
 0x444   :  { %3140 = vmatpush1.bf16.msra.mxu1 %v7105_v58 }
 0x445   :  { %3141 = vmatprep.subr.bf16.mxu1 %v7109_v8  ;;  %v7131_v8 = vld [vmem:[#allocation7 + $0x368] ss:$16 sps:$4 sm:$0xff]  }
 0x446   :  { %7584 = vst [vmem:[#allocation94_spill] sm:$0xff] %v7131_v8 }
 0x448   :  { %3142 = vmatpush1.bf16.msra.mxu1 %v7113_v62  ;;  %v7134_v62 = vld [vmem:[#allocation7 + $0x38c] ss:$16 sps:$4 sm:$0xff]  }
 0x449   :  { %3143 = vmatprep.subr.bf16.mxu1 %v7116_v44  ;;  %7585 = vst [vmem:[#allocation95_spill] sm:$0xff] %v7134_v62  ;;  %v7137_v44 = vld [vmem:[#allocation7 + $0x388] ss:$16 sps:$4 sm:$0xff]  }
 0x44a   :  { %7586 = vst [vmem:[#allocation96_spill] sm:$0xff] %v7137_v44 }
 0x44c   :  { %3144 = vmatpush1.bf16.msra.mxu1 %v7119_v20  ;;  %v7140_v20 = vld [vmem:[#allocation7 + $0x3ac] ss:$16 sps:$4 sm:$0xff]  }
 0x44d   :  { %3145 = vmatprep.subr.bf16.mxu1 %v7122_v56  ;;  %7587 = vst [vmem:[#allocation97_spill] sm:$0xff] %v7140_v20  ;;  %v7143_v56 = vld [vmem:[#allocation7 + $0x3a8] ss:$16 sps:$4 sm:$0xff]  }
 0x44e   :  { %7588 = vst [vmem:[#allocation98_spill] sm:$0xff] %v7143_v56 }
 0x450   :  { %3146 = vmatpush1.bf16.msra.mxu1 %v7125_v32  ;;  %v7146_v32 = vld [vmem:[#allocation7 + $0x3cc] ss:$16 sps:$4 sm:$0xff]  }
 0x451   :  { %3147 = vmatprep.subr.bf16.mxu1 %v7128_v61  ;;  %7589 = vst [vmem:[#allocation99_spill] sm:$0xff] %v7146_v32  ;;  %v7149_v61 = vld [vmem:[#allocation7 + $0x3c8] ss:$16 sps:$4 sm:$0xff]  }
 0x452   :  { %7590 = vst [vmem:[#allocation100_spill] sm:$0xff] %v7149_v61 }
 0x454   :  { %3148 = vmatpush1.bf16.msra.mxu1 %v7131_v8  ;;  %v7152_v8 = vld [vmem:[#allocation7 + $0x3ec] ss:$16 sps:$4 sm:$0xff]  }
 0x455   :  { %3149 = vmatprep.subr.bf16.mxu1 %v7134_v62  ;;  %7591 = vst [vmem:[#allocation101_spill] sm:$0xff] %v7152_v8  ;;  %v7155_v62 = vld [vmem:[#allocation7 + $0x3e8] ss:$16 sps:$4 sm:$0xff]  }
 0x456   :  { %7592 = vst [vmem:[#allocation102_spill] sm:$0xff] %v7155_v62 }
 0x458   :  { %3150 = vmatpush1.bf16.msra.mxu1 %v7137_v44 }
 0x459   :  { %3151 = vmatprep.subr.bf16.mxu1 %v7140_v20  ;;  %v7161_v20 = vsub.s32 3, %v6618_v7 }
 0x45b   :  { %7593 = vst [vmem:[#allocation103_spill] sm:$0xff] %v7161_v20 }
 0x45c   :  { %3152 = vmatpush1.bf16.msra.mxu1 %v7143_v56  ;;  %v7164_v56 = vsub.s32 2, %v6618_v7 }
 0x45d   :  { %3153 = vmatprep.subr.bf16.mxu1 %v7146_v32  ;;  %v853_v32 = vrot.slane %v6838_v47, %v7161_v20 }
 0x460   :  { %3154 = vmatpush1.bf16.msra.mxu1 %v7149_v61  ;;  %v849_v61 = vrot.slane %v6838_v47, %v7164_v56 }
 0x461   :  { %3155 = vmatprep.subr.bf16.mxu1 %v7152_v8 }
 0x464   :  { %3156 = vmatpush1.bf16.msra.mxu1 %v7155_v62 }
 0x465   :  { %3274 = vmatprep.subr.bf16.mxu1 %v6851_v10 }
 0x4ba   :  { %v2215_v44 = vpop.f32.mrb[8].mxu1 }
 0x4bb   :  { %v2217_v58 = vpop.f32.mrb[9].mxu1  ;;  %v7176_v54 = vadd.f32 %v2215_v44, %v849_v61 }
 0x4bc   :  { %v2219_v29 = vpop.f32.mrb[10].mxu1  ;;  %v7172_v4 = vadd.f32 %v2217_v58, %v853_v32 }
 0x4bd   :  { %v7170_v8 = vadd.f32 %v2219_v29, %v849_v61  ;;  %v2221_v62 = vpop.f32.mrb[11].mxu1  ;;  %v7629_v61 = vld [vmem:[#allocation76_spill] sm:$0xff] }
 0x4be   :  { %v7174_v10 = vadd.f32 %v2221_v62, %v853_v32 }
 0x4bf   :  { %v2226_v20 = vpack.c.bf16 %v7170_v8, %v7176_v54 }
 0x4c0   :  { %v2227_v7 = vpack.c.bf16 %v7174_v10, %v7172_v4 }
 0x4c2   :  { %3071 = vmatprep.mubr.bf16.mxu0 %v2227_v7  ;;  %3157 = vmatprep.mubr.bf16.mxu1 %v2227_v7  ;;  %v7631_v7 = vld [vmem:[#allocation77_spill] sm:$0xff] }
 0x4c3   :  { %3072 = vmatmul.mubr.bf16.vlgmr.msra.gmra.mrb[12].mxu0 %v2226_v20  ;;  %3158 = vmatmul.mubr.bf16.vlgmr.msra.gmra.mrb[12].mxu1 %v2226_v20  ;;  %v7628_v20 = vld [vmem:[#allocation40_spill] sm:$0xff] }
 0x4c4   :  { %3189 = vmatpush1.bf16.msra.mxu0 %v6731_v63  ;;  %3275 = vmatpush1.bf16.msra.mxu1 %v6861_v22  ;;  %v7594_v63 = vld [vmem:[#allocation19_spill] sm:$0xff] }
 0x4c5   :  { %3190 = vmatprep.subr.bf16.mxu0 %v6735_v3  ;;  %3276 = vmatprep.subr.bf16.mxu1 %v6866_v26  ;;  %v7595_v3 = vld [vmem:[#allocation58_spill] sm:$0xff] }
 0x4c8   :  { %3191 = vmatpush1.bf16.msra.mxu0 %v6737_v5  ;;  %3277 = vmatpush1.bf16.msra.mxu1 %v6875_v35  ;;  %v7596_v5 = vld [vmem:[#allocation20_spill] sm:$0xff] }
 0x4c9   :  { %3192 = vmatprep.subr.bf16.mxu0 %v6741_v19  ;;  %3278 = vmatprep.subr.bf16.mxu1 %v6878_v37  ;;  %v7597_v19 = vld [vmem:[#allocation61_spill] sm:$0xff] }
 0x4cc   :  { %3193 = vmatpush1.bf16.msra.mxu0 %v6743_v9  ;;  %3279 = vmatpush1.bf16.msra.mxu1 %v6887_v41  ;;  %v7598_v9 = vld [vmem:[#allocation21_spill] sm:$0xff]  ;;  %v7613_v41 = vld [vmem:[#allocation68_spill] sm:$0xff] }
 0x4cd   :  { %3194 = vmatprep.subr.bf16.mxu0 %v6747_v11  ;;  %3280 = vmatprep.subr.bf16.mxu1 %v6890_v0  ;;  %v7599_v11 = vld [vmem:[#allocation62_spill] sm:$0xff]  ;;  %v7614_v0 = vld [vmem:[#allocation33_spill] sm:$0xff] }
 0x4d0   :  { %3195 = vmatpush1.bf16.msra.mxu0 %v6749_v14  ;;  %3281 = vmatpush1.bf16.msra.mxu1 %v6899_v55  ;;  %v7600_v14 = vld [vmem:[#allocation22_spill] sm:$0xff]  ;;  %v7615_v55 = vld [vmem:[#allocation69_spill] sm:$0xff] }
 0x4d1   :  { %3196 = vmatprep.subr.bf16.mxu0 %v6753_v16  ;;  %3282 = vmatprep.subr.bf16.mxu1 %v6902_v57  ;;  %v7601_v16 = vld [vmem:[#allocation64_spill] sm:$0xff]  ;;  %v7616_v57 = vld [vmem:[#allocation34_spill] sm:$0xff] }
 0x4d4   :  { %3197 = vmatpush1.bf16.msra.mxu0 %v6755_v18  ;;  %3283 = vmatpush1.bf16.msra.mxu1 %v6911_v33  ;;  %v7602_v18 = vld [vmem:[#allocation23_spill] sm:$0xff] }
 0x4d5   :  { %3198 = vmatprep.subr.bf16.mxu0 %v6759_v21  ;;  %3284 = vmatprep.subr.bf16.mxu1 %v6914_v6  ;;  %v7603_v21 = vld [vmem:[#allocation65_spill] sm:$0xff]  ;;  %v7618_v33 = vld [vmem:[#allocation35_spill] sm:$0xff] }
 0x4d6   :  { %v7619_v6 = vld [vmem:[#allocation71_spill] sm:$0xff] }
 0x4d8   :  { %3199 = vmatpush1.bf16.msra.mxu0 %v6761_v23  ;;  %3285 = vmatpush1.bf16.msra.mxu1 %v6923_v24  ;;  %v7604_v23 = vld [vmem:[#allocation24_spill] sm:$0xff]  ;;  %v7622_v24 = vld [vmem:[#allocation37_spill] sm:$0xff] }
 0x4d9   :  { %3200 = vmatprep.subr.bf16.mxu0 %v6765_v25  ;;  %3286 = vmatprep.subr.bf16.mxu1 %v6926_v49  ;;  %v7605_v25 = vld [vmem:[#allocation66_spill] sm:$0xff] }
 0x4dc   :  { %3201 = vmatpush1.bf16.msra.mxu0 %v6767_v27  ;;  %3287 = vmatpush1.bf16.msra.mxu1 %v6938_v39  ;;  %v7606_v27 = vld [vmem:[#allocation25_spill] sm:$0xff]  ;;  %v7612_v39 = vld [vmem:[#allocation32_spill] sm:$0xff] }
 0x4dd   :  { %3202 = vmatprep.subr.bf16.mxu0 %v6771_v31  ;;  %3288 = vmatprep.subr.bf16.mxu1 %v6945_v17  ;;  %v7607_v31 = vld [vmem:[#allocation67_spill] sm:$0xff] }
 0x4e0   :  { %3203 = vmatpush1.bf16.msra.mxu0 %v6773_v34  ;;  %3289 = vmatpush1.bf16.msra.mxu1 %v6956_v42  ;;  %v7624_v42 = vld [vmem:[#allocation38_spill] sm:$0xff] }
 0x4e1   :  { %3204 = vmatprep.subr.bf16.mxu0 %v6777_v36  ;;  %3290 = vmatprep.subr.bf16.mxu1 %v6959_v28  ;;  %v7625_v28 = vld [vmem:[#allocation74_spill] sm:$0xff] }
 0x4e4   :  { %3205 = vmatpush1.bf16.msra.mxu0 %v6779_v38  ;;  %3291 = vmatpush1.bf16.msra.mxu1 %v6968_v60  ;;  %v7617_v60 = vld [vmem:[#allocation70_spill] sm:$0xff] }
 0x4e5   :  { %3206 = vmatprep.subr.bf16.mxu0 %v6783_v40  ;;  %3292 = vmatprep.subr.bf16.mxu1 %v6971_v12 }
 0x4e8   :  { %3207 = vmatpush1.bf16.msra.mxu0 %v6785_v43  ;;  %3293 = vmatpush1.bf16.msra.mxu1 %v6980_v13  ;;  %v7608_v43 = vld [vmem:[#allocation29_spill] sm:$0xff] }
 0x4e9   :  { %3208 = vmatprep.subr.bf16.mxu0 %v6790_v45  ;;  %3294 = vmatprep.subr.bf16.mxu1 %v6983_v15  ;;  %v7621_v15 = vld [vmem:[#allocation72_spill] sm:$0xff]  ;;  %v7623_v13 = vld [vmem:[#allocation73_spill] sm:$0xff] }
 0x4ec   :  { %3209 = vmatpush1.bf16.msra.mxu0 %v6793_v46  ;;  %3295 = vmatpush1.bf16.msra.mxu1 %v6992_v59  ;;  %v7627_v59 = vld [vmem:[#allocation75_spill] sm:$0xff] }
 0x4ed   :  { %3210 = vmatprep.subr.bf16.mxu0 %v6797_v48  ;;  %3296 = vmatprep.subr.bf16.mxu1 %v6995_v1 }
 0x4f0   :  { %3211 = vmatpush1.bf16.msra.mxu0 %v6799_v50  ;;  %3297 = vmatpush1.bf16.msra.mxu1 %v7004_v2  ;;  %v7609_v50 = vld [vmem:[#allocation28_spill] sm:$0xff] }
 0x4f1   :  { %3212 = vmatprep.subr.bf16.mxu0 %v6803_v30  ;;  %3298 = vmatprep.subr.bf16.mxu1 %v7007_v51  ;;  %v7611_v51 = vld [vmem:[#allocation31_spill] sm:$0xff]  ;;  %v7620_v2 = vld [vmem:[#allocation36_spill] sm:$0xff] }
 0x4f4   :  { %3213 = vmatpush1.bf16.msra.mxu0 %v6805_v52  ;;  %3299 = vmatpush1.bf16.msra.mxu1 %v7016_v53  ;;  %v7610_v52 = vld [vmem:[#allocation30_spill] sm:$0xff]  ;;  %v7626_v53 = vld [vmem:[#allocation39_spill] sm:$0xff] }
 0x4f5   :  { %3214 = vmatprep.subr.bf16.mxu0 %v7594_v63  ;;  %3300 = vmatprep.subr.bf16.mxu1 %v7595_v3  ;;  %v7632_v63 = vld [vmem:[#allocation42_spill] sm:$0xff] }
 0x4f6   :  { %v7633_v3 = vld [vmem:[#allocation78_spill] sm:$0xff] }
 0x4f8   :  { %3215 = vmatpush1.bf16.msra.mxu0 %v7596_v5  ;;  %3301 = vmatpush1.bf16.msra.mxu1 %v7597_v19  ;;  %v7634_v5 = vld [vmem:[#allocation43_spill] sm:$0xff] }
 0x4f9   :  { %3216 = vmatprep.subr.bf16.mxu0 %v7598_v9  ;;  %3302 = vmatprep.subr.bf16.mxu1 %v7599_v11  ;;  %v7635_v19 = vld [vmem:[#allocation79_spill] sm:$0xff]  ;;  %v7636_v9 = vld [vmem:[#allocation46_spill] sm:$0xff] }
 0x4fa   :  { %v7637_v11 = vld [vmem:[#allocation82_spill] sm:$0xff] }
 0x4fc   :  { %3217 = vmatpush1.bf16.msra.mxu0 %v7600_v14  ;;  %3303 = vmatpush1.bf16.msra.mxu1 %v7601_v16  ;;  %v7638_v14 = vld [vmem:[#allocation47_spill] sm:$0xff] }
 0x4fd   :  { %3218 = vmatprep.subr.bf16.mxu0 %v7602_v18  ;;  %3304 = vmatprep.subr.bf16.mxu1 %v7603_v21  ;;  %v7639_v16 = vld [vmem:[#allocation83_spill] sm:$0xff]  ;;  %v7640_v18 = vld [vmem:[#allocation48_spill] sm:$0xff]  ;;  %v7641_v21 = vld [vmem:[#allocation86_spill] sm:$0xff] }
 0x500   :  { %3219 = vmatpush1.bf16.msra.mxu0 %v7604_v23  ;;  %3305 = vmatpush1.bf16.msra.mxu1 %v7605_v25  ;;  %v7642_v23 = vld [vmem:[#allocation49_spill] sm:$0xff]  ;;  %v7643_v25 = vld [vmem:[#allocation87_spill] sm:$0xff] }
 0x501   :  { %3231 = vmatprep.subr.bf16.mxu0 %v7606_v27  ;;  %3317 = vmatprep.subr.bf16.mxu1 %v7607_v31  ;;  %v7644_v27 = vld [vmem:[#allocation50_spill] sm:$0xff]  ;;  %v7645_v31 = vld [vmem:[#allocation88_spill] sm:$0xff] }
 0x596   :  { %v3073_v34 = vpop.f32.mrb[12].mxu0  ;;  %v7246_v36 = vpop.f32.mrb[12].mxu1 }
 0x597   :  { %v3075_v38 = vpop.f32.mrb[13].mxu0  ;;  %v3161_v40 = vpop.f32.mrb[13].mxu1  ;;  %v7254_v30 = vsub.f32 %v7609_v50, %v3073_v34  ;;  %v7646_v34 = vld [vmem:[#allocation51_spill] sm:$0xff] }
 0x598   :  { %v7249_v45 = vsub.f32 %v7608_v43, %v3075_v38  ;;  %v3077_v46 = vpop.f32.mrb[14].mxu0  ;;  %v7251_v48 = vpop.f32.mrb[14].mxu1  ;;  %v7266_v49 = vsub.f32 %v7172_v4, %v3161_v40  ;;  %v7647_v38 = vld [vmem:[#allocation89_spill] sm:$0xff]  ;;  %v7648_v40 = vld [vmem:[#allocation52_spill] sm:$0xff]  ;;  %v7649_v43 = vld [vmem:[#allocation90_spill] sm:$0xff] }
 0x599   :  { %v7257_v58 = vsub.f32 %v7610_v52, %v3077_v46  ;;  %v3079_v29 = vpop.f32.mrb[15].mxu0  ;;  %v3165_v62 = vpop.f32.mrb[15].mxu1  ;;  %v3176_v22 = vmul.f32 %v7254_v30, %v7254_v30  ;;  %v7650_v46 = vld [vmem:[#allocation53_spill] sm:$0xff]  ;;  %v7651_v50 = vld [vmem:[#allocation91_spill] sm:$0xff]  ;;  %v7652_v52 = vld [vmem:[#allocation54_spill] sm:$0xff] }
 0x59a   :  { %v7260_v44 = vsub.f32 %v7611_v51, %v3079_v29  ;;  %v7263_v47 = vsub.f32 %v7174_v10, %v3165_v62  ;;  %v3177_v12 = vmul.f32 %v7249_v45, %v7249_v45  ;;  %v3179_v4 = vmul.f32 %v7266_v49, %v7266_v49  ;;  %v7630_v10 = vld [vmem:[#allocation41_spill] sm:$0xff]  ;;  %v7653_v29 = vld [vmem:[#allocation92_spill] sm:$0xff]  ;;  %v7654_v62 = vld [vmem:[#allocation55_spill] sm:$0xff] }
 0x59b   :  { %v3180_v1 = vmul.f32 %v7257_v58, %v7257_v58  ;;  %v7655_v51 = vld [vmem:[#allocation93_spill] sm:$0xff] }
 0x59c   :  { %v3181_v17 = vmul.f32 %v7260_v44, %v7260_v44  ;;  %v3183_v26 = vmul.f32 %v7263_v47, %v7263_v47 }
 0x59d   :  { %v3184_v35 = vpack.c.bf16 %v3180_v1, %v3176_v22  ;;  %v7656_v1 = vld [vmem:[#allocation56_spill] sm:$0xff]  ;;  %v7659_v22 = vld [vmem:[#allocation95_spill] sm:$0xff] }
 0x59e   :  { %v3185_v32 = vpack.c.bf16 %v3181_v17, %v3177_v12  ;;  %v3187_v37 = vpack.c.bf16 %v3183_v26, %v3179_v4  ;;  %v7657_v12 = vld [vmem:[#allocation94_spill] sm:$0xff]  ;;  %v7658_v17 = vld [vmem:[#allocation57_spill] sm:$0xff]  ;;  %v7660_v26 = vld [vmem:[#allocation59_spill] sm:$0xff] }
 0x59f   :  { %v7662_v4 = vld [vmem:[#allocation60_spill] sm:$0xff] }
 0x5a0   :  { %3220 = vmatprep.mubr.bf16.mxu0 %v3185_v32  ;;  %3306 = vmatprep.mubr.bf16.mxu1 %v3185_v32  ;;  %v7661_v32 = vld [vmem:[#allocation96_spill] sm:$0xff] }
 0x5a1   :  { %3221 = vmatmul.mubr.bf16.vlgmr.msra.gmra.mrb[16].mxu0 %v3184_v35  ;;  %3307 = vmatmul.mubr.bf16.vlgmr.msra.gmra.mrb[16].mxu1 %v3184_v35  ;;  %v7663_v35 = vld [vmem:[#allocation97_spill] sm:$0xff] }
 0x5a2   :  { %3232 = vmatpush1.bf16.msra.mxu0 %v7612_v39  ;;  %3318 = vmatpush1.bf16.msra.mxu1 %v7613_v41  ;;  %v7665_v39 = vld [vmem:[#allocation98_spill] sm:$0xff]  ;;  %v7336_v41 = vsub.f32 %v7170_v8, %v7251_v48 }
 0x5a3   :  { %3263 = vmatprep.mubr.bf16.mxu0 %v3187_v37  ;;  %3349 = vmatprep.mubr.bf16.mxu1 %v3187_v37  ;;  %v7664_v37 = vld [vmem:[#allocation63_spill] sm:$0xff]  ;;  %v6050_v8 = vld [vmem:[#allocation11 + $0x104] ss:$8 sps:$4 sm:$0xff]  }
 0x5a4   :  { %3233 = vmatprep.subr.bf16.mxu0 %v7614_v0  ;;  %3319 = vmatprep.subr.bf16.mxu1 %v7615_v55  ;;  %v7666_v0 = vld [vmem:[#allocation80_spill] sm:$0xff]  ;;  %v7667_v55 = vld [vmem:[#allocation99_spill] sm:$0xff]  ;;  %v6074_v48 = vld [vmem:[#allocation8 + $0x4] ss:$8 sps:$4 sm:$0xff]  }
 0x5a6   :  { %3234 = vmatpush1.bf16.msra.mxu0 %v7616_v57  ;;  %3320 = vmatpush1.bf16.msra.mxu1 %v7617_v60  ;;  %v7342_v57 = vsub.f32 %v7176_v54, %v7246_v36  ;;  %v7668_v60 = vld [vmem:[#allocation81_spill] sm:$0xff]  ;;  %v7673_v54 = vld [vmem:[#allocation102_spill] sm:$0xff] }
 0x5a7   :  { %3235 = vmatprep.subr.bf16.mxu0 %v7618_v33  ;;  %3321 = vmatprep.subr.bf16.mxu1 %v7619_v6  ;;  %v7669_v33 = vld [vmem:[#allocation100_spill] sm:$0xff]  ;;  %v3182_v6 = vmul.f32 %v7336_v41, %v7336_v41  ;;  %v6048_v36 = vld [vmem:[#allocation11 + $0x100] ss:$8 sps:$4 sm:$0xff]  }
 0x5aa   :  { %3236 = vmatpush1.bf16.msra.mxu0 %v7620_v2  ;;  %3322 = vmatpush1.bf16.msra.mxu1 %v7621_v15  ;;  %v7670_v2 = vld [vmem:[#allocation84_spill] sm:$0xff]  ;;  %v7671_v15 = vld [vmem:[#allocation101_spill] sm:$0xff] }
 0x5ab   :  { %3237 = vmatprep.subr.bf16.mxu0 %v7622_v24  ;;  %3323 = vmatprep.subr.bf16.mxu1 %v7623_v13  ;;  %v3178_v24 = vmul.f32 %v7342_v57, %v7342_v57  ;;  %v7672_v13 = vld [vmem:[#allocation85_spill] sm:$0xff] }
 0x5ae   :  { %3238 = vmatpush1.bf16.msra.mxu0 %v7624_v42  ;;  %3324 = vmatpush1.bf16.msra.mxu1 %v7625_v28  ;;  %v3186_v42 = vpack.c.bf16 %v3182_v6, %v3178_v24  ;;  %v6053_v28 = vld [vmem:[#allocation11 + $0x114] ss:$8 sps:$4 sm:$0xff]   ;;  %v6116_v6 = vld [vmem:[#allocation8 + $0xe4] ss:$8 sps:$4 sm:$0xff]   ;;  %v6168_v24 = vld [vmem:[#allocation11] ss:$8 sps:$4 sm:$0xff]  }
 0x5af   :  { %3239 = vmatprep.subr.bf16.mxu0 %v7626_v53  ;;  %3325 = vmatprep.subr.bf16.mxu1 %v7627_v59  ;;  %v6072_v53 = vld [vmem:[#allocation8] ss:$8 sps:$4 sm:$0xff]   ;;  %v6077_v59 = vld [vmem:[#allocation8 + $0x14] ss:$8 sps:$4 sm:$0xff]  }
 0x5b2   :  { %3240 = vmatpush1.bf16.msra.mxu0 %v7628_v20  ;;  %3326 = vmatpush1.bf16.msra.mxu1 %v7629_v61  ;;  %v6051_v20 = vld [vmem:[#allocation11 + $0x110] ss:$8 sps:$4 sm:$0xff]   ;;  %v6477_v61 = vmov 0  }
 0x5b3   :  { %3241 = vmatprep.subr.bf16.mxu0 %v7630_v10  ;;  %3327 = vmatprep.subr.bf16.mxu1 %v7631_v7  ;;  %v6056_v10 = vld [vmem:[#allocation11 + $0x124] ss:$8 sps:$4 sm:$0xff]   ;;  %v6075_v7 = vld [vmem:[#allocation8 + $0x10] ss:$8 sps:$4 sm:$0xff]  }
 0x5b6   :  { %3242 = vmatpush1.bf16.msra.mxu0 %v7632_v63  ;;  %3328 = vmatpush1.bf16.msra.mxu1 %v7633_v3  ;;  %v6080_v63 = vld [vmem:[#allocation8 + $0x24] ss:$8 sps:$4 sm:$0xff]   ;;  %v6054_v3 = vld [vmem:[#allocation11 + $0x120] ss:$8 sps:$4 sm:$0xff]  }
 0x5b7   :  { %3243 = vmatprep.subr.bf16.mxu0 %v7634_v5  ;;  %3329 = vmatprep.subr.bf16.mxu1 %v7635_v19  ;;  %v6059_v5 = vld [vmem:[#allocation11 + $0x134] ss:$8 sps:$4 sm:$0xff]   ;;  %v6078_v19 = vld [vmem:[#allocation8 + $0x20] ss:$8 sps:$4 sm:$0xff]  }
 0x5ba   :  { %3244 = vmatpush1.bf16.msra.mxu0 %v7636_v9  ;;  %3330 = vmatpush1.bf16.msra.mxu1 %v7637_v11  ;;  %v6083_v9 = vld [vmem:[#allocation8 + $0x34] ss:$8 sps:$4 sm:$0xff]   ;;  %v6057_v11 = vld [vmem:[#allocation11 + $0x130] ss:$8 sps:$4 sm:$0xff]  }
 0x5bb   :  { %3245 = vmatprep.subr.bf16.mxu0 %v7638_v14  ;;  %3331 = vmatprep.subr.bf16.mxu1 %v7639_v16  ;;  %v6062_v14 = vld [vmem:[#allocation11 + $0x144] ss:$8 sps:$4 sm:$0xff]   ;;  %v6081_v16 = vld [vmem:[#allocation8 + $0x30] ss:$8 sps:$4 sm:$0xff]  }
 0x5be   :  { %3246 = vmatpush1.bf16.msra.mxu0 %v7640_v18  ;;  %3332 = vmatpush1.bf16.msra.mxu1 %v7641_v21  ;;  %v6086_v18 = vld [vmem:[#allocation8 + $0x44] ss:$8 sps:$4 sm:$0xff]   ;;  %v6060_v21 = vld [vmem:[#allocation11 + $0x140] ss:$8 sps:$4 sm:$0xff]  }
 0x5bf   :  { %3247 = vmatprep.subr.bf16.mxu0 %v7642_v23  ;;  %3333 = vmatprep.subr.bf16.mxu1 %v7643_v25  ;;  %v6065_v23 = vld [vmem:[#allocation11 + $0x154] ss:$8 sps:$4 sm:$0xff]   ;;  %v6084_v25 = vld [vmem:[#allocation8 + $0x40] ss:$8 sps:$4 sm:$0xff]  }
 0x5c2   :  { %3248 = vmatpush1.bf16.msra.mxu0 %v7644_v27  ;;  %3334 = vmatpush1.bf16.msra.mxu1 %v7645_v31  ;;  %v6089_v27 = vld [vmem:[#allocation8 + $0x54] ss:$8 sps:$4 sm:$0xff]   ;;  %v6063_v31 = vld [vmem:[#allocation11 + $0x150] ss:$8 sps:$4 sm:$0xff]  }
 0x5c3   :  { %3249 = vmatprep.subr.bf16.mxu0 %v7646_v34  ;;  %3335 = vmatprep.subr.bf16.mxu1 %v7647_v38  ;;  %v6068_v34 = vld [vmem:[#allocation11 + $0x164] ss:$8 sps:$4 sm:$0xff]   ;;  %v6087_v38 = vld [vmem:[#allocation8 + $0x50] ss:$8 sps:$4 sm:$0xff]  }
 0x5c6   :  { %3250 = vmatpush1.bf16.msra.mxu0 %v7648_v40  ;;  %3336 = vmatpush1.bf16.msra.mxu1 %v7649_v43  ;;  %v6092_v40 = vld [vmem:[#allocation8 + $0x64] ss:$8 sps:$4 sm:$0xff]   ;;  %v6066_v43 = vld [vmem:[#allocation11 + $0x160] ss:$8 sps:$4 sm:$0xff]  }
 0x5c7   :  { %3251 = vmatprep.subr.bf16.mxu0 %v7650_v46  ;;  %3337 = vmatprep.subr.bf16.mxu1 %v7651_v50  ;;  %v6071_v46 = vld [vmem:[#allocation11 + $0x174] ss:$8 sps:$4 sm:$0xff]   ;;  %v6090_v50 = vld [vmem:[#allocation8 + $0x60] ss:$8 sps:$4 sm:$0xff]  }
 0x5ca   :  { %3252 = vmatpush1.bf16.msra.mxu0 %v7652_v52  ;;  %3338 = vmatpush1.bf16.msra.mxu1 %v7653_v29  ;;  %v6095_v52 = vld [vmem:[#allocation8 + $0x74] ss:$8 sps:$4 sm:$0xff]   ;;  %v6069_v29 = vld [vmem:[#allocation11 + $0x170] ss:$8 sps:$4 sm:$0xff]  }
 0x5cb   :  { %3253 = vmatprep.subr.bf16.mxu0 %v7654_v62  ;;  %3339 = vmatprep.subr.bf16.mxu1 %v7655_v51  ;;  %v6093_v62 = vld [vmem:[#allocation8 + $0x70] ss:$8 sps:$4 sm:$0xff]   ;;  %v6098_v51 = vld [vmem:[#allocation8 + $0x84] ss:$8 sps:$4 sm:$0xff]  }
 0x5ce   :  { %3254 = vmatpush1.bf16.msra.mxu0 %v7656_v1  ;;  %3340 = vmatpush1.bf16.msra.mxu1 %v7657_v12  ;;  %v6096_v1 = vld [vmem:[#allocation8 + $0x80] ss:$8 sps:$4 sm:$0xff]  }
 0x5cf   :  { %3255 = vmatprep.subr.bf16.mxu0 %v7658_v17  ;;  %3341 = vmatprep.subr.bf16.mxu1 %v7659_v22  ;;  %v7674_v12 = vld [vmem:[#allocation45_spill] sm:$0xff]  ;;  %v7675_v17 = vld [vmem:[#allocation44_spill] sm:$0xff] }
 0x5d0   :  { %v7676_v22 = vpack.c.bf16 %v7674_v12, %v7675_v17 }
 0x5d2   :  { %3256 = vmatpush1.bf16.msra.mxu0 %v7660_v26  ;;  %3342 = vmatpush1.bf16.msra.mxu1 %v7661_v32  ;;  %v6101_v26 = vld [vmem:[#allocation8 + $0x94] ss:$8 sps:$4 sm:$0xff]   ;;  %v6099_v32 = vld [vmem:[#allocation8 + $0x90] ss:$8 sps:$4 sm:$0xff]  }
 0x5d3   :  { %3257 = vmatprep.subr.bf16.mxu0 %v7662_v4  ;;  %3343 = vmatprep.subr.bf16.mxu1 %v7663_v35  ;;  %v6104_v4 = vld [vmem:[#allocation8 + $0xa4] ss:$8 sps:$4 sm:$0xff]   ;;  %v6102_v35 = vld [vmem:[#allocation8 + $0xa0] ss:$8 sps:$4 sm:$0xff]  }
 0x5d6   :  { %3258 = vmatpush1.bf16.msra.mxu0 %v7664_v37  ;;  %3344 = vmatpush1.bf16.msra.mxu1 %v7665_v39  ;;  %v6107_v37 = vld [vmem:[#allocation8 + $0xb4] ss:$8 sps:$4 sm:$0xff]   ;;  %v6105_v39 = vld [vmem:[#allocation8 + $0xb0] ss:$8 sps:$4 sm:$0xff]  }
 0x5d7   :  { %3259 = vmatprep.subr.bf16.mxu0 %v7666_v0  ;;  %3345 = vmatprep.subr.bf16.mxu1 %v7667_v55  ;;  %v6110_v0 = vld [vmem:[#allocation8 + $0xc4] ss:$8 sps:$4 sm:$0xff]   ;;  %v6108_v55 = vld [vmem:[#allocation8 + $0xc0] ss:$8 sps:$4 sm:$0xff]  }
 0x5da   :  { %3260 = vmatpush1.bf16.msra.mxu0 %v7668_v60  ;;  %3346 = vmatpush1.bf16.msra.mxu1 %v7669_v33  ;;  %v6113_v60 = vld [vmem:[#allocation8 + $0xd4] ss:$8 sps:$4 sm:$0xff]   ;;  %v6111_v33 = vld [vmem:[#allocation8 + $0xd0] ss:$8 sps:$4 sm:$0xff]  }
 0x5db   :  { %3261 = vmatprep.subr.bf16.mxu0 %v7670_v2  ;;  %3347 = vmatprep.subr.bf16.mxu1 %v7671_v15  ;;  %v6114_v2 = vld [vmem:[#allocation8 + $0xe0] ss:$8 sps:$4 sm:$0xff]   ;;  %v6119_v15 = vld [vmem:[#allocation8 + $0xf4] ss:$8 sps:$4 sm:$0xff]  }
 0x5de   :  { %3262 = vmatpush1.bf16.msra.mxu0 %v7672_v13  ;;  %3348 = vmatpush1.bf16.msra.mxu1 %v7673_v54  ;;  %v6170_v13 = vld [vmem:[#allocation11 + $0x4] ss:$8 sps:$4 sm:$0xff]   ;;  %v6173_v54 = vld [vmem:[#allocation11 + $0x14] ss:$8 sps:$4 sm:$0xff]  }
 0x5df   :  { %4077 = vmatprep.subr.bf16.mxu1 %v6050_v8  ;;  %3860 = vmatprep.subr.bf16.mxu0 %v6074_v48  ;;  %v6117_v8 = vld [vmem:[#allocation8 + $0xf0] ss:$8 sps:$4 sm:$0xff]   ;;  %v6122_v48 = vld [vmem:[#allocation8 + $0x104] ss:$8 sps:$4 sm:$0xff]  }
 0x5e1   :  { %3264 = vmatmul.mubr.bf16.vlgmr.msra.gmra.mrb[16].mxu0 %v3186_v42  ;;  %3350 = vmatmul.mubr.bf16.vlgmr.msra.gmra.mrb[16].mxu1 %v3186_v42  ;;  %v6176_v42 = vld [vmem:[#allocation11 + $0x24] ss:$8 sps:$4 sm:$0xff]  }
 0x5e2   :  { %4078 = vmatpush1.bf16.msra.mxu1 %v6048_v36  ;;  %4109 = vmatprep.mubr.bf16.mxu1 %v6477_v61  ;;  %v6171_v36 = vld [vmem:[#allocation11 + $0x10] ss:$8 sps:$4 sm:$0xff]   ;;  %v6180_v61 = vld [vmem:[#allocation11 + $0x40] ss:$8 sps:$4 sm:$0xff]  }
 0x5e3   :  { %4079 = vmatprep.subr.bf16.mxu1 %v6053_v28  ;;  %3861 = vmatpush1.bf16.msra.mxu0 %v6072_v53  ;;  %v6174_v28 = vld [vmem:[#allocation11 + $0x20] ss:$8 sps:$4 sm:$0xff]   ;;  %v6179_v53 = vld [vmem:[#allocation11 + $0x34] ss:$8 sps:$4 sm:$0xff]  }
 0x5e4   :  { %3862 = vmatprep.subr.bf16.mxu0 %v6077_v59  ;;  %v6177_v59 = vld [vmem:[#allocation11 + $0x30] ss:$8 sps:$4 sm:$0xff]  }
 0x5e6   :  { %4080 = vmatpush1.bf16.msra.mxu1 %v6051_v20  ;;  %v6182_v20 = vld [vmem:[#allocation11 + $0x44] ss:$8 sps:$4 sm:$0xff]  }
 0x5e7   :  { %4081 = vmatprep.subr.bf16.mxu1 %v6056_v10  ;;  %3863 = vmatpush1.bf16.msra.mxu0 %v6075_v7  ;;  %v6185_v10 = vld [vmem:[#allocation11 + $0x54] ss:$8 sps:$4 sm:$0xff]   ;;  %v6183_v7 = vld [vmem:[#allocation11 + $0x50] ss:$8 sps:$4 sm:$0xff]  }
 0x5e8   :  { %3864 = vmatprep.subr.bf16.mxu0 %v6080_v63  ;;  %v6188_v63 = vld [vmem:[#allocation11 + $0x64] ss:$8 sps:$4 sm:$0xff]  }
 0x5ea   :  { %4082 = vmatpush1.bf16.msra.mxu1 %v6054_v3  ;;  %v6186_v3 = vld [vmem:[#allocation11 + $0x60] ss:$8 sps:$4 sm:$0xff]  }
 0x5eb   :  { %4083 = vmatprep.subr.bf16.mxu1 %v6059_v5  ;;  %3865 = vmatpush1.bf16.msra.mxu0 %v6078_v19  ;;  %v6191_v5 = vld [vmem:[#allocation11 + $0x74] ss:$8 sps:$4 sm:$0xff]   ;;  %v6189_v19 = vld [vmem:[#allocation11 + $0x70] ss:$8 sps:$4 sm:$0xff]  }
 0x5ec   :  { %3866 = vmatprep.subr.bf16.mxu0 %v6083_v9  ;;  %v6194_v9 = vld [vmem:[#allocation11 + $0x84] ss:$8 sps:$4 sm:$0xff]  }
 0x5ee   :  { %4084 = vmatpush1.bf16.msra.mxu1 %v6057_v11 }
 0x5ef   :  { %4085 = vmatprep.subr.bf16.mxu1 %v6062_v14  ;;  %3867 = vmatpush1.bf16.msra.mxu0 %v6081_v16  ;;  %v6192_v16 = vld [vmem:[#allocation11 + $0x80] ss:$8 sps:$4 sm:$0xff]  }
 0x5f0   :  { %3868 = vmatprep.subr.bf16.mxu0 %v6086_v18 }
 0x5f2   :  { %4086 = vmatpush1.bf16.msra.mxu1 %v6060_v21 }
 0x5f3   :  { %4087 = vmatprep.subr.bf16.mxu1 %v6065_v23  ;;  %3869 = vmatpush1.bf16.msra.mxu0 %v6084_v25 }
 0x5f4   :  { %3870 = vmatprep.subr.bf16.mxu0 %v6089_v27  ;;  %v6197_v27 = vld [vmem:[#allocation11 + $0x94] ss:$8 sps:$4 sm:$0xff]  }
 0x5f6   :  { %4088 = vmatpush1.bf16.msra.mxu1 %v6063_v31 }
 0x5f7   :  { %4089 = vmatprep.subr.bf16.mxu1 %v6068_v34  ;;  %3871 = vmatpush1.bf16.msra.mxu0 %v6087_v38 }
 0x5f8   :  { %3872 = vmatprep.subr.bf16.mxu0 %v6092_v40 }
 0x5fa   :  { %4090 = vmatpush1.bf16.msra.mxu1 %v6066_v43  ;;  %v6195_v43 = vld [vmem:[#allocation11 + $0x90] ss:$8 sps:$4 sm:$0xff]  }
 0x5fb   :  { %4091 = vmatprep.subr.bf16.mxu1 %v6071_v46  ;;  %3873 = vmatpush1.bf16.msra.mxu0 %v6090_v50 }
 0x5fc   :  { %3874 = vmatprep.subr.bf16.mxu0 %v6095_v52 }
 0x5fe   :  { %4092 = vmatpush1.bf16.msra.mxu1 %v6069_v29 }
 0x5ff   :  { %3875 = vmatpush1.bf16.msra.mxu0 %v6093_v62  ;;  %4280 = vmatprep.subr.bf16.mxu1 %v6170_v13 }
 0x600   :  { %3876 = vmatprep.subr.bf16.mxu0 %v6098_v51 }
 0x601   :  { %4110 = vmatmul.mubr.bf16.vlgmr.msra.gmra.mrb[20].mxu1 %v7676_v22 }
 0x602   :  { %4281 = vmatpush1.bf16.msra.mxu1 %v6168_v24 }
 0x603   :  { %3877 = vmatpush1.bf16.msra.mxu0 %v6096_v1  ;;  %4282 = vmatprep.subr.bf16.mxu1 %v6173_v54  ;;  %v7678_v54 = vld [vmem:[#allocation27_spill] sm:$0xff] }
 0x604   :  { %3878 = vmatprep.subr.bf16.mxu0 %v6101_v26  ;;  %v6200_v26 = vld [vmem:[#allocation11 + $0xa4] ss:$8 sps:$4 sm:$0xff]  }
 0x606   :  { %4283 = vmatpush1.bf16.msra.mxu1 %v6171_v36 }
 0x607   :  { %3879 = vmatpush1.bf16.msra.mxu0 %v6099_v32  ;;  %4284 = vmatprep.subr.bf16.mxu1 %v6176_v42  ;;  %v6204_v42 = vld [vmem:[#allocation11 + $0xc0] ss:$8 sps:$4 sm:$0xff]  }
 0x608   :  { %3880 = vmatprep.subr.bf16.mxu0 %v6104_v4 }
 0x60a   :  { %4285 = vmatpush1.bf16.msra.mxu1 %v6174_v28 }
 0x60b   :  { %3881 = vmatpush1.bf16.msra.mxu0 %v6102_v35  ;;  %4286 = vmatprep.subr.bf16.mxu1 %v6179_v53 }
 0x60c   :  { %3882 = vmatprep.subr.bf16.mxu0 %v6107_v37 }
 0x60e   :  { %4287 = vmatpush1.bf16.msra.mxu1 %v6177_v59  ;;  %v7679_v59 = vld [vmem:[#allocation103_spill] sm:$0xff] }
 0x60f   :  { %3883 = vmatpush1.bf16.msra.mxu0 %v6105_v39  ;;  %4288 = vmatprep.subr.bf16.mxu1 %v6182_v20  ;;  %v6198_v39 = vld [vmem:[#allocation11 + $0xa0] ss:$8 sps:$4 sm:$0xff]  }
 0x610   :  { %3884 = vmatprep.subr.bf16.mxu0 %v6110_v0  ;;  %v6203_v0 = vld [vmem:[#allocation11 + $0xb4] ss:$8 sps:$4 sm:$0xff]  }
 0x612   :  { %4289 = vmatpush1.bf16.msra.mxu1 %v6180_v61  ;;  %v6209_v61 = vld [vmem:[#allocation11 + $0xd4] ss:$8 sps:$4 sm:$0xff]  }
 0x613   :  { %3885 = vmatpush1.bf16.msra.mxu0 %v6108_v55  ;;  %4290 = vmatprep.subr.bf16.mxu1 %v6185_v10  ;;  %v3392_v55 = vld [vmem:[%s7419_s7 + $0xf] sm:$0xf] }
 0x614   :  { %3886 = vmatprep.subr.bf16.mxu0 %v6113_v60  ;;  %v6201_v60 = vld [vmem:[#allocation11 + $0xb0] ss:$8 sps:$4 sm:$0xff]   ;;  %v3401_v36 = vrot.slane %v3392_v55, %v7678_v54  ;;  %v3409_v20 = vrot.slane %v3392_v55, %v7679_v59 }
 0x616   :  { %4291 = vmatpush1.bf16.msra.mxu1 %v6183_v7 }
 0x617   :  { %3887 = vmatpush1.bf16.msra.mxu0 %v6111_v33  ;;  %4292 = vmatprep.subr.bf16.mxu1 %v6188_v63  ;;  %v6206_v33 = vld [vmem:[#allocation11 + $0xc4] ss:$8 sps:$4 sm:$0xff]  }
 0x618   :  { %3888 = vmatprep.subr.bf16.mxu0 %v6116_v6  ;;  %v7677_v6 = vld [vmem:[#allocation26_spill] sm:$0xff] }
 0x61a   :  { %4293 = vmatpush1.bf16.msra.mxu1 %v6186_v3 }
 0x61b   :  { %3889 = vmatpush1.bf16.msra.mxu0 %v6114_v2  ;;  %4294 = vmatprep.subr.bf16.mxu1 %v6191_v5  ;;  %v3397_v2 = vrot.slane %v3392_v55, %v7677_v6 }
 0x61c   :  { %3890 = vmatprep.subr.bf16.mxu0 %v6119_v15 }
 0x61e   :  { %4295 = vmatpush1.bf16.msra.mxu1 %v6189_v19 }
 0x61f   :  { %3891 = vmatpush1.bf16.msra.mxu0 %v6117_v8  ;;  %4296 = vmatprep.subr.bf16.mxu1 %v6194_v9  ;;  %v3405_v8 = vrot.slane %v3392_v55, %v7164_v56  ;;  %v6123_v55 = vld [vmem:[#allocation8 + $0x110] ss:$8 sps:$4 sm:$0xff]  }
 0x620   :  { %3903 = vmatprep.subr.bf16.mxu0 %v6122_v48  ;;  %v3422_v48 = vld [vmem:[%s7419_s7 + $0x13] sm:$0xf] }
 0x621   :  { %v3427_v3 = vrot.slane %v3422_v48, %v7677_v6 }
 0x622   :  { %4297 = vmatpush1.bf16.msra.mxu1 %v6192_v16  ;;  %v3431_v16 = vrot.slane %v3422_v48, %v7678_v54 }
 0x623   :  { %4298 = vmatprep.subr.bf16.mxu1 %v6197_v27 }
 0x626   :  { %4299 = vmatpush1.bf16.msra.mxu1 %v6195_v43 }
 0x627   :  { %4300 = vmatprep.subr.bf16.mxu1 %v6200_v26 }
 0x62a   :  { %4301 = vmatpush1.bf16.msra.mxu1 %v6198_v39 }
 0x62b   :  { %4302 = vmatprep.subr.bf16.mxu1 %v6203_v0  ;;  %v6125_v0 = vld [vmem:[#allocation8 + $0x114] ss:$8 sps:$4 sm:$0xff]  }
 0x62e   :  { %4303 = vmatpush1.bf16.msra.mxu1 %v6201_v60  ;;  %v6128_v60 = vld [vmem:[#allocation8 + $0x124] ss:$8 sps:$4 sm:$0xff]  }
 0x62f   :  { %4304 = vmatprep.subr.bf16.mxu1 %v6206_v33  ;;  %v6126_v33 = vld [vmem:[#allocation8 + $0x120] ss:$8 sps:$4 sm:$0xff]  }
 0x632   :  { %4305 = vmatpush1.bf16.msra.mxu1 %v6204_v42  ;;  %v6138_v42 = vld [vmem:[#allocation8 + $0x160] ss:$8 sps:$4 sm:$0xff]  }
 0x633   :  { %4306 = vmatprep.subr.bf16.mxu1 %v6209_v61  ;;  %v6149_v61 = vld [vmem:[#allocation8 + $0x194] ss:$8 sps:$4 sm:$0xff]  }
 0x6b4   :  { %v3265_v11 = vpop.f32.mrb[16].mxu0  ;;  %v3351_v14 = vpop.f32.mrb[16].mxu1 }
 0x6b5   :  { %v3360_v18 = vmax.f32 %v3265_v11, 0.0  ;;  %v3362_v21 = vmax.f32 %v3351_v14, 0.0  ;;  %v3267_v23 = vpop.f32.mrb[17].mxu0  ;;  %v3353_v25 = vpop.f32.mrb[17].mxu1 }
 0x6b6   :  { %v3361_v31 = vmax.f32 %v3267_v23, 0.0  ;;  %v3363_v34 = vmax.f32 %v3353_v25, 0.0  ;;  %v3269_v38 = vpop.f32.mrb[18].mxu0  ;;  %v3355_v40 = vpop.f32.mrb[18].mxu1  ;;  %v3439_v25 = vrot.slane %v3422_v48, %v7679_v59  ;;  %v6146_v59 = vld [vmem:[#allocation8 + $0x184] ss:$8 sps:$4 sm:$0xff]  }
 0x6b7   :  { %v3368_v46 = vadd.f32 1e-05, %v3360_v18  ;;  %v3370_v50 = vadd.f32 1e-05, %v3362_v21  ;;  %v3364_v52 = vmax.f32 %v3269_v38, 0.0  ;;  %v3366_v29 = vmax.f32 %v3355_v40, 0.0 }
 0x6b8   :  { %v3369_v62 = vadd.f32 1e-05, %v3361_v31  ;;  %v3371_v51 = vadd.f32 1e-05, %v3363_v34  ;;  %v3271_v1 = vpop.f32.mrb[19].mxu0  ;;  %v3357_v12 = vpop.f32.mrb[19].mxu1 }
 0x6b9   :  { %6280 = vrsqrt.f32 %v3368_v46  ;;  %v3372_v17 = vadd.f32 1e-05, %v3364_v52  ;;  %v3365_v22 = vmax.f32 %v3271_v1, 0.0  ;;  %v3374_v32 = vadd.f32 1e-05, %v3366_v29 }
 0x6ba   :  { %6282 = vrsqrt.f32 %v3370_v50  ;;  %v3367_v4 = vmax.f32 %v3357_v12, 0.0  ;;  %v6207_v18 = vld [vmem:[#allocation11 + $0xd0] ss:$8 sps:$4 sm:$0xff]  }
 0x6bb   :  { %6284 = vrsqrt.f32 %v3369_v62  ;;  %v3373_v35 = vadd.f32 1e-05, %v3365_v22  ;;  %4307 = vmatpush1.bf16.msra.mxu1 %v6207_v18  ;;  %v6165_v18 = vld [vmem:[#allocation8 + $0x1f0] ss:$8 sps:$4 sm:$0xff]  }
 0x6bc   :  { %6286 = vrsqrt.f32 %v3371_v51  ;;  %v3375_v37 = vadd.f32 1e-05, %v3367_v4 }
 0x6bd   :  { %6288 = vrsqrt.f32 %v3372_v17 }
 0x6be   :  { %6290 = vrsqrt.f32 %v3374_v32 }
 0x6bf   :  { %6292 = vrsqrt.f32 %v3373_v35 }
 0x6c0   :  { %6294 = vrsqrt.f32 %v3375_v37  ;;  %v6120_v37 = vld [vmem:[#allocation8 + $0x100] ss:$8 sps:$4 sm:$0xff]  }
 0x6c3   :  { %v6281_v15 = vpop.eup %6280 }
 0x6c4   :  { %v6283_v24 = vpop.eup %6282  ;;  %v3384_v13 = vmul.f32 %v6281_v15, %v7254_v30  ;;  %v3435_v30 = vrot.slane %v3422_v48, %v7164_v56  ;;  %v6129_v15 = vld [vmem:[#allocation8 + $0x130] ss:$8 sps:$4 sm:$0xff]   ;;  %v6132_v48 = vld [vmem:[#allocation8 + $0x140] ss:$8 sps:$4 sm:$0xff]  }
 0x6c5   :  { %v6285_v28 = vpop.eup %6284  ;;  %v3386_v53 = vmul.f32 %v6283_v24, %v7342_v57  ;;  %v6137_v24 = vld [vmem:[#allocation8 + $0x154] ss:$8 sps:$4 sm:$0xff]  }
 0x6c6   :  { %v6287_v10 = vpop.eup %6286  ;;  %v3385_v7 = vmul.f32 %v6285_v28, %v7249_v45  ;;  %v3414_v63 = vmul.f32 %v3397_v2, %v3384_v13  ;;  %v6135_v13 = vld [vmem:[#allocation8 + $0x150] ss:$8 sps:$4 sm:$0xff]   ;;  %v6143_v28 = vld [vmem:[#allocation8 + $0x174] ss:$8 sps:$4 sm:$0xff]  }
 0x6c7   :  { %v6289_v5 = vpop.eup %6288  ;;  %v3387_v19 = vmul.f32 %v6287_v10, %v7266_v49  ;;  %v3416_v9 = vmul.f32 %v3405_v8, %v3386_v53  ;;  %v6141_v53 = vld [vmem:[#allocation8 + $0x170] ss:$8 sps:$4 sm:$0xff]  }
 0x6c8   :  { %v6291_v11 = vpop.eup %6290  ;;  %v3388_v14 = vmul.f32 %v6289_v5, %v7257_v58  ;;  %v3415_v57 = vmul.f32 %v3401_v36, %v3385_v7  ;;  %v3444_v31 = vadd.f32 %v3427_v3, %v3414_v63  ;;  %v6147_v10 = vld [vmem:[#allocation8 + $0x190] ss:$8 sps:$4 sm:$0xff]   ;;  %v6152_v7 = vld [vmem:[#allocation8 + $0x1a4] ss:$8 sps:$4 sm:$0xff]   ;;  %v6150_v63 = vld [vmem:[#allocation8 + $0x1a0] ss:$8 sps:$4 sm:$0xff]  }
 0x6c9   :  { %v6293_v21 = vpop.eup %6292  ;;  %v3390_v45 = vmul.f32 %v6291_v11, %v7336_v41  ;;  %v3417_v23 = vmul.f32 %v3409_v20, %v3387_v19  ;;  %v3446_v38 = vadd.f32 %v3435_v30, %v3416_v9  ;;  %v6153_v5 = vld [vmem:[#allocation8 + $0x1b0] ss:$8 sps:$4 sm:$0xff]   ;;  %v6156_v19 = vld [vmem:[#allocation8 + $0x1c0] ss:$8 sps:$4 sm:$0xff]   ;;  %v6161_v9 = vld [vmem:[#allocation8 + $0x1d4] ss:$8 sps:$4 sm:$0xff]  }
 0x6ca   :  { %v6295_v27 = vpop.eup %6294  ;;  %v3389_v56 = vmul.f32 %v6293_v21, %v7260_v44  ;;  %v3418_v49 = vmul.f32 %v3397_v2, %v3388_v14  ;;  %v3445_v43 = vadd.f32 %v3431_v16, %v3415_v57  ;;  %v3452_v62 = vmax.f32 %v3444_v31, 0.0  ;;  %v6131_v2 = vld [vmem:[#allocation8 + $0x134] ss:$8 sps:$4 sm:$0xff]   ;;  %v6159_v11 = vld [vmem:[#allocation8 + $0x1d0] ss:$8 sps:$4 sm:$0xff]  }
 0x6cb   :  { %v3391_v34 = vmul.f32 %v6295_v27, %v7263_v47  ;;  %v3420_v58 = vmul.f32 %v3405_v8, %v3390_v45  ;;  %v3447_v52 = vadd.f32 %v3439_v25, %v3417_v23  ;;  %v3454_v12 = vmax.f32 %v3446_v38, 0.0  ;;  %v6134_v8 = vld [vmem:[#allocation8 + $0x144] ss:$8 sps:$4 sm:$0xff]   ;;  %v6162_v57 = vld [vmem:[#allocation8 + $0x1e0] ss:$8 sps:$4 sm:$0xff]  }
 0x6cc   :  { %v3419_v40 = vmul.f32 %v3401_v36, %v3389_v56  ;;  %v3448_v46 = vadd.f32 %v3427_v3, %v3418_v49  ;;  %v3453_v44 = vmax.f32 %v3445_v43, 0.0  ;;  %v6140_v36 = vld [vmem:[#allocation8 + $0x164] ss:$8 sps:$4 sm:$0xff]   ;;  %v6155_v3 = vld [vmem:[#allocation8 + $0x1b4] ss:$8 sps:$4 sm:$0xff]  }
 0x6cd   :  { %v3421_v50 = vmul.f32 %v3409_v20, %v3391_v34  ;;  %v3450_v41 = vadd.f32 %v3435_v30, %v3420_v58  ;;  %v3455_v32 = vmax.f32 %v3447_v52, 0.0  ;;  %v6144_v20 = vld [vmem:[#allocation8 + $0x180] ss:$8 sps:$4 sm:$0xff]   ;;  %v6158_v30 = vld [vmem:[#allocation8 + $0x1c4] ss:$8 sps:$4 sm:$0xff]  }
 0x6ce   :  { %v3449_v29 = vadd.f32 %v3431_v16, %v3419_v40  ;;  %v3456_v51 = vmax.f32 %v3448_v46, 0.0  ;;  %v6164_v14 = vld [vmem:[#allocation8 + $0x1e4] ss:$8 sps:$4 sm:$0xff]   ;;  %v6167_v16 = vld [vmem:[#allocation8 + $0x1f4] ss:$8 sps:$4 sm:$0xff]  }
 0x6cf   :  { %v3451_v1 = vadd.f32 %v3439_v25, %v3421_v50  ;;  %v3458_v17 = vmax.f32 %v3450_v41, 0.0  ;;  %v6212_v21 = vld [vmem:[#allocation11 + $0xe4] ss:$8 sps:$4 sm:$0xff]   ;;  %v6210_v45 = vld [vmem:[#allocation11 + $0xe0] ss:$8 sps:$4 sm:$0xff]  }
 0x6d0   :  { %v3457_v22 = vmax.f32 %v3449_v29, 0.0  ;;  %v3460_v26 = vpack.c.bf16 %v3456_v51, %v3452_v62  ;;  %4308 = vmatprep.subr.bf16.mxu1 %v6212_v21  ;;  %v6215_v23 = vld [vmem:[#allocation11 + $0xf4] ss:$8 sps:$4 sm:$0xff]   ;;  %v6213_v25 = vld [vmem:[#allocation11 + $0xf0] ss:$8 sps:$4 sm:$0xff]  }
 0x6d1   :  { %v3459_v47 = vmax.f32 %v3451_v1, 0.0  ;;  %v7379_v4 = vpack.c.bf16 %v3458_v17, %v3454_v12  ;;  %4309 = vmatpush1.bf16.msra.mxu1 %v6210_v45  ;;  %v6218_v27 = vld [vmem:[#allocation11 + $0x184] ss:$8 sps:$4 sm:$0xff]   ;;  %v3528_v56 = vld [vmem:[%s7419_s7 + $0x4] sm:$0x3] }
 0x6d2   :  { %v3461_v35 = vpack.c.bf16 %v3457_v22, %v3453_v44  ;;  %4310 = vmatprep.subr.bf16.mxu1 %v6215_v23  ;;  %v3533_v49 = vrot.slane %v3528_v56, %v7677_v6  ;;  %v3537_v34 = vrot.slane %v3528_v56, %v7678_v54  ;;  %v6216_v62 = vld [vmem:[#allocation11 + $0x180] ss:$8 sps:$4 sm:$0xff]   ;;  %v6221_v51 = vld [vmem:[#allocation11 + $0x194] ss:$8 sps:$4 sm:$0xff]   ;;  %v6219_v1 = vld [vmem:[#allocation11 + $0x190] ss:$8 sps:$4 sm:$0xff]  }
 0x6d3   :  { %v3463_v39 = vpack.c.bf16 %v3459_v47, %v3455_v32  ;;  %v6224_v12 = vld [vmem:[#allocation11 + $0x1a4] ss:$8 sps:$4 sm:$0xff]   ;;  %v6222_v17 = vld [vmem:[#allocation11 + $0x1a0] ss:$8 sps:$4 sm:$0xff]   ;;  %v6227_v44 = vld [vmem:[#allocation11 + $0x1b4] ss:$8 sps:$4 sm:$0xff]  }
 0x6d4   :  { %3892 = vmatprep.mubr.bf16.mxu0 %v3461_v35  ;;  %v6225_v22 = vld [vmem:[#allocation11 + $0x1b0] ss:$8 sps:$4 sm:$0xff]   ;;  %v6228_v32 = vld [vmem:[#allocation11 + $0x1c0] ss:$8 sps:$4 sm:$0xff]   ;;  %v6233_v47 = vld [vmem:[#allocation11 + $0x1d4] ss:$8 sps:$4 sm:$0xff]  }
 0x6d5   :  { %3893 = vmatmul.mubr.bf16.vlgmr.msra.gmra.mrb[20].mxu0 %v3460_v26  ;;  %4311 = vmatpush1.bf16.msra.mxu1 %v6213_v25  ;;  %v6230_v26 = vld [vmem:[#allocation11 + $0x1c4] ss:$8 sps:$4 sm:$0xff]  }
 0x6d6   :  { %3904 = vmatpush1.bf16.msra.mxu0 %v6120_v37  ;;  %3935 = vmatprep.mubr.bf16.mxu0 %v3463_v39  ;;  %v6236_v35 = vld [vmem:[#allocation11 + $0x1e4] ss:$8 sps:$4 sm:$0xff]   ;;  %v6234_v37 = vld [vmem:[#allocation11 + $0x1e0] ss:$8 sps:$4 sm:$0xff]   ;;  %v6239_v39 = vld [vmem:[#allocation11 + $0x1f4] ss:$8 sps:$4 sm:$0xff]  }
 0x6d7   :  { %3905 = vmatprep.subr.bf16.mxu0 %v6125_v0  ;;  %4549 = vmatprep.subr.bf16.mxu1 %v6218_v27  ;;  %v6237_v0 = vld [vmem:[#allocation11 + $0x1f0] ss:$8 sps:$4 sm:$0xff]  }
 0x6da   :  { %3906 = vmatpush1.bf16.msra.mxu0 %v6123_v55  ;;  %v6242_v55 = vld [vmem:[#allocation11 + $0x204] ss:$8 sps:$4 sm:$0xff]  }
 0x6db   :  { %3907 = vmatprep.subr.bf16.mxu0 %v6128_v60  ;;  %v6240_v60 = vld [vmem:[#allocation11 + $0x200] ss:$8 sps:$4 sm:$0xff]  }
 0x6de   :  { %3908 = vmatpush1.bf16.msra.mxu0 %v6126_v33  ;;  %v6245_v33 = vld [vmem:[#allocation11 + $0x214] ss:$8 sps:$4 sm:$0xff]  }
 0x6df   :  { %3909 = vmatprep.subr.bf16.mxu0 %v6131_v2  ;;  %v6243_v2 = vld [vmem:[#allocation11 + $0x210] ss:$8 sps:$4 sm:$0xff]  }
 0x6e2   :  { %3910 = vmatpush1.bf16.msra.mxu0 %v6129_v15  ;;  %v6248_v15 = vld [vmem:[#allocation11 + $0x224] ss:$8 sps:$4 sm:$0xff]  }
 0x6e3   :  { %3911 = vmatprep.subr.bf16.mxu0 %v6134_v8  ;;  %v6246_v8 = vld [vmem:[#allocation11 + $0x220] ss:$8 sps:$4 sm:$0xff]  }
 0x6e6   :  { %3912 = vmatpush1.bf16.msra.mxu0 %v6132_v48  ;;  %v6251_v48 = vld [vmem:[#allocation11 + $0x234] ss:$8 sps:$4 sm:$0xff]  }
 0x6e7   :  { %3913 = vmatprep.subr.bf16.mxu0 %v6137_v24  ;;  %v6249_v24 = vld [vmem:[#allocation11 + $0x230] ss:$8 sps:$4 sm:$0xff]  }
 0x6ea   :  { %3914 = vmatpush1.bf16.msra.mxu0 %v6135_v13  ;;  %v6254_v13 = vld [vmem:[#allocation11 + $0x244] ss:$8 sps:$4 sm:$0xff]  }
 0x6eb   :  { %3915 = vmatprep.subr.bf16.mxu0 %v6140_v36  ;;  %v6252_v36 = vld [vmem:[#allocation11 + $0x240] ss:$8 sps:$4 sm:$0xff]  }
 0x6ee   :  { %3916 = vmatpush1.bf16.msra.mxu0 %v6138_v42  ;;  %v6257_v42 = vld [vmem:[#allocation11 + $0x254] ss:$8 sps:$4 sm:$0xff]  }
 0x6ef   :  { %3917 = vmatprep.subr.bf16.mxu0 %v6143_v28  ;;  %v6255_v28 = vld [vmem:[#allocation11 + $0x250] ss:$8 sps:$4 sm:$0xff]  }
 0x6f2   :  { %3918 = vmatpush1.bf16.msra.mxu0 %v6141_v53  ;;  %v6260_v53 = vld [vmem:[#allocation11 + $0x264] ss:$8 sps:$4 sm:$0xff]  }
 0x6f3   :  { %3919 = vmatprep.subr.bf16.mxu0 %v6146_v59  ;;  %v6258_v59 = vld [vmem:[#allocation11 + $0x260] ss:$8 sps:$4 sm:$0xff]  }
 0x6f6   :  { %3920 = vmatpush1.bf16.msra.mxu0 %v6144_v20  ;;  %v6263_v20 = vld [vmem:[#allocation11 + $0x274] ss:$8 sps:$4 sm:$0xff]  }
 0x6f7   :  { %3921 = vmatprep.subr.bf16.mxu0 %v6149_v61  ;;  %v6261_v61 = vld [vmem:[#allocation11 + $0x270] ss:$8 sps:$4 sm:$0xff]  }
 0x6fa   :  { %3922 = vmatpush1.bf16.msra.mxu0 %v6147_v10  ;;  %v6264_v10 = vld [vmem:[#allocation10 + $0x140] sm:$0xff]  }
 0x6fb   :  { %3923 = vmatprep.subr.bf16.mxu0 %v6152_v7  ;;  %v6265_v7 = vld [vmem:[#allocation10 + $0x100] sm:$0xff]  }
 0x6fe   :  { %3924 = vmatpush1.bf16.msra.mxu0 %v6150_v63  ;;  %v6266_v63 = vld [vmem:[#allocation10 + $0x148] sm:$0xff]  }
 0x6ff   :  { %3925 = vmatprep.subr.bf16.mxu0 %v6155_v3  ;;  %v6267_v3 = vld [vmem:[#allocation10 + $0x108] sm:$0xff]  }
 0x702   :  { %3926 = vmatpush1.bf16.msra.mxu0 %v6153_v5  ;;  %v6268_v5 = vld [vmem:[#allocation10 + $0x150] sm:$0xff]  }
 0x703   :  { %3927 = vmatprep.subr.bf16.mxu0 %v6158_v30  ;;  %v6269_v30 = vld [vmem:[#allocation10 + $0x110] sm:$0xff]  }
 0x706   :  { %3928 = vmatpush1.bf16.msra.mxu0 %v6156_v19  ;;  %v6270_v19 = vld [vmem:[#allocation10 + $0x158] sm:$0xff]  }
 0x707   :  { %3929 = vmatprep.subr.bf16.mxu0 %v6161_v9  ;;  %v6271_v9 = vld [vmem:[#allocation10 + $0x118] sm:$0xff]  }
 0x70a   :  { %3930 = vmatpush1.bf16.msra.mxu0 %v6159_v11  ;;  %v6272_v11 = vld [vmem:[#allocation10 + $0x160] sm:$0xff]  }
 0x70b   :  { %3931 = vmatprep.subr.bf16.mxu0 %v6164_v14  ;;  %v6273_v14 = vld [vmem:[#allocation10 + $0x120] sm:$0xff]  }
 0x70e   :  { %3932 = vmatpush1.bf16.msra.mxu0 %v6162_v57  ;;  %v6274_v57 = vld [vmem:[#allocation10 + $0x168] sm:$0xff]  }
 0x70f   :  { %3933 = vmatprep.subr.bf16.mxu0 %v6167_v16  ;;  %v4323_v16 = vld [vmem:[%s7419_s7 + $0xa] sm:$0x3] }
 0x710   :  { %v4332_v21 = vrot.slane %v4323_v16, %v7678_v54 }
 0x712   :  { %3934 = vmatpush1.bf16.msra.mxu0 %v6165_v18  ;;  %v4328_v18 = vrot.slane %v4323_v16, %v7677_v6 }
 0x713   :  { %5349 = vmatprep.subr.bf16.mxu0 %v6264_v10 }
 0x715   :  { %3936 = vmatmul.mubr.bf16.vlgmr.msra.gmra.mrb[20].mxu0 %v7379_v4  ;;  %v6231_v4 = vld [vmem:[#allocation11 + $0x1d0] ss:$8 sps:$4 sm:$0xff]  }
 0x716   :  { %5350 = vmatpush3.bf16.msra.mxu0 %v6265_v7 }
 0x717   :  { %5351 = vmatprep.subr.bf16.mxu0 %v6266_v63 }
 0x71a   :  { %5352 = vmatpush3.bf16.msra.mxu0 %v6267_v3 }
 0x71b   :  { %5353 = vmatprep.subr.bf16.mxu0 %v6268_v5 }
 0x71e   :  { %5354 = vmatpush3.bf16.msra.mxu0 %v6269_v30 }
 0x71f   :  { %5355 = vmatprep.subr.bf16.mxu0 %v6270_v19 }
 0x722   :  { %5356 = vmatpush3.bf16.msra.mxu0 %v6271_v9 }
 0x723   :  { %5357 = vmatprep.subr.bf16.mxu0 %v6272_v11 }
 0x726   :  { %5358 = vmatpush3.bf16.msra.mxu0 %v6273_v14 }
 0x727   :  { %5359 = vmatprep.subr.bf16.mxu0 %v6274_v57 }
 0x7e8   :  { %v3937_v31 = vpop.f32.mrb[20].mxu0 }
 0x7e9   :  { %v3939_v58 = vpop.f32.mrb[21].mxu0  ;;  %v5459_v40 = vadd.f32 %v3937_v31, %v3533_v49 }
 0x7ea   :  { %v3941_v38 = vpop.f32.mrb[22].mxu0  ;;  %v5460_v50 = vadd.f32 %v3939_v58, %v3537_v34 }
 0x7eb   :  { %v5461_v43 = vadd.f32 %v3941_v38, %v3533_v49  ;;  %v3943_v46 = vpop.f32.mrb[23].mxu0 }
 0x7ec   :  { %v5462_v52 = vadd.f32 %v3943_v46, %v3537_v34 }
 0x7ed   :  { %v3946_v41 = vpack.c.bf16 %v5461_v43, %v5459_v40 }
 0x7ee   :  { %v3947_v29 = vpack.c.bf16 %v5462_v52, %v5460_v50  ;;  %v6275_v52 = vld [vmem:[#allocation10 + $0x128] sm:$0xff]  }
 0x7ef   :  { %5360 = vmatpush3.bf16.msra.mxu0 %v6275_v52 }
 0x7f0   :  { %4312 = vmatprep.mubr.bf16.mxu1 %v3947_v29  ;;  %v6277_v29 = vld [vmem:[#allocation10 + $0x130] sm:$0xff]  }
 0x7f1   :  { %4313 = vmatmul.mubr.bf16.vlgmr.msra.gmra.mrb[20].mxu1 %v3946_v41  ;;  %v6276_v41 = vld [vmem:[#allocation10 + $0x170] sm:$0xff]  }
 0x7f2   :  { %4550 = vmatpush1.bf16.msra.mxu1 %v6216_v62  ;;  %5361 = vmatprep.subr.bf16.mxu0 %v6276_v41  ;;  %v6278_v62 = vld [vmem:[#allocation10 + $0x178] sm:$0xff]  }
 0x7f3   :  { %4551 = vmatprep.subr.bf16.mxu1 %v6221_v51  ;;  %5362 = vmatpush3.bf16.msra.mxu0 %v6277_v29  ;;  %v6279_v51 = vld [vmem:[#allocation10 + $0x138] sm:$0xff]  }
 0x7f4   :  { %5363 = vmatprep.subr.bf16.mxu0 %v6278_v62 }
 0x7f6   :  { %4552 = vmatpush1.bf16.msra.mxu1 %v6219_v1  ;;  %v4377_v1 = vld [vmem:[%s7419_s7 + $0xc] sm:$0x3] }
 0x7f7   :  { %4553 = vmatprep.subr.bf16.mxu1 %v6224_v12  ;;  %5364 = vmatpush3.bf16.msra.mxu0 %v6279_v51  ;;  %v4382_v12 = vrot.slane %v4377_v1, %v7677_v6  ;;  %v5296_v6 = vld [vmem:[%s7419_s7 + $0xe] ss:$0 sm:$0xff] }
 0x7fa   :  { %4554 = vmatpush1.bf16.msra.mxu1 %v6222_v17  ;;  %v4386_v17 = vrot.slane %v4377_v1, %v7678_v54 }
 0x7fb   :  { %4555 = vmatprep.subr.bf16.mxu1 %v6227_v44 }
 0x7fe   :  { %4556 = vmatpush1.bf16.msra.mxu1 %v6225_v22 }
 0x7ff   :  { %4557 = vmatprep.subr.bf16.mxu1 %v6230_v26 }
 0x802   :  { %4558 = vmatpush1.bf16.msra.mxu1 %v6228_v32 }
 0x803   :  { %4559 = vmatprep.subr.bf16.mxu1 %v6233_v47 }
 0x806   :  { %4560 = vmatpush1.bf16.msra.mxu1 %v6231_v4 }
 0x807   :  { %4561 = vmatprep.subr.bf16.mxu1 %v6236_v35 }
 0x80a   :  { %4562 = vmatpush1.bf16.msra.mxu1 %v6234_v37 }
 0x80b   :  { %4563 = vmatprep.subr.bf16.mxu1 %v6239_v39 }
 0x80e   :  { %4564 = vmatpush1.bf16.msra.mxu1 %v6237_v0 }
 0x80f   :  { %4565 = vmatprep.subr.bf16.mxu1 %v6242_v55 }
 0x812   :  { %4566 = vmatpush1.bf16.msra.mxu1 %v6240_v60 }
 0x813   :  { %4567 = vmatprep.subr.bf16.mxu1 %v6245_v33 }
 0x816   :  { %4568 = vmatpush1.bf16.msra.mxu1 %v6243_v2 }
 0x817   :  { %4569 = vmatprep.subr.bf16.mxu1 %v6248_v15 }
 0x81a   :  { %4570 = vmatpush1.bf16.msra.mxu1 %v6246_v8 }
 0x81b   :  { %4571 = vmatprep.subr.bf16.mxu1 %v6251_v48 }
 0x81e   :  { %4572 = vmatpush1.bf16.msra.mxu1 %v6249_v24 }
 0x81f   :  { %4573 = vmatprep.subr.bf16.mxu1 %v6254_v13 }
 0x822   :  { %4574 = vmatpush1.bf16.msra.mxu1 %v6252_v36 }
 0x823   :  { %4575 = vmatprep.subr.bf16.mxu1 %v6257_v42 }
 0x826   :  { %4576 = vmatpush1.bf16.msra.mxu1 %v6255_v28 }
 0x827   :  { %4577 = vmatprep.subr.bf16.mxu1 %v6260_v53 }
 0x82a   :  { %4578 = vmatpush1.bf16.msra.mxu1 %v6258_v59 }
 0x82b   :  { %4579 = vmatprep.subr.bf16.mxu1 %v6263_v20 }
 0x82e   :  { %4580 = vmatpush1.bf16.msra.mxu1 %v6261_v61 }
 0x8c4   :  { %v4314_v45 = vpop.f32.mrb[20].mxu1 }
 0x8c5   :  { %v4335_v23 = vadd.f32 %v4328_v18, %v4314_v45  ;;  %v4316_v25 = vpop.f32.mrb[21].mxu1 }
 0x8c6   :  { %v4336_v27 = vadd.f32 %v4332_v21, %v4316_v25  ;;  %v4318_v56 = vpop.f32.mrb[22].mxu1 }
 0x8c7   :  { %v4337_v49 = vadd.f32 %v4328_v18, %v4318_v56  ;;  %v4320_v31 = vpop.f32.mrb[23].mxu1  ;;  %v4339_v58 = vmax.f32 %v4335_v23, 0.0 }
 0x8c8   :  { %v4338_v34 = vadd.f32 %v4332_v21, %v4320_v31  ;;  %v4340_v40 = vmax.f32 %v4336_v27, 0.0 }
 0x8c9   :  { %v4341_v38 = vmax.f32 %v4337_v49, 0.0 }
 0x8ca   :  { %v4342_v43 = vmax.f32 %v4338_v34, 0.0 }
 0x8cb   :  { %v4343_v46 = vpack.c.bf16 %v4341_v38, %v4339_v58 }
 0x8cc   :  { %v4344_v50 = vpack.c.bf16 %v4342_v43, %v4340_v40 }
 0x8ce   :  { %4581 = vmatprep.mubr.bf16.mxu1 %v4344_v50 }
 0x8cf   :  { %4582 = vmatmul.mubr.bf16.vlgmr.msra.gmra.mrb[24].mxu1 %v4343_v46 }
 0x9a2   :  { %v4583_v44 = vpop.f32.mrb[24].mxu1 }
 0x9a3   :  { %v4584_v22 = vadd.f32 %v4583_v44, %v4382_v12  ;;  %v4585_v26 = vpop.f32.mrb[25].mxu1 }
 0x9a4   :  { %v4586_v32 = vadd.f32 %v4585_v26, %v4386_v17  ;;  %v4587_v47 = vpop.f32.mrb[26].mxu1 }
 0x9a5   :  { %v4588_v4 = vadd.f32 %v4587_v47, %v4382_v12  ;;  %v4589_v35 = vpop.f32.mrb[27].mxu1  ;;  %v4592_v39 = vmax.f32 %v4584_v22, 0.0 }
 0x9a6   :  { %v4590_v37 = vadd.f32 %v4589_v35, %v4386_v17  ;;  %v4593_v55 = vmax.f32 %v4586_v32, 0.0 }
 0x9a7   :  { %v4594_v0 = vmax.f32 %v4588_v4, 0.0 }
 0x9a8   :  { %v4595_v60 = vmax.f32 %v4590_v37, 0.0 }
 0x9a9   :  { %v4596_v33 = vpack.c.bf16 %v4594_v0, %v4592_v39 }
 0x9aa   :  { %v4597_v2 = vpack.c.bf16 %v4595_v60, %v4593_v55 }
 0x9ac   :  { %4765 = vmatprep.mubr.bf16.mxu0 %v4597_v2 }
 0x9ad   :  { %4766 = vmatmul.mubr.bf16.vlgmr.msra.gmra.mrb[24].mxu0 %v4596_v33 }
 0xa80   :  { %v5365_v15 = vpop.f32.mrb[24].mxu0 }
 0xa81   :  { %v5366_v54 = vpop.f32.mrb[25].mxu0 }
 0xa82   :  { %v5367_v8 = vadd.f32 %v5366_v54, %v5365_v15  ;;  %v5368_v48 = vpop.f32.mrb[26].mxu0 }
 0xa83   :  { %v5369_v24 = vpop.f32.mrb[27].mxu0 }
 0xa84   :  { %v4768_v13 = vadd.f32 %v5367_v8, %v5296_v6  ;;  %v5370_v36 = vadd.f32 %v5369_v24, %v5368_v48 }
 0xa86   :  { %4774 = vst [vmem:[#allocation13] sm:$0xff] %v4768_v13  ;;  %v4771_v42 = vadd.f32 %v5370_v36, %v5296_v6 }
 0xa88   :  { %4775 = vst [vmem:[#allocation13 + $0x8] sm:$0xff] %v4771_v42 }
 0xa89   :  { %4780 = vsyncadd [#allocation4], 224  ;;  %s6478_s24 = smov [#allocation13]  }
 0xa8a   :  { %s4781_s25 = sshll.u32 %s6478_s24, 4  ;;  %s4782_s25 = int_to_ptr.vmem [resolvable:$true] %s4781_s25 }
 0xa8b   :  { %s6428_s26 = scalar_lea.vmem %s4782_s25, 32  ;;  %s6432_s3 = scalar_lea.vmem %s4782_s25, 256 }
 0xa8c   :  { %p6429_p6 = scmp.ne.s32.totalorder %s4782_s25, %s6428_s26  ;;  %p6433_p7 = scmp.lt.s32.totalorder %s4782_s25, %s4782_s25 }
 0xa8d   :  { %p6434_p8 = scmp.lt.s32.totalorder %s6432_s3, %s6428_s26 }
 0xa8f   :  { %p6435_p9 = por %p6434_p8, %p6433_p7 }
 0xa91   :  { %p6436_p10 = pnand %p6435_p9, %p6429_p6 }
 0xa93   :  { %6439 = shalt.err (!%p6436_p10)
}
 0xa94   :  { %s6440_s16 = scalar_lea.hbm %s7420_s8, 32 }
 0xa95   :  { %p6441_p11 = scmp.ne.s32.totalorder %s7420_s8, %s6440_s16  ;;  %p6444_p12 = scmp.lt.u32.totalorder %s6440_s16, %s7420_s8 }
 0xa97   :  { %p6446_p13 = pnand %p6444_p12, %p6441_p11 }
 0xa99   :  { %6449 = shalt.err (!%p6446_p13)
}
 0xa9a   :  { %s6479_s10 = smov 32   ;;  %s6480_s12 = smov 2  }
 0xa9b   :  { %4787 = dma.vmem_to_hbm [thread:$0]  %s4782_s25, 32, %s7420_s8, [#allocation4], %s6479_s10, %s6479_s10, %s6480_s12  }
 0xa9c   :  { %6458 = dma.done.wait [#allocation4], 256  }
 0xa9d   :  { %6459 = vsyncadd [#allocation4], 4294967040 }
 0xa9e   :  { %4791 = vsyncpa [#allocation3], 1 }
 0xa9f   :  { %4792 = vsyncpa [#allocation6], 1 }
 0xaa0   :  { %4793 = vsyncpa [#allocation9], 1 }
 0xaa1   :  { %4794 = vsyncpa [#allocation12], 1 }
 0xaa2   :  { %4795 = vsyncpa [#allocation4], 1 }

</bundles_post_ra>
